<compile_context>
chip_gen: v6e
topology: v6e:2x2x1
jax: 0.10.0
libtpu: 0.0.40
codegen_flags: <defaults>
</compile_context>

<pallas_src>
import functools

import jax
import jax.numpy as jnp
from jax.experimental import pallas as pl
from jax.experimental.pallas import tpu as pltpu


def _smooth_l1(d):
    ad = jnp.abs(d)
    return jnp.where(ad < 1.0, 0.5 * d * d, ad - 0.5)


def _sum_all(x):
    # full reduction kept as an explicit lane-then-sublane reduce -> (1, 1) vreg value
    return jnp.sum(jnp.sum(x, axis=1, keepdims=True), axis=0, keepdims=True)


# ----------------------------------------------------------------------------
# Fused match + loss kernel (one grid step per batch element)
# ----------------------------------------------------------------------------
def _multibox_kernel(gt_ref, gtt_ref, priors_ref, preds_ref, stats_ref, *,
                     num_objs, num_classes, threshold, var1, neg_pos_ratio,
                     compute_nme):
    P = priors_ref.shape[1]
    O = gt_ref.shape[1]              # padded object count (multiple of 8)
    C = num_classes

    # ------- prior features (per-prior transcendentals precomputed in glue) -------
    pc = priors_ref[0:2, :]          # (2,P) cx, cy
    inv_v0 = priors_ref[4:6, :]      # (2,P) 1/(var0*w), 1/(var0*h)
    log_pwh = priors_ref[6:8, :]     # (2,P) log w, log h
    pcx = priors_ref[0:1, :]; pcy = priors_ref[1:2, :]
    pw = priors_ref[2:3, :];  ph = priors_ref[3:4, :]
    px1 = pcx - 0.5 * pw; py1 = pcy - 0.5 * ph
    px2 = pcx + 0.5 * pw; py2 = pcy + 0.5 * ph

    # ---------------- match ground truth boxes to priors ----------------
    gt = gt_ref[0]                   # (O, 15): [x1 y1 x2 y2 | 10 landm | label]
    tx1 = gt[:, 0:1]; ty1 = gt[:, 1:2]; tx2 = gt[:, 2:3]; ty2 = gt[:, 3:4]

    iw = jnp.maximum(jnp.minimum(tx2, px2) - jnp.maximum(tx1, px1), 0.0)
    ih = jnp.maximum(jnp.minimum(ty2, py2) - jnp.maximum(ty1, py1), 0.0)
    inter = iw * ih
    area_t = (tx2 - tx1) * (ty2 - ty1)          # (O, 1)
    area_p = (px2 - px1) * (py2 - py1)          # (1, P)
    # exact division kept here (IoU feeds threshold / argmax decisions)
    overlaps = inter / (area_t + area_p - inter)            # (O, P)

    lane_iota = jax.lax.broadcasted_iota(jnp.int32, (O, P), 1)
    obj_iota = jax.lax.broadcasted_iota(jnp.int32, (O, P), 0)
    real_row = obj_iota < num_objs               # glue-padded GT rows are inert

    best_prior_overlap = jnp.max(overlaps, axis=1, keepdims=True)   # (O,1)
    best_prior_idx = jnp.min(
        jnp.where(overlaps == best_prior_overlap, lane_iota, P),
        axis=1, keepdims=True)
    best_truth_overlap = jnp.max(overlaps, axis=0, keepdims=True)   # (1,P)
    best_truth_idx = jnp.min(
        jnp.where(overlaps == best_truth_overlap, obj_iota, O),
        axis=0, keepdims=True)

    valid_gt = best_prior_overlap >= 0.2                            # (O,1)
    num_valid = jnp.sum(valid_gt.astype(jnp.int32), axis=0, keepdims=True)   # (1,1)

    # bipartite override (emulates index_fill_ + the python "for j" loop, last j wins)
    forced = (best_prior_idx == lane_iota) & real_row               # (O,P)
    override_j = jnp.max(jnp.where(forced, obj_iota, -1), axis=0, keepdims=True)
    valid_forced = jnp.max(jnp.where(forced & valid_gt, 1, 0),
                           axis=0, keepdims=True) > 0
    best_truth_overlap = jnp.where(valid_forced, 2.0, best_truth_overlap)
    best_truth_idx = jnp.where(override_j >= 0, override_j, best_truth_idx)

    # one-shot gather of all 15 GT columns: (16, O) @ (O, P) on the MXU
    onehot = (best_truth_idx == obj_iota).astype(jnp.float32)       # (O, P)
    gathered = jnp.dot(gtt_ref[0], onehot,
                       preferred_element_type=jnp.float32)          # (16, P)

    conf_f = gathered[14:15, :]                                     # matched label
    conf_f = jnp.where(best_truth_overlap < threshold, 0.0, conf_f)
    conf_f = jnp.where(num_valid > 0, conf_f, 0.0)   # "no valid gt -> targets = 0"

    pos = conf_f != 0.0          # label != 0  (loc + conf losses)
    pos1 = conf_f > 0.0          # label  > 0  (landmark loss + NME)
    nposf = jnp.sum(pos.astype(jnp.float32), axis=1, keepdims=True)     # (1,1)
    npos1f = jnp.sum(pos1.astype(jnp.float32), axis=1, keepdims=True)   # (1,1)

    pred = preds_ref[0]          # (K_pad, P): loc 0:4 | conf 4:4+C | landm 4+C:14+C
    inv_var1 = 1.0 / var1

    # ---------------- localization smooth-L1 (stacked (4,P), positives) ----------------
    m_xy1 = gathered[0:2, :]                                        # (2,P) x1,y1
    m_xy2 = gathered[2:4, :]                                        # (2,P) x2,y2
    g_cen = ((m_xy1 + m_xy2) * 0.5 - pc) * inv_v0                   # (2,P)
    # clamp only ever bites on priors that are masked out by `pos` below (degenerate match)
    g_wh = (jnp.log(jnp.maximum(m_xy2 - m_xy1, 1e-20)) - log_pwh) * inv_var1  # (2,P)
    g_loc = jnp.concatenate([g_cen, g_wh], axis=0)                  # (4,P)
    loc_sl1 = _smooth_l1(pred[0:4, :] - g_loc)                      # (4,P)
    loc_loss = _sum_all(jnp.where(pos, loc_sl1, 0.0))

    # ---------------- landmark smooth-L1 (stacked (10,P), label > 0) ----------------
    pc5 = jnp.concatenate([pc] * 5, axis=0)                         # (10,P)
    inv5 = jnp.concatenate([inv_v0] * 5, axis=0)                    # (10,P)
    g_lm = (gathered[4:14, :] - pc5) * inv5                         # (10,P)
    lm_d = pred[4 + C:14 + C, :] - g_lm                             # (10,P)
    landm_loss = _sum_all(jnp.where(pos1, _smooth_l1(lm_d), 0.0))

    # ---------------- NME diagnostic (optional; 6 sqrt + 1 recip on the EUP) -------
    if compute_nme:
        sq = lm_d * lm_d
        pair = [sq[2 * i:2 * i + 1, :] + sq[2 * i + 1:2 * i + 2, :] for i in range(5)]
        norms = jnp.sqrt(jnp.concatenate(pair, axis=0))             # (5,P) batched sqrt
        pe = jnp.sum(norms, axis=0, keepdims=True) * 0.2            # mean over 5 points
        d01 = g_lm[0:2, :] - g_lm[2:4, :]
        inter_oc = jnp.sqrt(jnp.sum(d01 * d01, axis=0, keepdims=True))
        # TODO(synk): approx reciprocal (~2^-12 rel err) vs torch exact division (diagnostic)
        nme_per = pe * pl.reciprocal(inter_oc, approx=True)
        nme_sum = _sum_all(jnp.where(pos1, nme_per, 0.0))
    else:
        nme_sum = jnp.zeros((1, 1), jnp.float32)

    # ---------------- confidence CE + hard negative mining ----------------
    conf_pred = pred[4:4 + C, :]                                    # (C, P)
    cmx = jnp.max(conf_pred, axis=0, keepdims=True)
    lse = jnp.log(jnp.sum(jnp.exp(conf_pred - cmx), axis=0, keepdims=True)) + cmx
    # RetinaFace sets conf_t[pos] = 1 before the CE gather; negatives gather class 0
    gathered_logit = jnp.where(pos, conf_pred[1:2, :], conf_pred[0:1, :])
    closs = lse - gathered_logit                                    # (1, P)
    closs_mine = jnp.maximum(jnp.where(pos, 0.0, closs), 0.0)

    num_neg = jnp.minimum(jnp.ceil(neg_pos_ratio * nposf),
                          float(P - 1)).astype(jnp.int32)           # (1,1)

    # Exact top-num_neg selection in O(P): fully-unrolled bisection on the f32 bit
    # pattern (values >= 0 => int32 view is order preserving).  All bisection state is
    # kept as (1,1) int32 vregs -> no vector->scalar round trips in the serial chain.
    bits = pltpu.bitcast(closs_mine, jnp.int32)                     # (1, P)
    lo = jnp.full((1, 1), -1, jnp.int32)
    hi = jnp.full((1, 1), 0x7F800000, jnp.int32)
    for _ in range(32):                                             # unrolled
        mid = lo + ((hi - lo) >> 1)
        cnt = jnp.sum((bits > mid).astype(jnp.int32), axis=1, keepdims=True)
        go_up = cnt >= num_neg
        lo = jnp.where(go_up, mid, lo)
        hi = jnp.where(go_up, hi, mid)
    kth_bits = hi                                                   # (1,1)

    strict = bits > kth_bits
    ties = bits == kth_bits
    c_strict = jnp.sum(strict.astype(jnp.int32), axis=1, keepdims=True)
    r = num_neg - c_strict                       # ties still needed (>= 0), (1,1)

    lane_idx = jax.lax.broadcasted_iota(jnp.int32, (1, P), 1)
    lo = jnp.full((1, 1), -1, jnp.int32)
    hi = jnp.full((1, 1), P - 1, jnp.int32)
    for _ in range(max(1, int(P).bit_length())):                    # unrolled
        mid = lo + ((hi - lo) >> 1)
        cnt = jnp.sum((ties & (lane_idx <= mid)).astype(jnp.int32),
                      axis=1, keepdims=True)
        enough = cnt >= r
        lo = jnp.where(enough, lo, mid)
        hi = jnp.where(enough, mid, hi)
    cut = jnp.where(r > 0, hi, jnp.full((1, 1), -1, jnp.int32))

    neg = strict | (ties & (lane_idx <= cut))
    sel = pos | neg
    conf_loss = _sum_all(jnp.where(sel, closs, 0.0))

    # ---------------- write 6 per-batch partial sums (one unmasked 8x128 store) ----
    row = jax.lax.broadcasted_iota(jnp.int32, (8, 128), 0)
    zeros = jnp.zeros((8, 128), jnp.float32)
    stats_ref[0] = jnp.where(row == 0, loc_loss,
                   jnp.where(row == 1, landm_loss,
                   jnp.where(row == 2, conf_loss,
                   jnp.where(row == 3, nposf,
                   jnp.where(row == 4, npos1f,
                   jnp.where(row == 5, nme_sum, zeros))))))


# ----------------------------------------------------------------------------
# Plain-JAX glue mirroring MultiBoxLoss.forward
# ----------------------------------------------------------------------------
def multibox_loss(loc_preds, conf_preds, landm_preds, ground_truth, priors,
                  threshold=0.35, neg_pos_ratio=3, variance=(0.1, 0.2),
                  compute_nme=True, vmem_limit_bytes=64 * 1024 * 1024):
    B, P, C = conf_preds.shape
    num_objs = ground_truth.shape[1]
    assert P % 128 == 0, "num_priors must be a multiple of 128 (lane width)"
    assert C >= 2

    # pad GT rows to a multiple of 8 (>= 8); zero rows are inert (IoU 0, label 0)
    o_pad = max(8, ((num_objs + 7) // 8) * 8)
    gt = ground_truth
    if o_pad != num_objs:
        gt = jnp.pad(gt, ((0, 0), (0, o_pad - num_objs), (0, 0)))
    # transposed copy for the one-shot gather matmul, rows padded 15 -> 16
    gt_t = jnp.pad(jnp.transpose(gt, (0, 2, 1)), ((0, 0), (0, 1), (0, 0)))

    # prior feature slab (8, P): all per-prior divides/logs done once here by XLA
    pcx = priors[:, 0]; pcy = priors[:, 1]; pw = priors[:, 2]; ph = priors[:, 3]
    prior_feat = jnp.stack(
        [pcx, pcy, pw, ph,
         1.0 / (variance[0] * pw), 1.0 / (variance[0] * ph),
         jnp.log(pw), jnp.log(ph)], axis=0).astype(jnp.float32)     # (8, P)

    # single fused concat + transpose of all predictions -> (B, 14+C (pad 8x), P)
    preds = jnp.concatenate([loc_preds, conf_preds, landm_preds], axis=-1)
    k_tot = 14 + C
    k_pad = ((k_tot + 7) // 8) * 8
    preds_t = jnp.transpose(preds, (0, 2, 1))                       # (B, 14+C, P)
    if k_pad != k_tot:
        preds_t = jnp.pad(preds_t, ((0, 0), (0, k_pad - k_tot), (0, 0)))

    kernel = functools.partial(
        _multibox_kernel, num_objs=num_objs, num_classes=C, threshold=threshold,
        var1=variance[1], neg_pos_ratio=neg_pos_ratio, compute_nme=compute_nme)

    cost = pl.CostEstimate(
        flops=int(B * (14 * o_pad * P + 2 * 16 * o_pad * P + 250 * P)),
        transcendentals=int(B * P * (o_pad + 10 + C)),
        bytes_accessed=int(B * (k_pad * P * 4 + 31 * o_pad * 4 + 8 * 128 * 4)
                           + 8 * P * 4))

    stats = pl.pallas_call(
        kernel,
        out_shape=jax.ShapeDtypeStruct((B, 8, 128), jnp.float32),
        grid_spec=pltpu.PrefetchScalarGridSpec(
            num_scalar_prefetch=0,
            grid=(B,),
            in_specs=[pl.BlockSpec((1, o_pad, 15), lambda b: (b, 0, 0)),
                      pl.BlockSpec((1, 16, o_pad), lambda b: (b, 0, 0)),
                      pl.BlockSpec((8, P), lambda b: (0, 0)),
                      pl.BlockSpec((1, k_pad, P), lambda b: (b, 0, 0))],
            out_specs=pl.BlockSpec((1, 8, 128), lambda b: (b, 0, 0))),
        compiler_params=pltpu.CompilerParams(
            dimension_semantics=("parallel",),        # batch independent (2 TCs on v7x)
            vmem_limit_bytes=vmem_limit_bytes),
        cost_estimate=cost,
    )(gt, gt_t, prior_feat, preds_t)

    tot = jnp.sum(stats[:, :, 0], axis=0)                 # (8,), rows 0..5 used
    loc_sum, landm_sum, conf_sum = tot[0], tot[1], tot[2]
    num_pos, num_pos_landm, nme_sum = tot[3], tot[4], tot[5]

    N = jnp.maximum(num_pos, 1.0)
    N1 = jnp.maximum(num_pos_landm, 1.0)
    loc_loss = loc_sum / N
    conf_loss = conf_sum / N
    landm_loss = landm_sum / N1
    nme = nme_sum / num_pos_landm    # torch .mean() over selected rows (NaN if none, as in torch)
    return loc_loss, conf_loss, landm_loss, nme


# ----------------------------------------------------------------------------
# Deterministic synthetic setup
# ----------------------------------------------------------------------------
def make_priors():
    # 8x8 grid, 2 anchor sizes -> 128 priors, center-form (cx, cy, w, h)
    g = (jnp.arange(8, dtype=jnp.float32) + 0.5) / 8.0
    cx, cy = jnp.meshgrid(g, g, indexing="ij")
    cx = cx.reshape(-1)
    cy = cy.reshape(-1)
    priors = []
    for s in (0.15, 0.3):
        priors.append(jnp.stack([cx, cy, jnp.full_like(cx, s), jnp.full_like(cy, s)], axis=1))
    return jnp.concatenate(priors, axis=0)                # (128, 4)


def make_ground_truth(key, batch, num_objs):
    k1, k2 = jax.random.split(key)
    centers = jax.random.uniform(k1, (batch, num_objs, 2), minval=0.25, maxval=0.75)
    sizes = jax.random.uniform(k2, (batch, num_objs, 2), minval=0.15, maxval=0.35)
    x1y1 = centers - sizes / 2.0
    x2y2 = centers + sizes / 2.0
    boxes = jnp.concatenate([x1y1, x2y2], axis=-1)        # (B, num_objs, 4) corner form
    # 5 deterministic landmarks inside each box
    lms = []
    for i in range(5):
        lx = x1y1[..., 0:1] + sizes[..., 0:1] * (0.2 + 0.15 * i)
        ly = x1y1[..., 1:2] + sizes[..., 1:2] * (0.3 + 0.10 * i)
        lms += [lx, ly]
    lms = jnp.concatenate(lms, axis=-1)                   # (B, num_objs, 10)
    labels = jnp.ones((batch, num_objs, 1), jnp.float32)
    labels = labels.at[:, -1, 0].set(-1.0)                # one "ignore-landmark" object
    return jnp.concatenate([boxes, lms, labels], axis=-1)  # (B, num_objs, 15)


if __name__ == "__main__":
    B, P, C, num_objs = 2, 128, 2, 4
    key = jax.random.PRNGKey(0)
    k_loc, k_conf, k_lnm, k_gt = jax.random.split(key, 4)

    priors = make_priors()                                        # (128, 4)
    gt = make_ground_truth(k_gt, B, num_objs)                     # (2, 4, 15)
    loc_preds = 0.1 * jax.random.normal(k_loc, (B, P, 4), jnp.float32)
    conf_preds = jax.random.normal(k_conf, (B, P, C), jnp.float32)
    landm_preds = 0.1 * jax.random.normal(k_lnm, (B, P, 10), jnp.float32)

    loc_loss, conf_loss, landm_loss, nme = multibox_loss(
        loc_preds, conf_preds, landm_preds, gt, priors,
        threshold=0.35, neg_pos_ratio=3, variance=(0.1, 0.2))

    results = jax.block_until_ready((loc_loss, conf_loss, landm_loss, nme))
    assert all(bool(jnp.isfinite(r)) for r in results)
    print("KERNEL_OK")
</pallas_src>

<mosaic_0001>
module attributes {stable_mosaic.version = 11 : i64} {
  func.func @_multibox_kernel(%arg0: i32, %arg1: memref<1x8x15xf32, #tpu.memory_space<vmem>>, %arg2: memref<1x16x8xf32, #tpu.memory_space<vmem>>, %arg3: memref<8x128xf32, #tpu.memory_space<vmem>>, %arg4: memref<1x16x128xf32, #tpu.memory_space<vmem>>, %arg5: memref<1x8x128xf32, #tpu.memory_space<vmem>>) attributes {dimension_semantics = [#tpu.dimension_semantics<parallel>], iteration_bounds = array<i64: 2>, scalar_prefetch = 0 : i64, scratch_operands = 0 : i64, tpu.core_type = #tpu.core_type<tc>, window_params = [{transform_indices = @transform_0, window_bounds = array<i64: 1, 8, 15>}, {transform_indices = @transform_1, window_bounds = array<i64: 1, 16, 8>}, {pipeline_mode = #tpu.pipeline_mode<synchronous>, transform_indices = @transform_2, window_bounds = array<i64: 8, 128>}, {transform_indices = @transform_3, window_bounds = array<i64: 1, 16, 128>}, {transform_indices = @transform_4, window_bounds = array<i64: 1, 8, 128>}]} {
    %c0 = arith.constant 0 : index
    %c0_0 = arith.constant 0 : index
    %0 = vector.load %arg3[%c0, %c0_0] : memref<8x128xf32, #tpu.memory_space<vmem>>, vector<2x128xf32>
    %c4 = arith.constant 4 : index
    %c0_1 = arith.constant 0 : index
    %1 = vector.load %arg3[%c4, %c0_1] : memref<8x128xf32, #tpu.memory_space<vmem>>, vector<2x128xf32>
    %c6 = arith.constant 6 : index
    %c0_2 = arith.constant 0 : index
    %2 = vector.load %arg3[%c6, %c0_2] : memref<8x128xf32, #tpu.memory_space<vmem>>, vector<2x128xf32>
    %c0_3 = arith.constant 0 : index
    %c0_4 = arith.constant 0 : index
    %3 = vector.load %arg3[%c0_3, %c0_4] : memref<8x128xf32, #tpu.memory_space<vmem>>, vector<1x128xf32>
    %c1 = arith.constant 1 : index
    %c0_5 = arith.constant 0 : index
    %4 = vector.load %arg3[%c1, %c0_5] : memref<8x128xf32, #tpu.memory_space<vmem>>, vector<1x128xf32>
    %c2 = arith.constant 2 : index
    %c0_6 = arith.constant 0 : index
    %5 = vector.load %arg3[%c2, %c0_6] : memref<8x128xf32, #tpu.memory_space<vmem>>, vector<1x128xf32>
    %c3 = arith.constant 3 : index
    %c0_7 = arith.constant 0 : index
    %6 = vector.load %arg3[%c3, %c0_7] : memref<8x128xf32, #tpu.memory_space<vmem>>, vector<1x128xf32>
    %cst = arith.constant 5.000000e-01 : f32
    %7 = vector.broadcast %cst : f32 to vector<1x128xf32>
    %8 = arith.mulf %7, %5 : vector<1x128xf32>
    %9 = arith.subf %3, %8 : vector<1x128xf32>
    %cst_8 = arith.constant 5.000000e-01 : f32
    %10 = vector.broadcast %cst_8 : f32 to vector<1x128xf32>
    %11 = arith.mulf %10, %6 : vector<1x128xf32>
    %12 = arith.subf %4, %11 : vector<1x128xf32>
    %cst_9 = arith.constant 5.000000e-01 : f32
    %13 = vector.broadcast %cst_9 : f32 to vector<1x128xf32>
    %14 = arith.mulf %13, %5 : vector<1x128xf32>
    %15 = arith.addf %3, %14 : vector<1x128xf32>
    %cst_10 = arith.constant 5.000000e-01 : f32
    %16 = vector.broadcast %cst_10 : f32 to vector<1x128xf32>
    %17 = arith.mulf %16, %6 : vector<1x128xf32>
    %18 = arith.addf %4, %17 : vector<1x128xf32>
    %c0_11 = arith.constant 0 : index
    %c0_12 = arith.constant 0 : index
    %c0_13 = arith.constant 0 : index
    %19 = vector.load %arg1[%c0_11, %c0_12, %c0_13] : memref<1x8x15xf32, #tpu.memory_space<vmem>>, vector<1x8x15xf32>
    %20 = vector.shape_cast %19 : vector<1x8x15xf32> to vector<8x15xf32>
    %21 = vector.extract_strided_slice %20 {offsets = [0, 0], sizes = [8, 1], strides = [1, 1]} : vector<8x15xf32> to vector<8x1xf32>
    %22 = vector.extract_strided_slice %20 {offsets = [0, 1], sizes = [8, 1], strides = [1, 1]} : vector<8x15xf32> to vector<8x1xf32>
    %23 = vector.extract_strided_slice %20 {offsets = [0, 2], sizes = [8, 1], strides = [1, 1]} : vector<8x15xf32> to vector<8x1xf32>
    %24 = vector.extract_strided_slice %20 {offsets = [0, 3], sizes = [8, 1], strides = [1, 1]} : vector<8x15xf32> to vector<8x1xf32>
    %25 = vector.broadcast %23 : vector<8x1xf32> to vector<8x128xf32>
    %26 = vector.broadcast %15 : vector<1x128xf32> to vector<8x128xf32>
    %27 = arith.minimumf %25, %26 : vector<8x128xf32>
    %28 = vector.broadcast %21 : vector<8x1xf32> to vector<8x128xf32>
    %29 = vector.broadcast %9 : vector<1x128xf32> to vector<8x128xf32>
    %30 = arith.maximumf %28, %29 : vector<8x128xf32>
    %31 = arith.subf %27, %30 : vector<8x128xf32>
    %cst_14 = arith.constant 0.000000e+00 : f32
    %32 = vector.broadcast %cst_14 : f32 to vector<8x128xf32>
    %33 = arith.maximumf %31, %32 : vector<8x128xf32>
    %34 = vector.broadcast %24 : vector<8x1xf32> to vector<8x128xf32>
    %35 = vector.broadcast %18 : vector<1x128xf32> to vector<8x128xf32>
    %36 = arith.minimumf %34, %35 : vector<8x128xf32>
    %37 = vector.broadcast %22 : vector<8x1xf32> to vector<8x128xf32>
    %38 = vector.broadcast %12 : vector<1x128xf32> to vector<8x128xf32>
    %39 = arith.maximumf %37, %38 : vector<8x128xf32>
    %40 = arith.subf %36, %39 : vector<8x128xf32>
    %cst_15 = arith.constant 0.000000e+00 : f32
    %41 = vector.broadcast %cst_15 : f32 to vector<8x128xf32>
    %42 = arith.maximumf %40, %41 : vector<8x128xf32>
    %43 = arith.mulf %33, %42 : vector<8x128xf32>
    %44 = arith.subf %23, %21 : vector<8x1xf32>
    %45 = arith.subf %24, %22 : vector<8x1xf32>
    %46 = arith.mulf %44, %45 : vector<8x1xf32>
    %47 = arith.subf %15, %9 : vector<1x128xf32>
    %48 = arith.subf %18, %12 : vector<1x128xf32>
    %49 = arith.mulf %47, %48 : vector<1x128xf32>
    %50 = vector.broadcast %46 : vector<8x1xf32> to vector<8x128xf32>
    %51 = vector.broadcast %49 : vector<1x128xf32> to vector<8x128xf32>
    %52 = arith.addf %50, %51 : vector<8x128xf32>
    %53 = arith.subf %52, %43 : vector<8x128xf32>
    %54 = arith.divf %43, %53 : vector<8x128xf32>
    %55 = tpu.iota {dimensions = array<i32: 1>} : vector<8x128xi32>
    %56 = tpu.iota {dimensions = array<i32: 0>} : vector<8x128xi32>
    %c4_i32 = arith.constant 4 : i32
    %57 = vector.broadcast %c4_i32 : i32 to vector<8x128xi32>
    %58 = arith.cmpi slt, %56, %57 : vector<8x128xi32>
    %cst_16 = arith.constant dense<0xFF800000> : vector<8xf32>
    %59 = vector.multi_reduction <maximumf>, %54, %cst_16 [1] : vector<8x128xf32> to vector<8xf32>
    %60 = vector.shape_cast %59 : vector<8xf32> to vector<8x1xf32>
    %61 = vector.broadcast %60 : vector<8x1xf32> to vector<8x128xf32>
    %62 = arith.cmpf oeq, %54, %61 : vector<8x128xf32>
    %c128_i32 = arith.constant 128 : i32
    %63 = vector.broadcast %c128_i32 : i32 to vector<8x128xi32>
    %64 = arith.select %62, %55, %63 : vector<8x128xi1>, vector<8x128xi32>
    %cst_17 = arith.constant dense<2147483647> : vector<8xi32>
    %65 = vector.multi_reduction <minsi>, %64, %cst_17 [1] : vector<8x128xi32> to vector<8xi32>
    %66 = vector.shape_cast %65 : vector<8xi32> to vector<8x1xi32>
    %cst_18 = arith.constant dense<0xFF800000> : vector<128xf32>
    %67 = vector.multi_reduction <maximumf>, %54, %cst_18 [0] : vector<8x128xf32> to vector<128xf32>
    %68 = vector.shape_cast %67 : vector<128xf32> to vector<1x128xf32>
    %69 = vector.broadcast %68 : vector<1x128xf32> to vector<8x128xf32>
    %70 = arith.cmpf oeq, %54, %69 : vector<8x128xf32>
    %c8_i32 = arith.constant 8 : i32
    %71 = vector.broadcast %c8_i32 : i32 to vector<8x128xi32>
    %72 = arith.select %70, %56, %71 : vector<8x128xi1>, vector<8x128xi32>
    %cst_19 = arith.constant dense<2147483647> : vector<128xi32>
    %73 = vector.multi_reduction <minsi>, %72, %cst_19 [0] : vector<8x128xi32> to vector<128xi32>
    %74 = vector.shape_cast %73 : vector<128xi32> to vector<1x128xi32>
    %cst_20 = arith.constant 2.000000e-01 : f32
    %75 = vector.broadcast %cst_20 : f32 to vector<8x1xf32>
    %76 = arith.cmpf oge, %60, %75 : vector<8x1xf32>
    %77 = arith.extui %76 : vector<8x1xi1> to vector<8x1xi32>
    %cst_21 = arith.constant dense<0> : vector<1xi32>
    %78 = vector.multi_reduction <add>, %77, %cst_21 [0] : vector<8x1xi32> to vector<1xi32>
    %79 = vector.shape_cast %78 : vector<1xi32> to vector<1x1xi32>
    %80 = vector.broadcast %66 : vector<8x1xi32> to vector<8x128xi32>
    %81 = arith.cmpi eq, %80, %55 : vector<8x128xi32>
    %82 = arith.andi %81, %58 : vector<8x128xi1>
    %c-1_i32 = arith.constant -1 : i32
    %83 = vector.broadcast %c-1_i32 : i32 to vector<8x128xi32>
    %84 = arith.select %82, %56, %83 : vector<8x128xi1>, vector<8x128xi32>
    %cst_22 = arith.constant dense<-2147483648> : vector<128xi32>
    %85 = vector.multi_reduction <maxsi>, %84, %cst_22 [0] : vector<8x128xi32> to vector<128xi32>
    %86 = vector.shape_cast %85 : vector<128xi32> to vector<1x128xi32>
    %87 = vector.broadcast %76 : vector<8x1xi1> to vector<8x128xi1>
    %88 = arith.andi %82, %87 : vector<8x128xi1>
    %c1_i32 = arith.constant 1 : i32
    %c0_i32 = arith.constant 0 : i32
    %89 = vector.broadcast %c1_i32 : i32 to vector<8x128xi32>
    %90 = vector.broadcast %c0_i32 : i32 to vector<8x128xi32>
    %91 = arith.select %88, %89, %90 : vector<8x128xi1>, vector<8x128xi32>
    %cst_23 = arith.constant dense<-2147483648> : vector<128xi32>
    %92 = vector.multi_reduction <maxsi>, %91, %cst_23 [0] : vector<8x128xi32> to vector<128xi32>
    %93 = vector.shape_cast %92 : vector<128xi32> to vector<1x128xi32>
    %c0_i32_24 = arith.constant 0 : i32
    %94 = vector.broadcast %c0_i32_24 : i32 to vector<1x128xi32>
    %95 = arith.cmpi sgt, %93, %94 : vector<1x128xi32>
    %cst_25 = arith.constant 2.000000e+00 : f32
    %96 = vector.broadcast %cst_25 : f32 to vector<1x128xf32>
    %97 = arith.select %95, %96, %68 : vector<1x128xi1>, vector<1x128xf32>
    %c0_i32_26 = arith.constant 0 : i32
    %98 = vector.broadcast %c0_i32_26 : i32 to vector<1x128xi32>
    %99 = arith.cmpi sge, %86, %98 : vector<1x128xi32>
    %100 = arith.select %99, %86, %74 : vector<1x128xi1>, vector<1x128xi32>
    %101 = vector.broadcast %100 : vector<1x128xi32> to vector<8x128xi32>
    %102 = arith.cmpi eq, %101, %56 : vector<8x128xi32>
    %103 = arith.extui %102 : vector<8x128xi1> to vector<8x128xi32>
    %104 = arith.sitofp %103 : vector<8x128xi32> to vector<8x128xf32>
    %c0_27 = arith.constant 0 : index
    %c0_28 = arith.constant 0 : index
    %c0_29 = arith.constant 0 : index
    %105 = vector.load %arg2[%c0_27, %c0_28, %c0_29] : memref<1x16x8xf32, #tpu.memory_space<vmem>>, vector<1x16x8xf32>
    %106 = vector.shape_cast %105 : vector<1x16x8xf32> to vector<16x8xf32>
    %cst_30 = arith.constant dense<0.000000e+00> : vector<16x128xf32>
    %107 = tpu.matmul %106, %104, %cst_30 {dimension_numbers = #tpu.dot_dimension_numbers<[1], [0], [0], [1], [0, 0, 1, 1], [], []>} : vector<16x8xf32>, vector<8x128xf32>, vector<16x128xf32> -> vector<16x128xf32>
    %108 = vector.extract_strided_slice %107 {offsets = [14, 0], sizes = [1, 128], strides = [1, 1]} : vector<16x128xf32> to vector<1x128xf32>
    %cst_31 = arith.constant 3.500000e-01 : f32
    %109 = vector.broadcast %cst_31 : f32 to vector<1x128xf32>
    %110 = arith.cmpf olt, %97, %109 : vector<1x128xf32>
    %cst_32 = arith.constant 0.000000e+00 : f32
    %111 = vector.broadcast %cst_32 : f32 to vector<1x128xf32>
    %112 = arith.select %110, %111, %108 : vector<1x128xi1>, vector<1x128xf32>
    %c0_i32_33 = arith.constant 0 : i32
    %113 = vector.broadcast %c0_i32_33 : i32 to vector<1x1xi32>
    %114 = arith.cmpi sgt, %79, %113 : vector<1x1xi32>
    %cst_34 = arith.constant 0.000000e+00 : f32
    %115 = vector.shape_cast %114 : vector<1x1xi1> to vector<1x1xi1>
    %116 = vector.broadcast %115 : vector<1x1xi1> to vector<1x128xi1>
    %117 = vector.broadcast %cst_34 : f32 to vector<1x128xf32>
    %118 = arith.select %116, %112, %117 : vector<1x128xi1>, vector<1x128xf32>
    %cst_35 = arith.constant 0.000000e+00 : f32
    %119 = vector.broadcast %cst_35 : f32 to vector<1x128xf32>
    %120 = arith.cmpf one, %118, %119 : vector<1x128xf32>
    %cst_36 = arith.constant 0.000000e+00 : f32
    %121 = vector.broadcast %cst_36 : f32 to vector<1x128xf32>
    %122 = arith.cmpf ogt, %118, %121 : vector<1x128xf32>
    %123 = arith.extui %120 : vector<1x128xi1> to vector<1x128xi32>
    %124 = arith.sitofp %123 : vector<1x128xi32> to vector<1x128xf32>
    %cst_37 = arith.constant dense<0.000000e+00> : vector<1xf32>
    %125 = vector.multi_reduction <add>, %124, %cst_37 [1] : vector<1x128xf32> to vector<1xf32>
    %126 = vector.shape_cast %125 : vector<1xf32> to vector<1x1xf32>
    %127 = arith.extui %122 : vector<1x128xi1> to vector<1x128xi32>
    %128 = arith.sitofp %127 : vector<1x128xi32> to vector<1x128xf32>
    %cst_38 = arith.constant dense<0.000000e+00> : vector<1xf32>
    %129 = vector.multi_reduction <add>, %128, %cst_38 [1] : vector<1x128xf32> to vector<1xf32>
    %130 = vector.shape_cast %129 : vector<1xf32> to vector<1x1xf32>
    %c0_39 = arith.constant 0 : index
    %c0_40 = arith.constant 0 : index
    %c0_41 = arith.constant 0 : index
    %131 = vector.load %arg4[%c0_39, %c0_40, %c0_41] : memref<1x16x128xf32, #tpu.memory_space<vmem>>, vector<1x16x128xf32>
    %132 = vector.shape_cast %131 : vector<1x16x128xf32> to vector<16x128xf32>
    %133 = vector.extract_strided_slice %107 {offsets = [0, 0], sizes = [2, 128], strides = [1, 1]} : vector<16x128xf32> to vector<2x128xf32>
    %134 = vector.extract_strided_slice %107 {offsets = [2, 0], sizes = [2, 128], strides = [1, 1]} : vector<16x128xf32> to vector<2x128xf32>
    %135 = arith.addf %133, %134 : vector<2x128xf32>
    %cst_42 = arith.constant 5.000000e-01 : f32
    %136 = vector.broadcast %cst_42 : f32 to vector<2x128xf32>
    %137 = arith.mulf %135, %136 : vector<2x128xf32>
    %138 = arith.subf %137, %0 : vector<2x128xf32>
    %139 = arith.mulf %138, %1 : vector<2x128xf32>
    %140 = arith.subf %134, %133 : vector<2x128xf32>
    %cst_43 = arith.constant 9.99999968E-21 : f32
    %141 = vector.broadcast %cst_43 : f32 to vector<2x128xf32>
    %142 = arith.maximumf %140, %141 : vector<2x128xf32>
    %143 = math.log %142 : vector<2x128xf32>
    %144 = arith.subf %143, %2 : vector<2x128xf32>
    %cst_44 = arith.constant 5.000000e+00 : f32
    %145 = vector.broadcast %cst_44 : f32 to vector<2x128xf32>
    %146 = arith.mulf %144, %145 : vector<2x128xf32>
    %147 = tpu.concatenate %139, %146 in 0 : vector<2x128xf32>, vector<2x128xf32> -> vector<4x128xf32>
    %148 = vector.extract_strided_slice %132 {offsets = [0, 0], sizes = [4, 128], strides = [1, 1]} : vector<16x128xf32> to vector<4x128xf32>
    %149 = arith.subf %148, %147 : vector<4x128xf32>
    %150 = math.absf %149 : vector<4x128xf32>
    %cst_45 = arith.constant 1.000000e+00 : f32
    %151 = vector.broadcast %cst_45 : f32 to vector<4x128xf32>
    %152 = arith.cmpf olt, %150, %151 : vector<4x128xf32>
    %cst_46 = arith.constant 5.000000e-01 : f32
    %153 = vector.broadcast %cst_46 : f32 to vector<4x128xf32>
    %154 = arith.mulf %153, %149 : vector<4x128xf32>
    %155 = arith.mulf %154, %149 : vector<4x128xf32>
    %cst_47 = arith.constant 5.000000e-01 : f32
    %156 = vector.broadcast %cst_47 : f32 to vector<4x128xf32>
    %157 = arith.subf %150, %156 : vector<4x128xf32>
    %158 = arith.select %152, %155, %157 : vector<4x128xi1>, vector<4x128xf32>
    %cst_48 = arith.constant 0.000000e+00 : f32
    %159 = vector.shape_cast %120 : vector<1x128xi1> to vector<1x128xi1>
    %160 = vector.broadcast %159 : vector<1x128xi1> to vector<4x128xi1>
    %161 = vector.broadcast %cst_48 : f32 to vector<4x128xf32>
    %162 = arith.select %160, %158, %161 : vector<4x128xi1>, vector<4x128xf32>
    %cst_49 = arith.constant dense<0.000000e+00> : vector<4xf32>
    %163 = vector.multi_reduction <add>, %162, %cst_49 [1] : vector<4x128xf32> to vector<4xf32>
    %164 = vector.shape_cast %163 : vector<4xf32> to vector<4x1xf32>
    %cst_50 = arith.constant dense<0.000000e+00> : vector<1xf32>
    %165 = vector.multi_reduction <add>, %164, %cst_50 [0] : vector<4x1xf32> to vector<1xf32>
    %166 = vector.shape_cast %165 : vector<1xf32> to vector<1x1xf32>
    %167 = tpu.concatenate %0, %0, %0, %0, %0 in 0 : vector<2x128xf32>, vector<2x128xf32>, vector<2x128xf32>, vector<2x128xf32>, vector<2x128xf32> -> vector<10x128xf32>
    %168 = tpu.concatenate %1, %1, %1, %1, %1 in 0 : vector<2x128xf32>, vector<2x128xf32>, vector<2x128xf32>, vector<2x128xf32>, vector<2x128xf32> -> vector<10x128xf32>
    %169 = vector.extract_strided_slice %107 {offsets = [4, 0], sizes = [10, 128], strides = [1, 1]} : vector<16x128xf32> to vector<10x128xf32>
    %170 = arith.subf %169, %167 : vector<10x128xf32>
    %171 = arith.mulf %170, %168 : vector<10x128xf32>
    %172 = vector.extract_strided_slice %132 {offsets = [6, 0], sizes = [10, 128], strides = [1, 1]} : vector<16x128xf32> to vector<10x128xf32>
    %173 = arith.subf %172, %171 : vector<10x128xf32>
    %174 = math.absf %173 : vector<10x128xf32>
    %cst_51 = arith.constant 1.000000e+00 : f32
    %175 = vector.broadcast %cst_51 : f32 to vector<10x128xf32>
    %176 = arith.cmpf olt, %174, %175 : vector<10x128xf32>
    %cst_52 = arith.constant 5.000000e-01 : f32
    %177 = vector.broadcast %cst_52 : f32 to vector<10x128xf32>
    %178 = arith.mulf %177, %173 : vector<10x128xf32>
    %179 = arith.mulf %178, %173 : vector<10x128xf32>
    %cst_53 = arith.constant 5.000000e-01 : f32
    %180 = vector.broadcast %cst_53 : f32 to vector<10x128xf32>
    %181 = arith.subf %174, %180 : vector<10x128xf32>
    %182 = arith.select %176, %179, %181 : vector<10x128xi1>, vector<10x128xf32>
    %cst_54 = arith.constant 0.000000e+00 : f32
    %183 = vector.shape_cast %122 : vector<1x128xi1> to vector<1x128xi1>
    %184 = vector.broadcast %183 : vector<1x128xi1> to vector<10x128xi1>
    %185 = vector.broadcast %cst_54 : f32 to vector<10x128xf32>
    %186 = arith.select %184, %182, %185 : vector<10x128xi1>, vector<10x128xf32>
    %cst_55 = arith.constant dense<0.000000e+00> : vector<10xf32>
    %187 = vector.multi_reduction <add>, %186, %cst_55 [1] : vector<10x128xf32> to vector<10xf32>
    %188 = vector.shape_cast %187 : vector<10xf32> to vector<10x1xf32>
    %cst_56 = arith.constant dense<0.000000e+00> : vector<1xf32>
    %189 = vector.multi_reduction <add>, %188, %cst_56 [0] : vector<10x1xf32> to vector<1xf32>
    %190 = vector.shape_cast %189 : vector<1xf32> to vector<1x1xf32>
    %191 = arith.mulf %173, %173 : vector<10x128xf32>
    %192 = vector.extract_strided_slice %191 {offsets = [0, 0], sizes = [1, 128], strides = [1, 1]} : vector<10x128xf32> to vector<1x128xf32>
    %193 = vector.extract_strided_slice %191 {offsets = [1, 0], sizes = [1, 128], strides = [1, 1]} : vector<10x128xf32> to vector<1x128xf32>
    %194 = arith.addf %192, %193 : vector<1x128xf32>
    %195 = vector.extract_strided_slice %191 {offsets = [2, 0], sizes = [1, 128], strides = [1, 1]} : vector<10x128xf32> to vector<1x128xf32>
    %196 = vector.extract_strided_slice %191 {offsets = [3, 0], sizes = [1, 128], strides = [1, 1]} : vector<10x128xf32> to vector<1x128xf32>
    %197 = arith.addf %195, %196 : vector<1x128xf32>
    %198 = vector.extract_strided_slice %191 {offsets = [4, 0], sizes = [1, 128], strides = [1, 1]} : vector<10x128xf32> to vector<1x128xf32>
    %199 = vector.extract_strided_slice %191 {offsets = [5, 0], sizes = [1, 128], strides = [1, 1]} : vector<10x128xf32> to vector<1x128xf32>
    %200 = arith.addf %198, %199 : vector<1x128xf32>
    %201 = vector.extract_strided_slice %191 {offsets = [6, 0], sizes = [1, 128], strides = [1, 1]} : vector<10x128xf32> to vector<1x128xf32>
    %202 = vector.extract_strided_slice %191 {offsets = [7, 0], sizes = [1, 128], strides = [1, 1]} : vector<10x128xf32> to vector<1x128xf32>
    %203 = arith.addf %201, %202 : vector<1x128xf32>
    %204 = vector.extract_strided_slice %191 {offsets = [8, 0], sizes = [1, 128], strides = [1, 1]} : vector<10x128xf32> to vector<1x128xf32>
    %205 = vector.extract_strided_slice %191 {offsets = [9, 0], sizes = [1, 128], strides = [1, 1]} : vector<10x128xf32> to vector<1x128xf32>
    %206 = arith.addf %204, %205 : vector<1x128xf32>
    %207 = tpu.concatenate %194, %197, %200, %203, %206 in 0 : vector<1x128xf32>, vector<1x128xf32>, vector<1x128xf32>, vector<1x128xf32>, vector<1x128xf32> -> vector<5x128xf32>
    %208 = math.sqrt %207 : vector<5x128xf32>
    %cst_57 = arith.constant dense<0.000000e+00> : vector<128xf32>
    %209 = vector.multi_reduction <add>, %208, %cst_57 [0] : vector<5x128xf32> to vector<128xf32>
    %210 = vector.shape_cast %209 : vector<128xf32> to vector<1x128xf32>
    %cst_58 = arith.constant 2.000000e-01 : f32
    %211 = vector.broadcast %cst_58 : f32 to vector<1x128xf32>
    %212 = arith.mulf %210, %211 : vector<1x128xf32>
    %213 = vector.extract_strided_slice %171 {offsets = [0, 0], sizes = [2, 128], strides = [1, 1]} : vector<10x128xf32> to vector<2x128xf32>
    %214 = vector.extract_strided_slice %171 {offsets = [2, 0], sizes = [2, 128], strides = [1, 1]} : vector<10x128xf32> to vector<2x128xf32>
    %215 = arith.subf %213, %214 : vector<2x128xf32>
    %216 = arith.mulf %215, %215 : vector<2x128xf32>
    %cst_59 = arith.constant dense<0.000000e+00> : vector<128xf32>
    %217 = vector.multi_reduction <add>, %216, %cst_59 [0] : vector<2x128xf32> to vector<128xf32>
    %218 = vector.shape_cast %217 : vector<128xf32> to vector<1x128xf32>
    %219 = math.sqrt %218 : vector<1x128xf32>
    %220 = tpu.reciprocal %219 {approx = true} : vector<1x128xf32> -> vector<1x128xf32>
    %221 = arith.mulf %212, %220 : vector<1x128xf32>
    %cst_60 = arith.constant 0.000000e+00 : f32
    %222 = vector.broadcast %cst_60 : f32 to vector<1x128xf32>
    %223 = arith.select %122, %221, %222 : vector<1x128xi1>, vector<1x128xf32>
    %cst_61 = arith.constant dense<0.000000e+00> : vector<1xf32>
    %224 = vector.multi_reduction <add>, %223, %cst_61 [1] : vector<1x128xf32> to vector<1xf32>
    %225 = vector.shape_cast %224 : vector<1xf32> to vector<1x1xf32>
    %cst_62 = arith.constant dense<0.000000e+00> : vector<1xf32>
    %226 = vector.multi_reduction <add>, %225, %cst_62 [0] : vector<1x1xf32> to vector<1xf32>
    %227 = vector.shape_cast %226 : vector<1xf32> to vector<1x1xf32>
    %228 = vector.extract_strided_slice %132 {offsets = [4, 0], sizes = [2, 128], strides = [1, 1]} : vector<16x128xf32> to vector<2x128xf32>
    %cst_63 = arith.constant dense<0xFF800000> : vector<128xf32>
    %229 = vector.multi_reduction <maximumf>, %228, %cst_63 [0] : vector<2x128xf32> to vector<128xf32>
    %230 = vector.shape_cast %229 : vector<128xf32> to vector<1x128xf32>
    %231 = vector.broadcast %230 : vector<1x128xf32> to vector<2x128xf32>
    %232 = arith.subf %228, %231 : vector<2x128xf32>
    %233 = math.exp %232 : vector<2x128xf32>
    %cst_64 = arith.constant dense<0.000000e+00> : vector<128xf32>
    %234 = vector.multi_reduction <add>, %233, %cst_64 [0] : vector<2x128xf32> to vector<128xf32>
    %235 = vector.shape_cast %234 : vector<128xf32> to vector<1x128xf32>
    %236 = math.log %235 : vector<1x128xf32>
    %237 = arith.addf %236, %230 : vector<1x128xf32>
    %238 = vector.extract_strided_slice %228 {offsets = [1, 0], sizes = [1, 128], strides = [1, 1]} : vector<2x128xf32> to vector<1x128xf32>
    %239 = vector.extract_strided_slice %228 {offsets = [0, 0], sizes = [1, 128], strides = [1, 1]} : vector<2x128xf32> to vector<1x128xf32>
    %240 = arith.select %120, %238, %239 : vector<1x128xi1>, vector<1x128xf32>
    %241 = arith.subf %237, %240 : vector<1x128xf32>
    %cst_65 = arith.constant 0.000000e+00 : f32
    %242 = vector.broadcast %cst_65 : f32 to vector<1x128xf32>
    %243 = arith.select %120, %242, %241 : vector<1x128xi1>, vector<1x128xf32>
    %cst_66 = arith.constant 0.000000e+00 : f32
    %244 = vector.broadcast %cst_66 : f32 to vector<1x128xf32>
    %245 = arith.maximumf %243, %244 : vector<1x128xf32>
    %cst_67 = arith.constant 3.000000e+00 : f32
    %246 = vector.broadcast %cst_67 : f32 to vector<1x1xf32>
    %247 = arith.mulf %246, %126 : vector<1x1xf32>
    %248 = math.ceil %247 : vector<1x1xf32>
    %cst_68 = arith.constant 1.270000e+02 : f32
    %249 = vector.broadcast %cst_68 : f32 to vector<1x1xf32>
    %250 = arith.minimumf %248, %249 : vector<1x1xf32>
    %251 = arith.fptosi %250 : vector<1x1xf32> to vector<1x1xi32>
    %252 = tpu.bitcast %245 : vector<1x128xf32> -> vector<1x128xi32>
    %c-1_i32_69 = arith.constant -1 : i32
    %253 = vector.broadcast %c-1_i32_69 : i32 to vector<1x1xi32>
    %c2139095040_i32 = arith.constant 2139095040 : i32
    %254 = vector.broadcast %c2139095040_i32 : i32 to vector<1x1xi32>
    %255 = arith.subi %254, %253 : vector<1x1xi32>
    %c1_i32_70 = arith.constant 1 : i32
    %256 = vector.broadcast %c1_i32_70 : i32 to vector<1x1xi32>
    %257 = arith.shrsi %255, %256 : vector<1x1xi32>
    %258 = arith.addi %253, %257 : vector<1x1xi32>
    %259 = vector.broadcast %258 : vector<1x1xi32> to vector<1x128xi32>
    %260 = arith.cmpi sgt, %252, %259 : vector<1x128xi32>
    %261 = arith.extui %260 : vector<1x128xi1> to vector<1x128xi32>
    %cst_71 = arith.constant dense<0> : vector<1xi32>
    %262 = vector.multi_reduction <add>, %261, %cst_71 [1] : vector<1x128xi32> to vector<1xi32>
    %263 = vector.shape_cast %262 : vector<1xi32> to vector<1x1xi32>
    %264 = arith.cmpi sge, %263, %251 : vector<1x1xi32>
    %265 = arith.select %264, %258, %253 : vector<1x1xi1>, vector<1x1xi32>
    %266 = arith.select %264, %254, %258 : vector<1x1xi1>, vector<1x1xi32>
    %267 = arith.subi %266, %265 : vector<1x1xi32>
    %c1_i32_72 = arith.constant 1 : i32
    %268 = vector.broadcast %c1_i32_72 : i32 to vector<1x1xi32>
    %269 = arith.shrsi %267, %268 : vector<1x1xi32>
    %270 = arith.addi %265, %269 : vector<1x1xi32>
    %271 = vector.broadcast %270 : vector<1x1xi32> to vector<1x128xi32>
    %272 = arith.cmpi sgt, %252, %271 : vector<1x128xi32>
    %273 = arith.extui %272 : vector<1x128xi1> to vector<1x128xi32>
    %cst_73 = arith.constant dense<0> : vector<1xi32>
    %274 = vector.multi_reduction <add>, %273, %cst_73 [1] : vector<1x128xi32> to vector<1xi32>
    %275 = vector.shape_cast %274 : vector<1xi32> to vector<1x1xi32>
    %276 = arith.cmpi sge, %275, %251 : vector<1x1xi32>
    %277 = arith.select %276, %270, %265 : vector<1x1xi1>, vector<1x1xi32>
    %278 = arith.select %276, %266, %270 : vector<1x1xi1>, vector<1x1xi32>
    %279 = arith.subi %278, %277 : vector<1x1xi32>
    %c1_i32_74 = arith.constant 1 : i32
    %280 = vector.broadcast %c1_i32_74 : i32 to vector<1x1xi32>
    %281 = arith.shrsi %279, %280 : vector<1x1xi32>
    %282 = arith.addi %277, %281 : vector<1x1xi32>
    %283 = vector.broadcast %282 : vector<1x1xi32> to vector<1x128xi32>
    %284 = arith.cmpi sgt, %252, %283 : vector<1x128xi32>
    %285 = arith.extui %284 : vector<1x128xi1> to vector<1x128xi32>
    %cst_75 = arith.constant dense<0> : vector<1xi32>
    %286 = vector.multi_reduction <add>, %285, %cst_75 [1] : vector<1x128xi32> to vector<1xi32>
    %287 = vector.shape_cast %286 : vector<1xi32> to vector<1x1xi32>
    %288 = arith.cmpi sge, %287, %251 : vector<1x1xi32>
    %289 = arith.select %288, %282, %277 : vector<1x1xi1>, vector<1x1xi32>
    %290 = arith.select %288, %278, %282 : vector<1x1xi1>, vector<1x1xi32>
    %291 = arith.subi %290, %289 : vector<1x1xi32>
    %c1_i32_76 = arith.constant 1 : i32
    %292 = vector.broadcast %c1_i32_76 : i32 to vector<1x1xi32>
    %293 = arith.shrsi %291, %292 : vector<1x1xi32>
    %294 = arith.addi %289, %293 : vector<1x1xi32>
    %295 = vector.broadcast %294 : vector<1x1xi32> to vector<1x128xi32>
    %296 = arith.cmpi sgt, %252, %295 : vector<1x128xi32>
    %297 = arith.extui %296 : vector<1x128xi1> to vector<1x128xi32>
    %cst_77 = arith.constant dense<0> : vector<1xi32>
    %298 = vector.multi_reduction <add>, %297, %cst_77 [1] : vector<1x128xi32> to vector<1xi32>
    %299 = vector.shape_cast %298 : vector<1xi32> to vector<1x1xi32>
    %300 = arith.cmpi sge, %299, %251 : vector<1x1xi32>
    %301 = arith.select %300, %294, %289 : vector<1x1xi1>, vector<1x1xi32>
    %302 = arith.select %300, %290, %294 : vector<1x1xi1>, vector<1x1xi32>
    %303 = arith.subi %302, %301 : vector<1x1xi32>
    %c1_i32_78 = arith.constant 1 : i32
    %304 = vector.broadcast %c1_i32_78 : i32 to vector<1x1xi32>
    %305 = arith.shrsi %303, %304 : vector<1x1xi32>
    %306 = arith.addi %301, %305 : vector<1x1xi32>
    %307 = vector.broadcast %306 : vector<1x1xi32> to vector<1x128xi32>
    %308 = arith.cmpi sgt, %252, %307 : vector<1x128xi32>
    %309 = arith.extui %308 : vector<1x128xi1> to vector<1x128xi32>
    %cst_79 = arith.constant dense<0> : vector<1xi32>
    %310 = vector.multi_reduction <add>, %309, %cst_79 [1] : vector<1x128xi32> to vector<1xi32>
    %311 = vector.shape_cast %310 : vector<1xi32> to vector<1x1xi32>
    %312 = arith.cmpi sge, %311, %251 : vector<1x1xi32>
    %313 = arith.select %312, %306, %301 : vector<1x1xi1>, vector<1x1xi32>
    %314 = arith.select %312, %302, %306 : vector<1x1xi1>, vector<1x1xi32>
    %315 = arith.subi %314, %313 : vector<1x1xi32>
    %c1_i32_80 = arith.constant 1 : i32
    %316 = vector.broadcast %c1_i32_80 : i32 to vector<1x1xi32>
    %317 = arith.shrsi %315, %316 : vector<1x1xi32>
    %318 = arith.addi %313, %317 : vector<1x1xi32>
    %319 = vector.broadcast %318 : vector<1x1xi32> to vector<1x128xi32>
    %320 = arith.cmpi sgt, %252, %319 : vector<1x128xi32>
    %321 = arith.extui %320 : vector<1x128xi1> to vector<1x128xi32>
    %cst_81 = arith.constant dense<0> : vector<1xi32>
    %322 = vector.multi_reduction <add>, %321, %cst_81 [1] : vector<1x128xi32> to vector<1xi32>
    %323 = vector.shape_cast %322 : vector<1xi32> to vector<1x1xi32>
    %324 = arith.cmpi sge, %323, %251 : vector<1x1xi32>
    %325 = arith.select %324, %318, %313 : vector<1x1xi1>, vector<1x1xi32>
    %326 = arith.select %324, %314, %318 : vector<1x1xi1>, vector<1x1xi32>
    %327 = arith.subi %326, %325 : vector<1x1xi32>
    %c1_i32_82 = arith.constant 1 : i32
    %328 = vector.broadcast %c1_i32_82 : i32 to vector<1x1xi32>
    %329 = arith.shrsi %327, %328 : vector<1x1xi32>
    %330 = arith.addi %325, %329 : vector<1x1xi32>
    %331 = vector.broadcast %330 : vector<1x1xi32> to vector<1x128xi32>
    %332 = arith.cmpi sgt, %252, %331 : vector<1x128xi32>
    %333 = arith.extui %332 : vector<1x128xi1> to vector<1x128xi32>
    %cst_83 = arith.constant dense<0> : vector<1xi32>
    %334 = vector.multi_reduction <add>, %333, %cst_83 [1] : vector<1x128xi32> to vector<1xi32>
    %335 = vector.shape_cast %334 : vector<1xi32> to vector<1x1xi32>
    %336 = arith.cmpi sge, %335, %251 : vector<1x1xi32>
    %337 = arith.select %336, %330, %325 : vector<1x1xi1>, vector<1x1xi32>
    %338 = arith.select %336, %326, %330 : vector<1x1xi1>, vector<1x1xi32>
    %339 = arith.subi %338, %337 : vector<1x1xi32>
    %c1_i32_84 = arith.constant 1 : i32
    %340 = vector.broadcast %c1_i32_84 : i32 to vector<1x1xi32>
    %341 = arith.shrsi %339, %340 : vector<1x1xi32>
    %342 = arith.addi %337, %341 : vector<1x1xi32>
    %343 = vector.broadcast %342 : vector<1x1xi32> to vector<1x128xi32>
    %344 = arith.cmpi sgt, %252, %343 : vector<1x128xi32>
    %345 = arith.extui %344 : vector<1x128xi1> to vector<1x128xi32>
    %cst_85 = arith.constant dense<0> : vector<1xi32>
    %346 = vector.multi_reduction <add>, %345, %cst_85 [1] : vector<1x128xi32> to vector<1xi32>
    %347 = vector.shape_cast %346 : vector<1xi32> to vector<1x1xi32>
    %348 = arith.cmpi sge, %347, %251 : vector<1x1xi32>
    %349 = arith.select %348, %342, %337 : vector<1x1xi1>, vector<1x1xi32>
    %350 = arith.select %348, %338, %342 : vector<1x1xi1>, vector<1x1xi32>
    %351 = arith.subi %350, %349 : vector<1x1xi32>
    %c1_i32_86 = arith.constant 1 : i32
    %352 = vector.broadcast %c1_i32_86 : i32 to vector<1x1xi32>
    %353 = arith.shrsi %351, %352 : vector<1x1xi32>
    %354 = arith.addi %349, %353 : vector<1x1xi32>
    %355 = vector.broadcast %354 : vector<1x1xi32> to vector<1x128xi32>
    %356 = arith.cmpi sgt, %252, %355 : vector<1x128xi32>
    %357 = arith.extui %356 : vector<1x128xi1> to vector<1x128xi32>
    %cst_87 = arith.constant dense<0> : vector<1xi32>
    %358 = vector.multi_reduction <add>, %357, %cst_87 [1] : vector<1x128xi32> to vector<1xi32>
    %359 = vector.shape_cast %358 : vector<1xi32> to vector<1x1xi32>
    %360 = arith.cmpi sge, %359, %251 : vector<1x1xi32>
    %361 = arith.select %360, %354, %349 : vector<1x1xi1>, vector<1x1xi32>
    %362 = arith.select %360, %350, %354 : vector<1x1xi1>, vector<1x1xi32>
    %363 = arith.subi %362, %361 : vector<1x1xi32>
    %c1_i32_88 = arith.constant 1 : i32
    %364 = vector.broadcast %c1_i32_88 : i32 to vector<1x1xi32>
    %365 = arith.shrsi %363, %364 : vector<1x1xi32>
    %366 = arith.addi %361, %365 : vector<1x1xi32>
    %367 = vector.broadcast %366 : vector<1x1xi32> to vector<1x128xi32>
    %368 = arith.cmpi sgt, %252, %367 : vector<1x128xi32>
    %369 = arith.extui %368 : vector<1x128xi1> to vector<1x128xi32>
    %cst_89 = arith.constant dense<0> : vector<1xi32>
    %370 = vector.multi_reduction <add>, %369, %cst_89 [1] : vector<1x128xi32> to vector<1xi32>
    %371 = vector.shape_cast %370 : vector<1xi32> to vector<1x1xi32>
    %372 = arith.cmpi sge, %371, %251 : vector<1x1xi32>
    %373 = arith.select %372, %366, %361 : vector<1x1xi1>, vector<1x1xi32>
    %374 = arith.select %372, %362, %366 : vector<1x1xi1>, vector<1x1xi32>
    %375 = arith.subi %374, %373 : vector<1x1xi32>
    %c1_i32_90 = arith.constant 1 : i32
    %376 = vector.broadcast %c1_i32_90 : i32 to vector<1x1xi32>
    %377 = arith.shrsi %375, %376 : vector<1x1xi32>
    %378 = arith.addi %373, %377 : vector<1x1xi32>
    %379 = vector.broadcast %378 : vector<1x1xi32> to vector<1x128xi32>
    %380 = arith.cmpi sgt, %252, %379 : vector<1x128xi32>
    %381 = arith.extui %380 : vector<1x128xi1> to vector<1x128xi32>
    %cst_91 = arith.constant dense<0> : vector<1xi32>
    %382 = vector.multi_reduction <add>, %381, %cst_91 [1] : vector<1x128xi32> to vector<1xi32>
    %383 = vector.shape_cast %382 : vector<1xi32> to vector<1x1xi32>
    %384 = arith.cmpi sge, %383, %251 : vector<1x1xi32>
    %385 = arith.select %384, %378, %373 : vector<1x1xi1>, vector<1x1xi32>
    %386 = arith.select %384, %374, %378 : vector<1x1xi1>, vector<1x1xi32>
    %387 = arith.subi %386, %385 : vector<1x1xi32>
    %c1_i32_92 = arith.constant 1 : i32
    %388 = vector.broadcast %c1_i32_92 : i32 to vector<1x1xi32>
    %389 = arith.shrsi %387, %388 : vector<1x1xi32>
    %390 = arith.addi %385, %389 : vector<1x1xi32>
    %391 = vector.broadcast %390 : vector<1x1xi32> to vector<1x128xi32>
    %392 = arith.cmpi sgt, %252, %391 : vector<1x128xi32>
    %393 = arith.extui %392 : vector<1x128xi1> to vector<1x128xi32>
    %cst_93 = arith.constant dense<0> : vector<1xi32>
    %394 = vector.multi_reduction <add>, %393, %cst_93 [1] : vector<1x128xi32> to vector<1xi32>
    %395 = vector.shape_cast %394 : vector<1xi32> to vector<1x1xi32>
    %396 = arith.cmpi sge, %395, %251 : vector<1x1xi32>
    %397 = arith.select %396, %390, %385 : vector<1x1xi1>, vector<1x1xi32>
    %398 = arith.select %396, %386, %390 : vector<1x1xi1>, vector<1x1xi32>
    %399 = arith.subi %398, %397 : vector<1x1xi32>
    %c1_i32_94 = arith.constant 1 : i32
    %400 = vector.broadcast %c1_i32_94 : i32 to vector<1x1xi32>
    %401 = arith.shrsi %399, %400 : vector<1x1xi32>
    %402 = arith.addi %397, %401 : vector<1x1xi32>
    %403 = vector.broadcast %402 : vector<1x1xi32> to vector<1x128xi32>
    %404 = arith.cmpi sgt, %252, %403 : vector<1x128xi32>
    %405 = arith.extui %404 : vector<1x128xi1> to vector<1x128xi32>
    %cst_95 = arith.constant dense<0> : vector<1xi32>
    %406 = vector.multi_reduction <add>, %405, %cst_95 [1] : vector<1x128xi32> to vector<1xi32>
    %407 = vector.shape_cast %406 : vector<1xi32> to vector<1x1xi32>
    %408 = arith.cmpi sge, %407, %251 : vector<1x1xi32>
    %409 = arith.select %408, %402, %397 : vector<1x1xi1>, vector<1x1xi32>
    %410 = arith.select %408, %398, %402 : vector<1x1xi1>, vector<1x1xi32>
    %411 = arith.subi %410, %409 : vector<1x1xi32>
    %c1_i32_96 = arith.constant 1 : i32
    %412 = vector.broadcast %c1_i32_96 : i32 to vector<1x1xi32>
    %413 = arith.shrsi %411, %412 : vector<1x1xi32>
    %414 = arith.addi %409, %413 : vector<1x1xi32>
    %415 = vector.broadcast %414 : vector<1x1xi32> to vector<1x128xi32>
    %416 = arith.cmpi sgt, %252, %415 : vector<1x128xi32>
    %417 = arith.extui %416 : vector<1x128xi1> to vector<1x128xi32>
    %cst_97 = arith.constant dense<0> : vector<1xi32>
    %418 = vector.multi_reduction <add>, %417, %cst_97 [1] : vector<1x128xi32> to vector<1xi32>
    %419 = vector.shape_cast %418 : vector<1xi32> to vector<1x1xi32>
    %420 = arith.cmpi sge, %419, %251 : vector<1x1xi32>
    %421 = arith.select %420, %414, %409 : vector<1x1xi1>, vector<1x1xi32>
    %422 = arith.select %420, %410, %414 : vector<1x1xi1>, vector<1x1xi32>
    %423 = arith.subi %422, %421 : vector<1x1xi32>
    %c1_i32_98 = arith.constant 1 : i32
    %424 = vector.broadcast %c1_i32_98 : i32 to vector<1x1xi32>
    %425 = arith.shrsi %423, %424 : vector<1x1xi32>
    %426 = arith.addi %421, %425 : vector<1x1xi32>
    %427 = vector.broadcast %426 : vector<1x1xi32> to vector<1x128xi32>
    %428 = arith.cmpi sgt, %252, %427 : vector<1x128xi32>
    %429 = arith.extui %428 : vector<1x128xi1> to vector<1x128xi32>
    %cst_99 = arith.constant dense<0> : vector<1xi32>
    %430 = vector.multi_reduction <add>, %429, %cst_99 [1] : vector<1x128xi32> to vector<1xi32>
    %431 = vector.shape_cast %430 : vector<1xi32> to vector<1x1xi32>
    %432 = arith.cmpi sge, %431, %251 : vector<1x1xi32>
    %433 = arith.select %432, %426, %421 : vector<1x1xi1>, vector<1x1xi32>
    %434 = arith.select %432, %422, %426 : vector<1x1xi1>, vector<1x1xi32>
    %435 = arith.subi %434, %433 : vector<1x1xi32>
    %c1_i32_100 = arith.constant 1 : i32
    %436 = vector.broadcast %c1_i32_100 : i32 to vector<1x1xi32>
    %437 = arith.shrsi %435, %436 : vector<1x1xi32>
    %438 = arith.addi %433, %437 : vector<1x1xi32>
    %439 = vector.broadcast %438 : vector<1x1xi32> to vector<1x128xi32>
    %440 = arith.cmpi sgt, %252, %439 : vector<1x128xi32>
    %441 = arith.extui %440 : vector<1x128xi1> to vector<1x128xi32>
    %cst_101 = arith.constant dense<0> : vector<1xi32>
    %442 = vector.multi_reduction <add>, %441, %cst_101 [1] : vector<1x128xi32> to vector<1xi32>
    %443 = vector.shape_cast %442 : vector<1xi32> to vector<1x1xi32>
    %444 = arith.cmpi sge, %443, %251 : vector<1x1xi32>
    %445 = arith.select %444, %438, %433 : vector<1x1xi1>, vector<1x1xi32>
    %446 = arith.select %444, %434, %438 : vector<1x1xi1>, vector<1x1xi32>
    %447 = arith.subi %446, %445 : vector<1x1xi32>
    %c1_i32_102 = arith.constant 1 : i32
    %448 = vector.broadcast %c1_i32_102 : i32 to vector<1x1xi32>
    %449 = arith.shrsi %447, %448 : vector<1x1xi32>
    %450 = arith.addi %445, %449 : vector<1x1xi32>
    %451 = vector.broadcast %450 : vector<1x1xi32> to vector<1x128xi32>
    %452 = arith.cmpi sgt, %252, %451 : vector<1x128xi32>
    %453 = arith.extui %452 : vector<1x128xi1> to vector<1x128xi32>
    %cst_103 = arith.constant dense<0> : vector<1xi32>
    %454 = vector.multi_reduction <add>, %453, %cst_103 [1] : vector<1x128xi32> to vector<1xi32>
    %455 = vector.shape_cast %454 : vector<1xi32> to vector<1x1xi32>
    %456 = arith.cmpi sge, %455, %251 : vector<1x1xi32>
    %457 = arith.select %456, %450, %445 : vector<1x1xi1>, vector<1x1xi32>
    %458 = arith.select %456, %446, %450 : vector<1x1xi1>, vector<1x1xi32>
    %459 = arith.subi %458, %457 : vector<1x1xi32>
    %c1_i32_104 = arith.constant 1 : i32
    %460 = vector.broadcast %c1_i32_104 : i32 to vector<1x1xi32>
    %461 = arith.shrsi %459, %460 : vector<1x1xi32>
    %462 = arith.addi %457, %461 : vector<1x1xi32>
    %463 = vector.broadcast %462 : vector<1x1xi32> to vector<1x128xi32>
    %464 = arith.cmpi sgt, %252, %463 : vector<1x128xi32>
    %465 = arith.extui %464 : vector<1x128xi1> to vector<1x128xi32>
    %cst_105 = arith.constant dense<0> : vector<1xi32>
    %466 = vector.multi_reduction <add>, %465, %cst_105 [1] : vector<1x128xi32> to vector<1xi32>
    %467 = vector.shape_cast %466 : vector<1xi32> to vector<1x1xi32>
    %468 = arith.cmpi sge, %467, %251 : vector<1x1xi32>
    %469 = arith.select %468, %462, %457 : vector<1x1xi1>, vector<1x1xi32>
    %470 = arith.select %468, %458, %462 : vector<1x1xi1>, vector<1x1xi32>
    %471 = arith.subi %470, %469 : vector<1x1xi32>
    %c1_i32_106 = arith.constant 1 : i32
    %472 = vector.broadcast %c1_i32_106 : i32 to vector<1x1xi32>
    %473 = arith.shrsi %471, %472 : vector<1x1xi32>
    %474 = arith.addi %469, %473 : vector<1x1xi32>
    %475 = vector.broadcast %474 : vector<1x1xi32> to vector<1x128xi32>
    %476 = arith.cmpi sgt, %252, %475 : vector<1x128xi32>
    %477 = arith.extui %476 : vector<1x128xi1> to vector<1x128xi32>
    %cst_107 = arith.constant dense<0> : vector<1xi32>
    %478 = vector.multi_reduction <add>, %477, %cst_107 [1] : vector<1x128xi32> to vector<1xi32>
    %479 = vector.shape_cast %478 : vector<1xi32> to vector<1x1xi32>
    %480 = arith.cmpi sge, %479, %251 : vector<1x1xi32>
    %481 = arith.select %480, %474, %469 : vector<1x1xi1>, vector<1x1xi32>
    %482 = arith.select %480, %470, %474 : vector<1x1xi1>, vector<1x1xi32>
    %483 = arith.subi %482, %481 : vector<1x1xi32>
    %c1_i32_108 = arith.constant 1 : i32
    %484 = vector.broadcast %c1_i32_108 : i32 to vector<1x1xi32>
    %485 = arith.shrsi %483, %484 : vector<1x1xi32>
    %486 = arith.addi %481, %485 : vector<1x1xi32>
    %487 = vector.broadcast %486 : vector<1x1xi32> to vector<1x128xi32>
    %488 = arith.cmpi sgt, %252, %487 : vector<1x128xi32>
    %489 = arith.extui %488 : vector<1x128xi1> to vector<1x128xi32>
    %cst_109 = arith.constant dense<0> : vector<1xi32>
    %490 = vector.multi_reduction <add>, %489, %cst_109 [1] : vector<1x128xi32> to vector<1xi32>
    %491 = vector.shape_cast %490 : vector<1xi32> to vector<1x1xi32>
    %492 = arith.cmpi sge, %491, %251 : vector<1x1xi32>
    %493 = arith.select %492, %486, %481 : vector<1x1xi1>, vector<1x1xi32>
    %494 = arith.select %492, %482, %486 : vector<1x1xi1>, vector<1x1xi32>
    %495 = arith.subi %494, %493 : vector<1x1xi32>
    %c1_i32_110 = arith.constant 1 : i32
    %496 = vector.broadcast %c1_i32_110 : i32 to vector<1x1xi32>
    %497 = arith.shrsi %495, %496 : vector<1x1xi32>
    %498 = arith.addi %493, %497 : vector<1x1xi32>
    %499 = vector.broadcast %498 : vector<1x1xi32> to vector<1x128xi32>
    %500 = arith.cmpi sgt, %252, %499 : vector<1x128xi32>
    %501 = arith.extui %500 : vector<1x128xi1> to vector<1x128xi32>
    %cst_111 = arith.constant dense<0> : vector<1xi32>
    %502 = vector.multi_reduction <add>, %501, %cst_111 [1] : vector<1x128xi32> to vector<1xi32>
    %503 = vector.shape_cast %502 : vector<1xi32> to vector<1x1xi32>
    %504 = arith.cmpi sge, %503, %251 : vector<1x1xi32>
    %505 = arith.select %504, %498, %493 : vector<1x1xi1>, vector<1x1xi32>
    %506 = arith.select %504, %494, %498 : vector<1x1xi1>, vector<1x1xi32>
    %507 = arith.subi %506, %505 : vector<1x1xi32>
    %c1_i32_112 = arith.constant 1 : i32
    %508 = vector.broadcast %c1_i32_112 : i32 to vector<1x1xi32>
    %509 = arith.shrsi %507, %508 : vector<1x1xi32>
    %510 = arith.addi %505, %509 : vector<1x1xi32>
    %511 = vector.broadcast %510 : vector<1x1xi32> to vector<1x128xi32>
    %512 = arith.cmpi sgt, %252, %511 : vector<1x128xi32>
    %513 = arith.extui %512 : vector<1x128xi1> to vector<1x128xi32>
    %cst_113 = arith.constant dense<0> : vector<1xi32>
    %514 = vector.multi_reduction <add>, %513, %cst_113 [1] : vector<1x128xi32> to vector<1xi32>
    %515 = vector.shape_cast %514 : vector<1xi32> to vector<1x1xi32>
    %516 = arith.cmpi sge, %515, %251 : vector<1x1xi32>
    %517 = arith.select %516, %510, %505 : vector<1x1xi1>, vector<1x1xi32>
    %518 = arith.select %516, %506, %510 : vector<1x1xi1>, vector<1x1xi32>
    %519 = arith.subi %518, %517 : vector<1x1xi32>
    %c1_i32_114 = arith.constant 1 : i32
    %520 = vector.broadcast %c1_i32_114 : i32 to vector<1x1xi32>
    %521 = arith.shrsi %519, %520 : vector<1x1xi32>
    %522 = arith.addi %517, %521 : vector<1x1xi32>
    %523 = vector.broadcast %522 : vector<1x1xi32> to vector<1x128xi32>
    %524 = arith.cmpi sgt, %252, %523 : vector<1x128xi32>
    %525 = arith.extui %524 : vector<1x128xi1> to vector<1x128xi32>
    %cst_115 = arith.constant dense<0> : vector<1xi32>
    %526 = vector.multi_reduction <add>, %525, %cst_115 [1] : vector<1x128xi32> to vector<1xi32>
    %527 = vector.shape_cast %526 : vector<1xi32> to vector<1x1xi32>
    %528 = arith.cmpi sge, %527, %251 : vector<1x1xi32>
    %529 = arith.select %528, %522, %517 : vector<1x1xi1>, vector<1x1xi32>
    %530 = arith.select %528, %518, %522 : vector<1x1xi1>, vector<1x1xi32>
    %531 = arith.subi %530, %529 : vector<1x1xi32>
    %c1_i32_116 = arith.constant 1 : i32
    %532 = vector.broadcast %c1_i32_116 : i32 to vector<1x1xi32>
    %533 = arith.shrsi %531, %532 : vector<1x1xi32>
    %534 = arith.addi %529, %533 : vector<1x1xi32>
    %535 = vector.broadcast %534 : vector<1x1xi32> to vector<1x128xi32>
    %536 = arith.cmpi sgt, %252, %535 : vector<1x128xi32>
    %537 = arith.extui %536 : vector<1x128xi1> to vector<1x128xi32>
    %cst_117 = arith.constant dense<0> : vector<1xi32>
    %538 = vector.multi_reduction <add>, %537, %cst_117 [1] : vector<1x128xi32> to vector<1xi32>
    %539 = vector.shape_cast %538 : vector<1xi32> to vector<1x1xi32>
    %540 = arith.cmpi sge, %539, %251 : vector<1x1xi32>
    %541 = arith.select %540, %534, %529 : vector<1x1xi1>, vector<1x1xi32>
    %542 = arith.select %540, %530, %534 : vector<1x1xi1>, vector<1x1xi32>
    %543 = arith.subi %542, %541 : vector<1x1xi32>
    %c1_i32_118 = arith.constant 1 : i32
    %544 = vector.broadcast %c1_i32_118 : i32 to vector<1x1xi32>
    %545 = arith.shrsi %543, %544 : vector<1x1xi32>
    %546 = arith.addi %541, %545 : vector<1x1xi32>
    %547 = vector.broadcast %546 : vector<1x1xi32> to vector<1x128xi32>
    %548 = arith.cmpi sgt, %252, %547 : vector<1x128xi32>
    %549 = arith.extui %548 : vector<1x128xi1> to vector<1x128xi32>
    %cst_119 = arith.constant dense<0> : vector<1xi32>
    %550 = vector.multi_reduction <add>, %549, %cst_119 [1] : vector<1x128xi32> to vector<1xi32>
    %551 = vector.shape_cast %550 : vector<1xi32> to vector<1x1xi32>
    %552 = arith.cmpi sge, %551, %251 : vector<1x1xi32>
    %553 = arith.select %552, %546, %541 : vector<1x1xi1>, vector<1x1xi32>
    %554 = arith.select %552, %542, %546 : vector<1x1xi1>, vector<1x1xi32>
    %555 = arith.subi %554, %553 : vector<1x1xi32>
    %c1_i32_120 = arith.constant 1 : i32
    %556 = vector.broadcast %c1_i32_120 : i32 to vector<1x1xi32>
    %557 = arith.shrsi %555, %556 : vector<1x1xi32>
    %558 = arith.addi %553, %557 : vector<1x1xi32>
    %559 = vector.broadcast %558 : vector<1x1xi32> to vector<1x128xi32>
    %560 = arith.cmpi sgt, %252, %559 : vector<1x128xi32>
    %561 = arith.extui %560 : vector<1x128xi1> to vector<1x128xi32>
    %cst_121 = arith.constant dense<0> : vector<1xi32>
    %562 = vector.multi_reduction <add>, %561, %cst_121 [1] : vector<1x128xi32> to vector<1xi32>
    %563 = vector.shape_cast %562 : vector<1xi32> to vector<1x1xi32>
    %564 = arith.cmpi sge, %563, %251 : vector<1x1xi32>
    %565 = arith.select %564, %558, %553 : vector<1x1xi1>, vector<1x1xi32>
    %566 = arith.select %564, %554, %558 : vector<1x1xi1>, vector<1x1xi32>
    %567 = arith.subi %566, %565 : vector<1x1xi32>
    %c1_i32_122 = arith.constant 1 : i32
    %568 = vector.broadcast %c1_i32_122 : i32 to vector<1x1xi32>
    %569 = arith.shrsi %567, %568 : vector<1x1xi32>
    %570 = arith.addi %565, %569 : vector<1x1xi32>
    %571 = vector.broadcast %570 : vector<1x1xi32> to vector<1x128xi32>
    %572 = arith.cmpi sgt, %252, %571 : vector<1x128xi32>
    %573 = arith.extui %572 : vector<1x128xi1> to vector<1x128xi32>
    %cst_123 = arith.constant dense<0> : vector<1xi32>
    %574 = vector.multi_reduction <add>, %573, %cst_123 [1] : vector<1x128xi32> to vector<1xi32>
    %575 = vector.shape_cast %574 : vector<1xi32> to vector<1x1xi32>
    %576 = arith.cmpi sge, %575, %251 : vector<1x1xi32>
    %577 = arith.select %576, %570, %565 : vector<1x1xi1>, vector<1x1xi32>
    %578 = arith.select %576, %566, %570 : vector<1x1xi1>, vector<1x1xi32>
    %579 = arith.subi %578, %577 : vector<1x1xi32>
    %c1_i32_124 = arith.constant 1 : i32
    %580 = vector.broadcast %c1_i32_124 : i32 to vector<1x1xi32>
    %581 = arith.shrsi %579, %580 : vector<1x1xi32>
    %582 = arith.addi %577, %581 : vector<1x1xi32>
    %583 = vector.broadcast %582 : vector<1x1xi32> to vector<1x128xi32>
    %584 = arith.cmpi sgt, %252, %583 : vector<1x128xi32>
    %585 = arith.extui %584 : vector<1x128xi1> to vector<1x128xi32>
    %cst_125 = arith.constant dense<0> : vector<1xi32>
    %586 = vector.multi_reduction <add>, %585, %cst_125 [1] : vector<1x128xi32> to vector<1xi32>
    %587 = vector.shape_cast %586 : vector<1xi32> to vector<1x1xi32>
    %588 = arith.cmpi sge, %587, %251 : vector<1x1xi32>
    %589 = arith.select %588, %582, %577 : vector<1x1xi1>, vector<1x1xi32>
    %590 = arith.select %588, %578, %582 : vector<1x1xi1>, vector<1x1xi32>
    %591 = arith.subi %590, %589 : vector<1x1xi32>
    %c1_i32_126 = arith.constant 1 : i32
    %592 = vector.broadcast %c1_i32_126 : i32 to vector<1x1xi32>
    %593 = arith.shrsi %591, %592 : vector<1x1xi32>
    %594 = arith.addi %589, %593 : vector<1x1xi32>
    %595 = vector.broadcast %594 : vector<1x1xi32> to vector<1x128xi32>
    %596 = arith.cmpi sgt, %252, %595 : vector<1x128xi32>
    %597 = arith.extui %596 : vector<1x128xi1> to vector<1x128xi32>
    %cst_127 = arith.constant dense<0> : vector<1xi32>
    %598 = vector.multi_reduction <add>, %597, %cst_127 [1] : vector<1x128xi32> to vector<1xi32>
    %599 = vector.shape_cast %598 : vector<1xi32> to vector<1x1xi32>
    %600 = arith.cmpi sge, %599, %251 : vector<1x1xi32>
    %601 = arith.select %600, %594, %589 : vector<1x1xi1>, vector<1x1xi32>
    %602 = arith.select %600, %590, %594 : vector<1x1xi1>, vector<1x1xi32>
    %603 = arith.subi %602, %601 : vector<1x1xi32>
    %c1_i32_128 = arith.constant 1 : i32
    %604 = vector.broadcast %c1_i32_128 : i32 to vector<1x1xi32>
    %605 = arith.shrsi %603, %604 : vector<1x1xi32>
    %606 = arith.addi %601, %605 : vector<1x1xi32>
    %607 = vector.broadcast %606 : vector<1x1xi32> to vector<1x128xi32>
    %608 = arith.cmpi sgt, %252, %607 : vector<1x128xi32>
    %609 = arith.extui %608 : vector<1x128xi1> to vector<1x128xi32>
    %cst_129 = arith.constant dense<0> : vector<1xi32>
    %610 = vector.multi_reduction <add>, %609, %cst_129 [1] : vector<1x128xi32> to vector<1xi32>
    %611 = vector.shape_cast %610 : vector<1xi32> to vector<1x1xi32>
    %612 = arith.cmpi sge, %611, %251 : vector<1x1xi32>
    %613 = arith.select %612, %606, %601 : vector<1x1xi1>, vector<1x1xi32>
    %614 = arith.select %612, %602, %606 : vector<1x1xi1>, vector<1x1xi32>
    %615 = arith.subi %614, %613 : vector<1x1xi32>
    %c1_i32_130 = arith.constant 1 : i32
    %616 = vector.broadcast %c1_i32_130 : i32 to vector<1x1xi32>
    %617 = arith.shrsi %615, %616 : vector<1x1xi32>
    %618 = arith.addi %613, %617 : vector<1x1xi32>
    %619 = vector.broadcast %618 : vector<1x1xi32> to vector<1x128xi32>
    %620 = arith.cmpi sgt, %252, %619 : vector<1x128xi32>
    %621 = arith.extui %620 : vector<1x128xi1> to vector<1x128xi32>
    %cst_131 = arith.constant dense<0> : vector<1xi32>
    %622 = vector.multi_reduction <add>, %621, %cst_131 [1] : vector<1x128xi32> to vector<1xi32>
    %623 = vector.shape_cast %622 : vector<1xi32> to vector<1x1xi32>
    %624 = arith.cmpi sge, %623, %251 : vector<1x1xi32>
    %625 = arith.select %624, %618, %613 : vector<1x1xi1>, vector<1x1xi32>
    %626 = arith.select %624, %614, %618 : vector<1x1xi1>, vector<1x1xi32>
    %627 = arith.subi %626, %625 : vector<1x1xi32>
    %c1_i32_132 = arith.constant 1 : i32
    %628 = vector.broadcast %c1_i32_132 : i32 to vector<1x1xi32>
    %629 = arith.shrsi %627, %628 : vector<1x1xi32>
    %630 = arith.addi %625, %629 : vector<1x1xi32>
    %631 = vector.broadcast %630 : vector<1x1xi32> to vector<1x128xi32>
    %632 = arith.cmpi sgt, %252, %631 : vector<1x128xi32>
    %633 = arith.extui %632 : vector<1x128xi1> to vector<1x128xi32>
    %cst_133 = arith.constant dense<0> : vector<1xi32>
    %634 = vector.multi_reduction <add>, %633, %cst_133 [1] : vector<1x128xi32> to vector<1xi32>
    %635 = vector.shape_cast %634 : vector<1xi32> to vector<1x1xi32>
    %636 = arith.cmpi sge, %635, %251 : vector<1x1xi32>
    %637 = arith.select %636, %626, %630 : vector<1x1xi1>, vector<1x1xi32>
    %638 = vector.broadcast %637 : vector<1x1xi32> to vector<1x128xi32>
    %639 = arith.cmpi sgt, %252, %638 : vector<1x128xi32>
    %640 = vector.broadcast %637 : vector<1x1xi32> to vector<1x128xi32>
    %641 = arith.cmpi eq, %252, %640 : vector<1x128xi32>
    %642 = arith.extui %639 : vector<1x128xi1> to vector<1x128xi32>
    %cst_134 = arith.constant dense<0> : vector<1xi32>
    %643 = vector.multi_reduction <add>, %642, %cst_134 [1] : vector<1x128xi32> to vector<1xi32>
    %644 = vector.shape_cast %643 : vector<1xi32> to vector<1x1xi32>
    %645 = arith.subi %251, %644 : vector<1x1xi32>
    %646 = tpu.iota {dimensions = array<i32: 1>} : vector<1x128xi32>
    %c-1_i32_135 = arith.constant -1 : i32
    %647 = vector.broadcast %c-1_i32_135 : i32 to vector<1x1xi32>
    %c127_i32 = arith.constant 127 : i32
    %648 = vector.broadcast %c127_i32 : i32 to vector<1x1xi32>
    %649 = arith.subi %648, %647 : vector<1x1xi32>
    %c1_i32_136 = arith.constant 1 : i32
    %650 = vector.broadcast %c1_i32_136 : i32 to vector<1x1xi32>
    %651 = arith.shrsi %649, %650 : vector<1x1xi32>
    %652 = arith.addi %647, %651 : vector<1x1xi32>
    %653 = vector.broadcast %652 : vector<1x1xi32> to vector<1x128xi32>
    %654 = arith.cmpi sle, %646, %653 : vector<1x128xi32>
    %655 = arith.andi %641, %654 : vector<1x128xi1>
    %656 = arith.extui %655 : vector<1x128xi1> to vector<1x128xi32>
    %cst_137 = arith.constant dense<0> : vector<1xi32>
    %657 = vector.multi_reduction <add>, %656, %cst_137 [1] : vector<1x128xi32> to vector<1xi32>
    %658 = vector.shape_cast %657 : vector<1xi32> to vector<1x1xi32>
    %659 = arith.cmpi sge, %658, %645 : vector<1x1xi32>
    %660 = arith.select %659, %647, %652 : vector<1x1xi1>, vector<1x1xi32>
    %661 = arith.select %659, %652, %648 : vector<1x1xi1>, vector<1x1xi32>
    %662 = arith.subi %661, %660 : vector<1x1xi32>
    %c1_i32_138 = arith.constant 1 : i32
    %663 = vector.broadcast %c1_i32_138 : i32 to vector<1x1xi32>
    %664 = arith.shrsi %662, %663 : vector<1x1xi32>
    %665 = arith.addi %660, %664 : vector<1x1xi32>
    %666 = vector.broadcast %665 : vector<1x1xi32> to vector<1x128xi32>
    %667 = arith.cmpi sle, %646, %666 : vector<1x128xi32>
    %668 = arith.andi %641, %667 : vector<1x128xi1>
    %669 = arith.extui %668 : vector<1x128xi1> to vector<1x128xi32>
    %cst_139 = arith.constant dense<0> : vector<1xi32>
    %670 = vector.multi_reduction <add>, %669, %cst_139 [1] : vector<1x128xi32> to vector<1xi32>
    %671 = vector.shape_cast %670 : vector<1xi32> to vector<1x1xi32>
    %672 = arith.cmpi sge, %671, %645 : vector<1x1xi32>
    %673 = arith.select %672, %660, %665 : vector<1x1xi1>, vector<1x1xi32>
    %674 = arith.select %672, %665, %661 : vector<1x1xi1>, vector<1x1xi32>
    %675 = arith.subi %674, %673 : vector<1x1xi32>
    %c1_i32_140 = arith.constant 1 : i32
    %676 = vector.broadcast %c1_i32_140 : i32 to vector<1x1xi32>
    %677 = arith.shrsi %675, %676 : vector<1x1xi32>
    %678 = arith.addi %673, %677 : vector<1x1xi32>
    %679 = vector.broadcast %678 : vector<1x1xi32> to vector<1x128xi32>
    %680 = arith.cmpi sle, %646, %679 : vector<1x128xi32>
    %681 = arith.andi %641, %680 : vector<1x128xi1>
    %682 = arith.extui %681 : vector<1x128xi1> to vector<1x128xi32>
    %cst_141 = arith.constant dense<0> : vector<1xi32>
    %683 = vector.multi_reduction <add>, %682, %cst_141 [1] : vector<1x128xi32> to vector<1xi32>
    %684 = vector.shape_cast %683 : vector<1xi32> to vector<1x1xi32>
    %685 = arith.cmpi sge, %684, %645 : vector<1x1xi32>
    %686 = arith.select %685, %673, %678 : vector<1x1xi1>, vector<1x1xi32>
    %687 = arith.select %685, %678, %674 : vector<1x1xi1>, vector<1x1xi32>
    %688 = arith.subi %687, %686 : vector<1x1xi32>
    %c1_i32_142 = arith.constant 1 : i32
    %689 = vector.broadcast %c1_i32_142 : i32 to vector<1x1xi32>
    %690 = arith.shrsi %688, %689 : vector<1x1xi32>
    %691 = arith.addi %686, %690 : vector<1x1xi32>
    %692 = vector.broadcast %691 : vector<1x1xi32> to vector<1x128xi32>
    %693 = arith.cmpi sle, %646, %692 : vector<1x128xi32>
    %694 = arith.andi %641, %693 : vector<1x128xi1>
    %695 = arith.extui %694 : vector<1x128xi1> to vector<1x128xi32>
    %cst_143 = arith.constant dense<0> : vector<1xi32>
    %696 = vector.multi_reduction <add>, %695, %cst_143 [1] : vector<1x128xi32> to vector<1xi32>
    %697 = vector.shape_cast %696 : vector<1xi32> to vector<1x1xi32>
    %698 = arith.cmpi sge, %697, %645 : vector<1x1xi32>
    %699 = arith.select %698, %686, %691 : vector<1x1xi1>, vector<1x1xi32>
    %700 = arith.select %698, %691, %687 : vector<1x1xi1>, vector<1x1xi32>
    %701 = arith.subi %700, %699 : vector<1x1xi32>
    %c1_i32_144 = arith.constant 1 : i32
    %702 = vector.broadcast %c1_i32_144 : i32 to vector<1x1xi32>
    %703 = arith.shrsi %701, %702 : vector<1x1xi32>
    %704 = arith.addi %699, %703 : vector<1x1xi32>
    %705 = vector.broadcast %704 : vector<1x1xi32> to vector<1x128xi32>
    %706 = arith.cmpi sle, %646, %705 : vector<1x128xi32>
    %707 = arith.andi %641, %706 : vector<1x128xi1>
    %708 = arith.extui %707 : vector<1x128xi1> to vector<1x128xi32>
    %cst_145 = arith.constant dense<0> : vector<1xi32>
    %709 = vector.multi_reduction <add>, %708, %cst_145 [1] : vector<1x128xi32> to vector<1xi32>
    %710 = vector.shape_cast %709 : vector<1xi32> to vector<1x1xi32>
    %711 = arith.cmpi sge, %710, %645 : vector<1x1xi32>
    %712 = arith.select %711, %699, %704 : vector<1x1xi1>, vector<1x1xi32>
    %713 = arith.select %711, %704, %700 : vector<1x1xi1>, vector<1x1xi32>
    %714 = arith.subi %713, %712 : vector<1x1xi32>
    %c1_i32_146 = arith.constant 1 : i32
    %715 = vector.broadcast %c1_i32_146 : i32 to vector<1x1xi32>
    %716 = arith.shrsi %714, %715 : vector<1x1xi32>
    %717 = arith.addi %712, %716 : vector<1x1xi32>
    %718 = vector.broadcast %717 : vector<1x1xi32> to vector<1x128xi32>
    %719 = arith.cmpi sle, %646, %718 : vector<1x128xi32>
    %720 = arith.andi %641, %719 : vector<1x128xi1>
    %721 = arith.extui %720 : vector<1x128xi1> to vector<1x128xi32>
    %cst_147 = arith.constant dense<0> : vector<1xi32>
    %722 = vector.multi_reduction <add>, %721, %cst_147 [1] : vector<1x128xi32> to vector<1xi32>
    %723 = vector.shape_cast %722 : vector<1xi32> to vector<1x1xi32>
    %724 = arith.cmpi sge, %723, %645 : vector<1x1xi32>
    %725 = arith.select %724, %712, %717 : vector<1x1xi1>, vector<1x1xi32>
    %726 = arith.select %724, %717, %713 : vector<1x1xi1>, vector<1x1xi32>
    %727 = arith.subi %726, %725 : vector<1x1xi32>
    %c1_i32_148 = arith.constant 1 : i32
    %728 = vector.broadcast %c1_i32_148 : i32 to vector<1x1xi32>
    %729 = arith.shrsi %727, %728 : vector<1x1xi32>
    %730 = arith.addi %725, %729 : vector<1x1xi32>
    %731 = vector.broadcast %730 : vector<1x1xi32> to vector<1x128xi32>
    %732 = arith.cmpi sle, %646, %731 : vector<1x128xi32>
    %733 = arith.andi %641, %732 : vector<1x128xi1>
    %734 = arith.extui %733 : vector<1x128xi1> to vector<1x128xi32>
    %cst_149 = arith.constant dense<0> : vector<1xi32>
    %735 = vector.multi_reduction <add>, %734, %cst_149 [1] : vector<1x128xi32> to vector<1xi32>
    %736 = vector.shape_cast %735 : vector<1xi32> to vector<1x1xi32>
    %737 = arith.cmpi sge, %736, %645 : vector<1x1xi32>
    %738 = arith.select %737, %725, %730 : vector<1x1xi1>, vector<1x1xi32>
    %739 = arith.select %737, %730, %726 : vector<1x1xi1>, vector<1x1xi32>
    %740 = arith.subi %739, %738 : vector<1x1xi32>
    %c1_i32_150 = arith.constant 1 : i32
    %741 = vector.broadcast %c1_i32_150 : i32 to vector<1x1xi32>
    %742 = arith.shrsi %740, %741 : vector<1x1xi32>
    %743 = arith.addi %738, %742 : vector<1x1xi32>
    %744 = vector.broadcast %743 : vector<1x1xi32> to vector<1x128xi32>
    %745 = arith.cmpi sle, %646, %744 : vector<1x128xi32>
    %746 = arith.andi %641, %745 : vector<1x128xi1>
    %747 = arith.extui %746 : vector<1x128xi1> to vector<1x128xi32>
    %cst_151 = arith.constant dense<0> : vector<1xi32>
    %748 = vector.multi_reduction <add>, %747, %cst_151 [1] : vector<1x128xi32> to vector<1xi32>
    %749 = vector.shape_cast %748 : vector<1xi32> to vector<1x1xi32>
    %750 = arith.cmpi sge, %749, %645 : vector<1x1xi32>
    %751 = arith.select %750, %743, %739 : vector<1x1xi1>, vector<1x1xi32>
    %c0_i32_152 = arith.constant 0 : i32
    %752 = vector.broadcast %c0_i32_152 : i32 to vector<1x1xi32>
    %753 = arith.cmpi sgt, %645, %752 : vector<1x1xi32>
    %c-1_i32_153 = arith.constant -1 : i32
    %754 = vector.broadcast %c-1_i32_153 : i32 to vector<1x1xi32>
    %755 = arith.select %753, %751, %754 : vector<1x1xi1>, vector<1x1xi32>
    %756 = vector.broadcast %755 : vector<1x1xi32> to vector<1x128xi32>
    %757 = arith.cmpi sle, %646, %756 : vector<1x128xi32>
    %758 = arith.andi %641, %757 : vector<1x128xi1>
    %759 = arith.ori %639, %758 : vector<1x128xi1>
    %760 = arith.ori %120, %759 : vector<1x128xi1>
    %cst_154 = arith.constant 0.000000e+00 : f32
    %761 = vector.broadcast %cst_154 : f32 to vector<1x128xf32>
    %762 = arith.select %760, %241, %761 : vector<1x128xi1>, vector<1x128xf32>
    %cst_155 = arith.constant dense<0.000000e+00> : vector<1xf32>
    %763 = vector.multi_reduction <add>, %762, %cst_155 [1] : vector<1x128xf32> to vector<1xf32>
    %764 = vector.shape_cast %763 : vector<1xf32> to vector<1x1xf32>
    %cst_156 = arith.constant dense<0.000000e+00> : vector<1xf32>
    %765 = vector.multi_reduction <add>, %764, %cst_156 [0] : vector<1x1xf32> to vector<1xf32>
    %766 = vector.shape_cast %765 : vector<1xf32> to vector<1x1xf32>
    %767 = tpu.iota {dimensions = array<i32: 0>} : vector<8x128xi32>
    %cst_157 = arith.constant 0.000000e+00 : f32
    %768 = vector.broadcast %cst_157 : f32 to vector<8x128xf32>
    %c0_i32_158 = arith.constant 0 : i32
    %769 = vector.broadcast %c0_i32_158 : i32 to vector<8x128xi32>
    %770 = arith.cmpi eq, %767, %769 : vector<8x128xi32>
    %c1_i32_159 = arith.constant 1 : i32
    %771 = vector.broadcast %c1_i32_159 : i32 to vector<8x128xi32>
    %772 = arith.cmpi eq, %767, %771 : vector<8x128xi32>
    %c2_i32 = arith.constant 2 : i32
    %773 = vector.broadcast %c2_i32 : i32 to vector<8x128xi32>
    %774 = arith.cmpi eq, %767, %773 : vector<8x128xi32>
    %c3_i32 = arith.constant 3 : i32
    %775 = vector.broadcast %c3_i32 : i32 to vector<8x128xi32>
    %776 = arith.cmpi eq, %767, %775 : vector<8x128xi32>
    %c4_i32_160 = arith.constant 4 : i32
    %777 = vector.broadcast %c4_i32_160 : i32 to vector<8x128xi32>
    %778 = arith.cmpi eq, %767, %777 : vector<8x128xi32>
    %c5_i32 = arith.constant 5 : i32
    %779 = vector.broadcast %c5_i32 : i32 to vector<8x128xi32>
    %780 = arith.cmpi eq, %767, %779 : vector<8x128xi32>
    %781 = vector.shape_cast %227 : vector<1x1xf32> to vector<1x1xf32>
    %782 = vector.broadcast %781 : vector<1x1xf32> to vector<8x128xf32>
    %783 = arith.select %780, %782, %768 : vector<8x128xi1>, vector<8x128xf32>
    %784 = vector.shape_cast %130 : vector<1x1xf32> to vector<1x1xf32>
    %785 = vector.broadcast %784 : vector<1x1xf32> to vector<8x128xf32>
    %786 = arith.select %778, %785, %783 : vector<8x128xi1>, vector<8x128xf32>
    %787 = vector.shape_cast %126 : vector<1x1xf32> to vector<1x1xf32>
    %788 = vector.broadcast %787 : vector<1x1xf32> to vector<8x128xf32>
    %789 = arith.select %776, %788, %786 : vector<8x128xi1>, vector<8x128xf32>
    %790 = vector.shape_cast %766 : vector<1x1xf32> to vector<1x1xf32>
    %791 = vector.broadcast %790 : vector<1x1xf32> to vector<8x128xf32>
    %792 = arith.select %774, %791, %789 : vector<8x128xi1>, vector<8x128xf32>
    %793 = vector.shape_cast %190 : vector<1x1xf32> to vector<1x1xf32>
    %794 = vector.broadcast %793 : vector<1x1xf32> to vector<8x128xf32>
    %795 = arith.select %772, %794, %792 : vector<8x128xi1>, vector<8x128xf32>
    %796 = vector.shape_cast %166 : vector<1x1xf32> to vector<1x1xf32>
    %797 = vector.broadcast %796 : vector<1x1xf32> to vector<8x128xf32>
    %798 = arith.select %770, %797, %795 : vector<8x128xi1>, vector<8x128xf32>
    %c0_161 = arith.constant 0 : index
    %c0_162 = arith.constant 0 : index
    %c0_163 = arith.constant 0 : index
    %799 = vector.load %arg5[%c0_161, %c0_162, %c0_163] : memref<1x8x128xf32, #tpu.memory_space<vmem>>, vector<1x8x128xf32>
    %800 = vector.shape_cast %799 : vector<1x8x128xf32> to vector<8x128xf32>
    %801 = vector.shape_cast %798 : vector<8x128xf32> to vector<1x8x128xf32>
    tpu.vector_store %arg5[%c0_161, %c0_162, %c0_163], %801 {strides = array<i32>} : memref<1x8x128xf32, #tpu.memory_space<vmem>>, vector<1x8x128xf32>,
    return
  }
  func.func @transform_0(%arg0: i32) -> (i32, i32, i32) {
    %c0_i32 = arith.constant 0 : i32
    %c0_i32_0 = arith.constant 0 : i32
    %c0_i32_1 = arith.constant 0 : i32
    return %arg0, %c0_i32, %c0_i32_0 : i32, i32, i32
  }
  func.func @transform_1(%arg0: i32) -> (i32, i32, i32) {
    %c0_i32 = arith.constant 0 : i32
    %c0_i32_0 = arith.constant 0 : i32
    %c0_i32_1 = arith.constant 0 : i32
    return %arg0, %c0_i32, %c0_i32_0 : i32, i32, i32
  }
  func.func @transform_2(%arg0: i32) -> (i32, i32) {
    %c0_i32 = arith.constant 0 : i32
    %c0_i32_0 = arith.constant 0 : i32
    %c0_i32_1 = arith.constant 0 : i32
    return %c0_i32, %c0_i32_0 : i32, i32
  }
  func.func @transform_3(%arg0: i32) -> (i32, i32, i32) {
    %c0_i32 = arith.constant 0 : i32
    %c0_i32_0 = arith.constant 0 : i32
    %c0_i32_1 = arith.constant 0 : i32
    return %arg0, %c0_i32, %c0_i32_0 : i32, i32, i32
  }
  func.func @transform_4(%arg0: i32) -> (i32, i32, i32) {
    %c0_i32 = arith.constant 0 : i32
    %c0_i32_0 = arith.constant 0 : i32
    %c0_i32_1 = arith.constant 0 : i32
    return %arg0, %c0_i32, %c0_i32_0 : i32, i32, i32
  }
}

</mosaic_0001>

<bundles_post_ra>
// kernel: tpu_custom_call.1
= control target key start
LH: loop header
LB: loop body
LE: loop exit
PB: predicated region body
PF: predicated region fallthrough
CT: control target
= control target key end

     0   :  { %9 = vsyncpa [#allocation3], 0  ;;  %s2488_s0 = inlined_call_operand.vmem [shape: f32[2,8,15], index: 0, kind: input, shape index: {}]   ;;  %s2489_s1 = inlined_call_operand.vmem [shape: f32[2,16,8], index: 1, kind: input, shape index: {}]   ;;  %s2490_s2 = inlined_call_operand.hbm [shape: f32[8,128], index: 2, kind: input, shape index: {}]   ;;  %s2491_s3 = inlined_call_operand.vmem [shape: f32[2,16,128], index: 3, kind: input, shape index: {}]   ;;  %s2492_s4 = inlined_call_operand.hbm [shape: f32[2,8,128], index: 4, kind: output, shape index: {}]  }
   0x1   :  { %10 = vsyncpa [#allocation4], 0 }
   0x2   :  { %12 = vsyncpa [#allocation4 + $0x1], 0  ;;  %s2006_s15 = smov 0   ;;  %s2008_s16 = smov 0  }
   0x3   :  { %s2010_s17 = smov 0   ;;  %s2012_s18 = smov 0  }
   0x4 LB: > { %s2027_s19 = sadd.s32 4294967295, %s1965_s18   ;;  %s1753_s20 = sadd.s32 4294967294, %s1965_s18   ;;  %s1965_s18 = sphi %s2012_s18, %s2506_s18   ;;  %s1961_s17 = sphi %s2010_s17, %s2505_s17   ;;  %s1957_s16 = sphi %s2008_s16, %s2504_s16   ;;  %s1953_s15 = sphi %s2006_s15, %s2503_s15  }
   0x5   : > { %s2031_s21 = sadd.s32 1, %s1965_s18   ;;  %s124_s22 = sadd.s32 1, %s1961_s17 }
   0x6   : > { %s121_s23 = ssub.s32 %s1965_s18, %s2031_s21  ;;  %p134_p0 = scmp.ne.s32.totalorder %s1961_s17, %s1957_s16 }
   0x7   : > { %p122_p1 = scmp.eq.s32.totalorder %s121_s23, 0  ;;  %p135_p2 = scmp.eq.s32.totalorder %s2027_s19, 1 }
   0x8   : > { %p140_p3 = scmp.ne.s32.totalorder %s1957_s16, %s1953_s15  ;;  %p141_p4 = scmp.eq.s32.totalorder %s1753_s20, 1 }
   0x9   : > { %s2042_s24 = scalar_select %p122_p1, %s1961_s17, %s124_s22  }
   0xa   : > { %p2044_p5 = por %p135_p2, %p134_p0  ;;  %p2048_p6 = por %p141_p4, %p140_p3 }
   0xb   : > { %p1754_p7 = scmp.ge.s32.totalorder %s1965_s18, 1  ;;  %p148_p8 = scmp.lt.s32.totalorder %s1965_s18, 3 }
   0xc   : > { %s2494_s26 = scalar_select %p2048_p6, 1, 0 }
   0xd   : > { %p1804_p9 = scmp.eq.s32.totalorder %s2027_s19, 0  ;;  %p2055_p10 = pnand %p1754_p7, %p148_p8 }
   0xe   : > { %s1967_s28 = smov [#allocation2]  }
   0xf   : > { %s161_s29 = sshll.u32 %s1967_s28, 4  ;;  %p1796_p11 = pneg %p2055_p10  ;;  %s162_s29 = int_to_ptr.vmem [resolvable:$true] %s161_s29 }
  0x10   : > { %s1886_s30 = scalar_lea.vmem %s162_s29, 128  ;;  %p1894_p3 = scmp.lt.s32.totalorder %s162_s29, %s162_s29 }
  0x11   : > { %p1797_p12 = pnand %p1804_p9, %p1796_p11  ;;  %p1887_p0 = scmp.ne.s32.totalorder %s162_s29, %s1886_s30 }
  0x12   : > { %p1895_p4 = scmp.lt.s32.totalorder %s1886_s30, %s1886_s30 }
  0x13   : > { %p1877_p13 = pneg %p1797_p12 }
  0x14   : > { %p1896_p6 = por %p1895_p4, %p1894_p3 }
  0x15   : > { %p1889_p1 = pnand %p1887_p0, %p1877_p13 }
  0x17   : > { %p1890_p2 = pneg %p1889_p1 }
  0x19   : > { %p1897_p7 = pnand %p1896_p6, %p1890_p2 }
  0x1b   : > { %1900 = shalt.err (!%p1897_p7)
}
  0x1c   : > { %1799 = dma.hbm_to_vmem [thread:$0]  (!%p1797_p12), %s2490_s2, 128, %s162_s29, [#allocation3]  }
  0x1d   : > { %197 = sbr.rel (%p2055_p10) target bundleno = 7590 (0x1da6), region = 36 }
  0x22   : > { %1944 = dma.done.wait (%p1804_p9), [#allocation3], 128  }
  0x23   : > { %1946 = vsyncadd (%p1804_p9), [#allocation3], 4294967168  ;;  %p232_p8 = scmp.lt.s32.totalorder %s2027_s19, 1  ;;  %v1968_v0 = vmov 2   ;;  %v1969_v1 = vmov 3   ;;  %s1970_s12 = smov 2   ;;  %v265_v9 = vlaneseq }
  0x24   : > { %1852 = vset.pattern.permute.xlu1 %v1968_v0  ;;  %1854 = vset.pattern.permute.xlu0 %v1969_v1  ;;  %v1971_v3 = vmov 0   ;;  %v1972_v4 = vmov 1   ;;  %s1973_s13 = smov 127   ;;  %v251_v10 = vld [vmem:[#allocation2 + $0x2] sm:$0x1]  ;;  %vm408_vm2 = vcmask 64512  }
  0x25   : > { %s2074_s7 = scalar_select %p232_p8, %s2027_s19, 1  ;;  %v252_v12 = vld [vmem:[#allocation2 + $0x3] sm:$0x1]  ;;  %v2081_v13 = vshrl.u32 %v265_v9, 7  ;;  %v253_v14 = vmul.f32 0.5, %v251_v10  ;;  %v2084_v48 = vand.u32 127, %v265_v9 }
  0x26   : > { %v249_v15 = vld [vmem:[#allocation2] sm:$0x1]  ;;  %v255_v16 = vmul.f32 0.5, %v252_v12  ;;  %v250_v17 = vld [vmem:[#allocation2 + $0x1] sm:$0x1]  ;;  %vm709_vm15 = vcmask 1045508  }
  0x27   : > { %s1760_s8 = sshll.u32 %s2074_s7, 3  ;;  %v267_v18 = vsub.s32 0, %v2081_v13  ;;  %v257_v19 = vadd.f32 %v253_v14, %v249_v15  ;;  %v254_v21 = vsub.f32 %v249_v15, %v253_v14  ;;  %s1778_s14 = sshll.u32 %s2074_s7, 4  ;;  %vm331_vm5 = vcmp.lt.s32.totalorder %v2081_v13, 4 }
  0x28   : > { %s235_s11 = scalar_lea.vmem %s2488_s0, %s1760_s8  ;;  %v256_v22 = vsub.f32 %v250_v17, %v255_v16  ;;  %v258_v23 = vadd.f32 %v255_v16, %v250_v17  ;;  %s2096_s23 = scalar_lea.vmem %s2489_s1, %s1778_s14 }
  0x29   : > { %v259_v2 = vld [vmem:[%s235_s11] sm:$0xff]  ;;  %v268_v24 = vrot.slane %v257_v19, %v267_v18  ;;  %v277_v25 = vrot.slane %v254_v21, %v267_v18  ;;  %v311_v34 = vsub.f32 %v257_v19, %v254_v21  ;;  %s2121_s29 = scalar_lea.vmem %s2491_s3, %s1778_s14  ;;  %s229_s30 = sand.u32 1, %s1957_s16  }
  0x2a   : > { %302 = vrot.lane.b32.xlu0 %v259_v2, %s1970_s12  ;;  %262 = vperm.xlu1 %1852, %v259_v2   ;;  %v297_v26 = vrot.slane %v256_v22, %v267_v18  ;;  %v288_v27 = vrot.slane %v258_v23, %v267_v18  ;;  %v312_v35 = vsub.f32 %v258_v23, %v256_v22  ;;  %v406_v57 = vld [vmem:[%s2096_s23] sm:$0xff]  ;;  %v407_v23 = vld [vmem:[%s2096_s23 + $0x8] sm:$0xff]  ;;  %s1759_s5 = sshll.u32 %s229_s30, 3  ;;  %s1775_s6 = sshll.u32 %s2027_s19, 7 }
  0x2b   : > { %1785 = vmatprep.mubr.msk.f32.mxu0 %vm408_vm2, %v406_v57  ;;  %s231_s7 = scalar_lea.vmem [#allocation5], %s1759_s5  ;;  %s2451_s11 = scalar_lea.hbm %s2492_s4, %s1775_s6 }
  0x2c   : > { %v313_v38 = vmul.f32 %v312_v35, %v311_v34  ;;  %s1658_s8 = sshll.u32 %s231_s7, 4  ;;  %s1645_s19 = scalar_lea.sflag [#allocation4], %s229_s30  ;;  %s1659_s8 = int_to_ptr.vmem [resolvable:$true] %s1658_s8 }
  0x2d   : > { %s1901_s12 = scalar_lea.vmem %s1659_s8, 128 }
  0x2e   : > { %1853 = vset.pattern.permute.xlu1 %v1971_v3  ;;  %v322_v41 = vrot.slane %v313_v38, %v267_v18  ;;  %p1902_p6 = scmp.ne.s32.totalorder %s1659_s8, %s1901_s12 }
  0x2f   : > { %271 = vperm.xlu1 %1853, %v259_v2  }
  0x30   : > { %p1903_p9 = pnand %p1902_p6, %p2044_p5 }
  0x32   : > { %p1904_p10 = pneg %p1903_p9 }
  0x33   : > { %1855 = vset.pattern.permute.xlu1 %v1972_v4 }
  0x34   : > { %291 = vperm.xlu1 %1855, %v259_v2  }
  0x38   : > { %1856 = vset.pattern.permute.xlu1 %v1968_v0 }
  0x9c   : > { %v303_v5 = vpop.permute.xlu0 %302 }
  0x9d   : > { %v305_v6 = vsub.f32 %v259_v2, %v303_v5 }
  0x9f   : > { %307 = vrot.lane.b32.xlu0 %v305_v6, %s1973_s13  ;;  %s1980_s13 = smov [#allocation5]  }
  0xa0   : > { %s1905_s14 = sshll.u32 %s1980_s13, 4  ;;  %s1906_s14 = int_to_ptr.vmem [resolvable:$false] %s1905_s14 }
  0xa1   : > { %s1907_s20 = scalar_lea.vmem %s1906_s14, 256  ;;  %p1908_p11 = scmp.lt.s32.totalorder %s1659_s8, %s1906_s14 }
  0xa2   : > { %p1909_p12 = scmp.lt.s32.totalorder %s1907_s20, %s1901_s12 }
  0xa3   : > { %282 = vperm.xlu0 %1854, %v259_v2  }
  0xa4   : > { %p1910_p13 = por %p1909_p12, %p1908_p11 }
  0xa5   : > { %v263_v11 = vpop.permute.xlu1 %262 }
  0xa6   : > { %v269_v30 = vmin.f32 %v263_v11, %v268_v24  ;;  %v1974_v24 = vmov 1.0   ;;  %p1911_p0 = pnand %p1910_p13, %p1904_p10 }
  0xa7   : > { %1857 = vset.pattern.permute.xlu0 %v1968_v0 }
  0xaa   : > { %v272_v20 = vpop.permute.xlu1 %271 }
  0xab   : > { %v278_v31 = vmax.f32 %v272_v20, %v277_v25  ;;  %v2124_v25 = vld [vmem:[%s2121_s29] sm:$0xff] }
  0xad   : > { %v279_v36 = vsub.f32 %v269_v30, %v278_v31 }
  0xaf   : > { %v292_v28 = vpop.permute.xlu1 %291  ;;  %v280_v39 = vmax.f32 %v279_v36, 0.0 }
  0xb0   : > { %v298_v32 = vmax.f32 %v292_v28, %v297_v26  ;;  %v710_v26 = vsel %vm709_vm15, %v2124_v25, -inf }
 0x111   : > { %v308_v7 = vpop.permute.xlu0 %307 }
 0x112   : > { %v310_v8 = vmul.f32 %v308_v7, %v305_v6 }
 0x114   : > { %316 = vperm.xlu1 %1856, %v310_v8  }
 0x11e   : > { %v283_v29 = vpop.permute.xlu0 %282 }
 0x11f   : > { %v289_v33 = vmin.f32 %v283_v29, %v288_v27  ;;  %v711_v27 = vrot.slane %v710_v26, 4 }
 0x121   : > { %v299_v37 = vsub.f32 %v289_v33, %v298_v32  ;;  %v712_v28 = vmax.f32 %v710_v26, %v711_v27 }
 0x123   : > { %v300_v40 = vmax.f32 %v299_v37, 0.0  ;;  %v713_v29 = vrot.slane %v712_v28, 2 }
 0x125   : > { %v301_v43 = vmul.f32 %v300_v40, %v280_v39  ;;  %v714_v30 = vmax.f32 %v712_v28, %v713_v29  ;;  %v1975_v29 = vmov 0.0  }
 0x127   : > { %v715_v31 = vrot.slane %v714_v30, 1 }
 0x129   : > { %v2127_v32 = vmax.f32 %v714_v30, %v715_v31 }
 0x12b   : > { %v717_v33 = vsub.f32 %v2124_v25, %v2127_v32 }
 0x12d   : > { %v718_v34 = vmul.f32 1.442695, %v717_v33 }
 0x18f   : > { %v317_v42 = vpop.permute.xlu1 %316 }
 0x190   : > { %v323_v44 = vadd.f32 %v322_v41, %v317_v42 }
 0x192   : > { %v324_v45 = vsub.f32 %v323_v44, %v301_v43 }
 0x194   : > { %1858 = vrcp.f32 %v324_v45 }
 0x195   : > { %1860 = vpow2.f32 %v718_v34 }
 0x1a1   : > { %v1859_v46 = vpop.eup %1858 }
 0x1a2   : > { %v326_v47 = vmul.f32 %v1859_v46, %v301_v43  ;;  %v1861_v35 = vpop.eup %1860 }
 0x1a3   : > { %v721_v36 = vrot.slane %v1861_v35, 4 }
 0x1a4   : > { %332 = vmax.xlane.f32.xlu0 %v326_v47  ;;  %v350_v58 = vrot.slane %v326_v47, 4 }
 0x1a6   : > { %v351_v59 = vmax.f32 %v326_v47, %v350_v58 }
 0x1a8   : > { %v352_v60 = vrot.slane %v351_v59, 2 }
 0x1aa   : > { %v353_v61 = vmax.f32 %v351_v59, %v352_v60 }
 0x1ac   : > { %v354_v62 = vrot.slane %v353_v61, 1 }
 0x1ae   : > { %v2100_v63 = vmax.f32 %v353_v61, %v354_v62 }
 0x1b0   : > { %vm356_vm3 = vcmp.eq.f32.partialorder %v326_v47, %v2100_v63 }
 0x1b1   : > { %v357_v0 = vsel %vm356_vm3, %v2081_v13, 8 }
 0x1b2   : > { %v358_v1 = vrot.slane %v357_v0, 4 }
 0x1b4   : > { %vm359_vm4 = vcmp.lt.s32.totalorder %v357_v0, %v358_v1 }
 0x1b5   : > { %v360_v5 = vsel %vm359_vm4, %v357_v0, %v358_v1 }
 0x1b6   : > { %v361_v9 = vrot.slane %v360_v5, 2 }
 0x1b8   : > { %vm362_vm8 = vcmp.lt.s32.totalorder %v360_v5, %v361_v9 }
 0x1b9   : > { %v363_v14 = vsel %vm362_vm8, %v360_v5, %v361_v9 }
 0x1ba   : > { %v364_v17 = vrot.slane %v363_v14, 1 }
 0x1bc   : > { %vm365_vm11 = vcmp.lt.s32.totalorder %v363_v14, %v364_v17 }
 0x1bd   : > { %v366_v21 = vsel %vm365_vm11, %v363_v14, %v364_v17  ;;  %vm500_vm11 = vcmask 1046534  }
 0x22d   : > { %v2086_v49 = vpop.xlane.xlu0 %332 }
 0x22e   : > { %vm334_vm0 = vcmp.eq.f32.partialorder %v326_v47, %v2086_v49 }
 0x22f   : > { %v335_v50 = vsel %vm334_vm0, %v2084_v48, 128  ;;  %vm529_vm0 = vcmask 1041408  }
 0x230   : > { %v337_v51 = vshra.s32 %v335_v50, 16  ;;  %v336_v53 = vand.u32 65535, %v335_v50  ;;  %v723_v37 = vsel %vm529_vm0, %v721_v36, 0.0 }
 0x231   : > { %v724_v38 = vrot.slane %v723_v37, 4 }
 0x232   : > { %v339_v52 = vcvt.s32.f32 %v337_v51  ;;  %v338_v55 = vcvt.s32.f32 %v336_v53 }
 0x233   : > { %v725_v40 = vadd.f32 %v724_v38, %v723_v37 }
 0x234   : > { %340 = vmin.xlane.f32.xlu1 %v339_v52 }
 0x235   : > { %v726_v42 = vrot.slane %v725_v40, 2 }
 0x237   : > { %v727_v43 = vadd.f32 %v726_v42, %v725_v40 }
 0x239   : > { %v728_v46 = vrot.slane %v727_v43, 1 }
 0x23b   : > { %v729_v51 = vadd.f32 %v728_v46, %v727_v43 }
 0x23d   : > { %1862 = vlog2.f32 %v729_v51 }
 0x24a   : > { %v1863_v9 = vpop.eup %1862 }
 0x2bd   : > { %v341_v54 = vpop.xlane.xlu1 %340 }
 0x2be   : > { %vm342_vm1 = vcmp.eq.f32.partialorder %v339_v52, %v341_v54  ;;  %v347_v2 = vcvt.f32.s32 %v341_v54  ;;  %v246_v52 = vld [vmem:[#allocation2] sm:$0x3] }
 0x2bf   : > { %v343_v56 = vsel %vm342_vm1, %v338_v55, inf  ;;  %vm367_vm1 = vcmp.ge.f32.partialorder %v2086_v49, 0.2  ;;  %v556_v54 = vrot.slane %v246_v52, 6  ;;  %v247_v55 = vld [vmem:[#allocation2 + $0x4] sm:$0x3] }
 0x2c0   : > { %344 = vmin.xlane.f32.xlu0 %v343_v56  ;;  %v348_v6 = vshll.u32 %v347_v2, 16  ;;  %v368_v45 = vsel %vm367_vm1, 1, %v1971_v3  ;;  %v558_v58 = vrot.slane %v246_v52, 4  ;;  %v567_v60 = vrot.slane %v247_v55, 6 }
 0x2c1   : > { %v369_v50 = vrot.slane %v368_v45, 4  ;;  %v562_v59 = vsel %vm529_vm0, %v246_v52, %v556_v54  ;;  %v560_v62 = vrot.slane %v246_v52, 2  ;;  %v569_v1 = vrot.slane %v247_v55, 4 }
 0x2c2   : > { %v573_v2 = vsel %vm529_vm0, %v247_v55, %v567_v60 }
 0x2c3   : > { %v370_v49 = vadd.s32 %v369_v50, %v368_v45  ;;  %v2177_v45 = vsub.s32 6, %v2081_v13 }
 0x2c5   : > { %v371_v56 = vrot.slane %v370_v49, 2 }
 0x2c7   : > { %v372_v61 = vadd.s32 %v371_v56, %v370_v49 }
 0x349   : > { %v345_v4 = vpop.xlane.xlu0 %344 }
 0x34a   : > { %v346_v7 = vcvt.f32.s32 %v345_v4 }
 0x34c   : > { %v349_v8 = vadd.s32 %v348_v6, %v346_v7  ;;  %v571_v6 = vrot.slane %v247_v55, 2  ;;  %v373_v7 = vrot.slane %v372_v61, 1 }
 0x34e   : > { %vm375_vm6 = vcmp.eq.s32.totalorder %v349_v8, %v2084_v48 }
 0x34f   : > { %vm2106_vm7 = vmand %vm375_vm6, %vm331_vm5  ;;  %vm544_vm5 = vcmask 1043456  }
 0x350   : > { %v377_v11 = vsel %vm2106_vm7, %v2081_v13, 4294967295  ;;  %v563_v0 = vsel %vm544_vm5, %v562_v59, %v558_v58  ;;  %v574_v8 = vsel %vm544_vm5, %v573_v2, %v569_v1 }
 0x351   : > { %v378_v12 = vrot.slane %v377_v11, 4 }
 0x353   : > { %vm379_vm9 = vcmp.gt.s32.totalorder %v377_v11, %v378_v12 }
 0x354   : > { %v380_v15 = vsel %vm379_vm9, %v377_v11, %v378_v12  ;;  %v374_v12 = vadd.s32 %v373_v7, %v372_v61 }
 0x355   : > { %v381_v16 = vrot.slane %v380_v15, 2 }
 0x357   : > { %vm382_vm10 = vcmp.gt.s32.totalorder %v380_v15, %v381_v16 }
 0x358   : > { %v383_v18 = vsel %vm382_vm10, %v380_v15, %v381_v16  ;;  %v731_v15 = vmul.f32 0.6931472, %v1863_v9  ;;  %vm492_vm10 = vcmp.gt.s32.totalorder %v374_v12, 0 }
 0x359   : > { %v384_v19 = vrot.slane %v383_v18, 1 }
 0x35b   : > { %vm385_vm12 = vcmp.gt.s32.totalorder %v383_v18, %v384_v19 }
 0x35c   : > { %v386_v20 = vsel %vm385_vm12, %v383_v18, %v384_v19  ;;  %v734_v18 = vrot.slane %v2124_v25, 7  ;;  %v736_v19 = vrot.slane %v2124_v25, 6 }
 0x35d   : > { %vm401_vm13 = vcmp.ge.s32.totalorder %v386_v20, 0 }
 0x35e   : > { %v402_v22 = vsel %vm401_vm13, %v386_v20, %v366_v21 }
 0x35f   : > { %vm403_vm14 = vcmp.eq.s32.totalorder %v402_v22, %v2081_v13 }
 0x360   : > { %1783 = vmatprep.subr.msk.mxu0 %vm403_vm14, %v1974_v24 }
 0x361   : > { %1784 = vmatpush3.msk.msra.mxu0 %vm403_vm14, %v1974_v24 }
 0x362   : > { %1786 = vmatmul.mubr.msk.f32.vlgmr.msra.gmra.mxu0 %vm408_vm2, %v407_v23  ;;  %vm388_vm2 = vmand %vm2106_vm7, %vm367_vm1  ;;  %vm564_vm7 = vcmask 1045504   ;;  %v732_v23 = vadd.f32 %v731_v15, %v2127_v32 }
 0x363   : > { %v389_v39 = vsel %vm388_vm2, 1, %v1971_v3  ;;  %v565_v5 = vsel %vm564_vm7, %v563_v0, %v560_v62  ;;  %v575_v11 = vsel %vm564_vm7, %v574_v8, %v571_v6  ;;  %vm659_vm2 = vcmask 1040384  }
 0x364   : > { %v390_v41 = vrot.slane %v389_v39, 4  ;;  %v577_v10 = vrot.slane %v565_v5, 4  ;;  %v584_v17 = vrot.slane %v575_v11, 4 }
 0x366   : > { %vm391_vm3 = vcmp.gt.s32.totalorder %v389_v39, %v390_v41  ;;  %v578_v16 = vsel %vm544_vm5, %v577_v10, %v558_v58  ;;  %v585_v26 = vsel %vm544_vm5, %v584_v17, %v569_v1 }
 0x367   : > { %v392_v44 = vsel %vm391_vm3, %v389_v39, %v390_v41  ;;  %v510_v41 = vld [vmem:[%s2121_s29 + $0x8] sm:$0xff]  ;;  %vm662_vm3 = vcmask 1042432  }
 0x368   : > { %v393_v47 = vrot.slane %v392_v44, 2 }
 0x36a   : > { %vm394_vm4 = vcmp.gt.s32.totalorder %v392_v44, %v393_v47 }
 0x36b   : > { %v395_v53 = vsel %vm394_vm4, %v392_v44, %v393_v47 }
 0x36c   : > { %v396_v57 = vrot.slane %v395_v53, 1 }
 0x36e   : > { %vm397_vm6 = vcmp.gt.s32.totalorder %v395_v53, %v396_v57 }
 0x36f   : > { %v398_v4 = vsel %vm397_vm6, %v395_v53, %v396_v57  ;;  %vm672_vm6 = vcmask 1044480  }
 0x370   : > { %vm399_vm8 = vcmp.gt.s32.totalorder %v398_v4, 0 }
 0x371   : > { %v400_v14 = vsel %vm399_vm8, 2.0, %v2100_v63 }
 0x372   : > { %vm490_vm9 = vcmp.lt.f32.partialorder %v400_v14, 0.35 }
 0x422   : > { %v1787_v20 = vpop.f32.mrf.mxu0 }
 0x423   : > { %v491_v21 = vsel %vm490_vm9, 0.0, %v1787_v20  ;;  %v582_v22 = vsub.f32 %v1787_v20, %v578_v16 }
 0x424   : > { %v2146_v24 = vsel %vm492_vm10, %v491_v21, 0.0  ;;  %v2149_v63 = vpop.f32.mrf.mxu0 }
 0x425   : > { %vm496_vm12 = vcmp.ne.f32.partialorder %v2146_v24, 0.0  ;;  %v581_v28 = vsub.f32 %v2149_v63, %v577_v10  ;;  %v589_v31 = vmul.f32 %v585_v26, %v582_v22  ;;  %vm497_vm13 = vcmp.gt.f32.partialorder %v2146_v24, 0.0 }
 0x426   : > { %v738_v27 = vsel %vm496_vm12, %v734_v18, %v736_v19  ;;  %v1769_v30 = vsel %vm496_vm12, 1.0, %v1975_v29  ;;  %v2168_v40 = vsel %vm497_vm13, 1.0, %v1975_v29 }
 0x427   : > { %v2157_v32 = vsub.f32 %v732_v23, %v738_v27  ;;  %v501_v33 = vsel %vm500_vm11, %v1769_v30, 0.0  ;;  %v588_v34 = vmul.f32 %v584_v17, %v581_v28  ;;  %v593_v39 = vrot.slane %v589_v31, 6 }
 0x428   : > { %502 = vadd.xlane.f32.xlu0 %v501_v33 }
 0x429   : > { %v740_v35 = vsel %vm496_vm12, 0.0, %v2157_v32  ;;  %v592_v37 = vrot.slane %v588_v34, 6  ;;  %v681_v38 = vrot.slane %v588_v34, 2 }
 0x42a   : > { %v2164_v36 = vmax.f32 %v740_v35, 0.0 }
 0x42b   : > { %v2172_v42 = vsub.f32 %v2124_v25, %v592_v37  ;;  %v683_v43 = vsub.f32 %v588_v34, %v681_v38  ;;  %v594_v46 = vsel %vm529_vm0, %v592_v37, %v593_v39  ;;  %v504_v25 = vsel %vm497_vm13, 1, %v1971_v3 }
 0x42c   : > { %vm747_vm14 = vcmp.gt.s32.totalorder %v2164_v36, 1069547519  ;;  %v598_v53 = vsub.f32 %v510_v41, %v594_v46  ;;  %v614_v58 = vrot.slane %v504_v25, %v2177_v45 }
 0x42d   : > { %v748_v44 = vsel %vm747_vm14, 1, %v1971_v3  ;;  %v639_v47 = vmul.f32 %v2172_v42, %v2172_v42  ;;  %v684_v50 = vmul.f32 %v683_v43, %v683_v43 }
 0x42e   : > { %v749_v51 = vsel %vm500_vm11, %v748_v44, 0  ;;  %v600_v59 = vand.u32 2147483647, %v598_v53  ;;  %v604_v62 = vmul.f32 0.5, %v598_v53  ;;  %v640_v0 = vmul.f32 %v598_v53, %v598_v53 }
 0x42f   : > { %v751_v52 = vshrl.u32 %v749_v51, 16  ;;  %v750_v49 = vand.u32 65535, %v749_v51  ;;  %v642_v54 = vrot.slane %v639_v47, 1  ;;  %v686_v55 = vrot.slane %v684_v50, 4 }
 0x430   : > { %vm602_vm15 = vcmp.lt.f32.partialorder %v600_v59, 1.0  ;;  %v1773_v2 = vadd.f32 -0.5, %v600_v59  ;;  %v606_v4 = vmul.f32 %v604_v62, %v598_v53  ;;  %v646_v5 = vrot.slane %v640_v0, 1 }
 0x431   : > { %v753_v56 = vcvt.s32.f32 %v751_v52  ;;  %v752_v57 = vcvt.s32.f32 %v750_v49  ;;  %v644_v60 = vadd.f32 %v642_v54, %v639_v47  ;;  %v688_v61 = vsel %vm529_vm0, %v686_v55, 0.0 }
 0x432   : > { %v689_v1 = vrot.slane %v688_v61, 4  ;;  %vm2188_vm1 = vcmp.eq.s32.totalorder %v614_v58, 1  ;;  %v610_v9 = vsel %vm602_vm15, %v606_v4, %v1773_v2  ;;  %v648_v10 = vadd.f32 %v646_v5, %v640_v0 }
 0x433   : > { %756 = vadd.xlane.f32.xlu1 %v753_v56  ;;  %754 = vadd.xlane.f32.xlu0 %v752_v57  ;;  %v650_v7 = vrot.slane %v644_v60, 6  ;;  %v2194_v12 = vsel %vm2188_vm1, %v610_v9, 0.0  ;;  %v1977_v4 = vmov 1069547519  }
 0x434   : > { %v690_v6 = vadd.f32 %v689_v1, %v688_v61  ;;  %v653_v14 = vrot.slane %v648_v10, 7  ;;  %v655_v16 = vrot.slane %v648_v10, 1  ;;  %v657_v19 = vrot.slane %v648_v10, 2 }
 0x435   : > { %v1976_v1 = vmov 4294967295  }
 0x436   : > { %v691_v11 = vrot.slane %v690_v6, 2  ;;  %v660_v17 = vsel %vm659_vm2, %v650_v7, %v653_v14 }
 0x437   : > { %v661_v20 = vsel %vm529_vm0, %v660_v17, %v648_v10 }
 0x438   : > { %v692_v15 = vadd.f32 %v691_v11, %v690_v6  ;;  %v663_v21 = vsel %vm662_vm3, %v661_v20, %v655_v16 }
 0x439   : > { %v664_v23 = vsel %vm544_vm5, %v663_v21, %v657_v19 }
 0x43a   : > { %v693_v18 = vrot.slane %v692_v15, 1  ;;  %1864 = vrsqrt.f32 %v664_v23  ;;  %vm667_vm4 = vcmp.eq.f32.partialorder %v664_v23, inf  ;;  %v670_v29 = vand.u32 2147483648, %v664_v23 }
 0x43b   : > { %vm669_vm7 = vcmp.eq.f32.partialorder %v664_v23, 0.0 }
 0x43c   : > { %v694_v22 = vadd.f32 %v693_v18, %v692_v15 }
 0x43e   : > { %1866 = vrsqrt.f32 %v694_v22  ;;  %vm697_vm8 = vcmp.eq.f32.partialorder %v694_v22, inf  ;;  %v700_v33 = vand.u32 2147483648, %v694_v22  ;;  %vm699_vm9 = vcmp.eq.f32.partialorder %v694_v22, 0.0 }
 0x447   : > { %v1865_v26 = vpop.eup %1864 }
 0x448   : > { %v666_v28 = vmul.f32 %v1865_v26, %v664_v23 }
 0x44a   : > { %v668_v31 = vsel %vm667_vm4, %v664_v23, %v666_v28 }
 0x44b   : > { %v1867_v27 = vpop.eup %1866  ;;  %v671_v34 = vsel %vm669_vm7, %v670_v29, %v668_v31 }
 0x44c   : > { %v696_v30 = vmul.f32 %v1867_v27, %v694_v22  ;;  %v673_v37 = vsel %vm672_vm6, %v671_v34, 0.0 }
 0x44d   : > { %v674_v39 = vrot.slane %v673_v37, 4 }
 0x44e   : > { %v698_v35 = vsel %vm697_vm8, %v694_v22, %v696_v30 }
 0x44f   : > { %v701_v38 = vsel %vm699_vm9, %v700_v33, %v698_v35  ;;  %v675_v41 = vadd.f32 %v674_v39, %v673_v37 }
 0x450   : > { %1868 = vrcp.f32 %v701_v38 }
 0x451   : > { %v676_v43 = vrot.slane %v675_v41, 2 }
 0x453   : > { %v677_v44 = vadd.f32 %v676_v43, %v675_v41 }
 0x455   : > { %v678_v46 = vrot.slane %v677_v44, 1 }
 0x457   : > { %v679_v47 = vadd.f32 %v678_v46, %v677_v44 }
 0x459   : > { %v680_v50 = vmul.f32 0.2, %v679_v47 }
 0x45d   : > { %v1869_v51 = vpop.eup %1868 }
 0x45e   : > { %v703_v25 = vmul.f32 %v1869_v51, %v680_v50 }
 0x460   : > { %v2200_v52 = vsel %vm497_vm13, %v703_v25, 0.0 }
 0x4b1   : > { %v2202_v49 = vpop.xlane.xlu0 %502 }
 0x4b2   : > { %v742_v53 = vmul.f32 3.0, %v2202_v49 }
 0x4b4   : > { %v743_v54 = vceil.f32 %v742_v53 }
 0x4b6   : > { %v744_v55 = vmin.f32 %v743_v54, 127.0 }
 0x4b8   : > { %v1788_v58 = vtrunc.f32 %v744_v55 }
 0x4ba   : > { %v2205_v62 = vcvt.f32.s32 %v1788_v58 }
 0x4bc   : > { %v757_v56 = vpop.xlane.xlu1 %756  ;;  %v755_v57 = vpop.xlane.xlu0 %754 }
 0x4bd   : > { %v759_v59 = vcvt.f32.s32 %v757_v56  ;;  %v758_v61 = vcvt.f32.s32 %v755_v57 }
 0x4bf   : > { %v760_v60 = vshll.u32 %v759_v59, 16 }
 0x4c1   : > { %v761_v0 = vadd.s32 %v760_v60, %v758_v61 }
 0x4c3   : > { %vm762_vm10 = vcmp.ge.s32.totalorder %v761_v0, %v2205_v62 }
 0x4c4   : > { %v763_v2 = vsel %vm762_vm10, 1069547519, %v1976_v1  ;;  %v764_v5 = vsel %vm762_vm10, 2139095040, %v1977_v4 }
 0x4c5   : > { %v765_v6 = vsub.s32 %v764_v5, %v763_v2 }
 0x4c7   : > { %v766_v7 = vshra.s32 %v765_v6, 1 }
 0x4c9   : > { %v767_v9 = vadd.s32 %v766_v7, %v763_v2 }
 0x4cb   : > { %vm768_vm13 = vcmp.gt.s32.totalorder %v2164_v36, %v767_v9 }
 0x4cc   : > { %v769_v10 = vsel %vm768_vm13, 1, %v1971_v3 }
 0x4cd   : > { %v770_v11 = vsel %vm500_vm11, %v769_v10, 0 }
 0x4ce   : > { %v772_v14 = vshrl.u32 %v770_v11, 16  ;;  %v771_v15 = vand.u32 65535, %v770_v11 }
 0x4d0   : > { %v774_v16 = vcvt.s32.f32 %v772_v14  ;;  %v773_v17 = vcvt.s32.f32 %v771_v15 }
 0x4d2   : > { %777 = vadd.xlane.f32.xlu1 %v774_v16  ;;  %775 = vadd.xlane.f32.xlu0 %v773_v17 }
 0x55b   : > { %v778_v18 = vpop.xlane.xlu1 %777  ;;  %v776_v19 = vpop.xlane.xlu0 %775 }
 0x55c   : > { %v780_v20 = vcvt.f32.s32 %v778_v18  ;;  %v779_v22 = vcvt.f32.s32 %v776_v19 }
 0x55e   : > { %v781_v21 = vshll.u32 %v780_v20, 16 }
 0x560   : > { %v782_v23 = vadd.s32 %v781_v21, %v779_v22 }
 0x562   : > { %vm783_vm14 = vcmp.ge.s32.totalorder %v782_v23, %v2205_v62 }
 0x563   : > { %v784_v26 = vsel %vm783_vm14, %v767_v9, %v763_v2  ;;  %v785_v27 = vsel %vm783_vm14, %v764_v5, %v767_v9 }
 0x564   : > { %v786_v28 = vsub.s32 %v785_v27, %v784_v26 }
 0x566   : > { %v787_v29 = vshra.s32 %v786_v28, 1 }
 0x568   : > { %v788_v30 = vadd.s32 %v787_v29, %v784_v26 }
 0x56a   : > { %vm789_vm15 = vcmp.gt.s32.totalorder %v2164_v36, %v788_v30 }
 0x56b   : > { %v790_v31 = vsel %vm789_vm15, 1, %v1971_v3 }
 0x56c   : > { %v791_v33 = vsel %vm500_vm11, %v790_v31, 0 }
 0x56d   : > { %v793_v34 = vshrl.u32 %v791_v33, 16  ;;  %v792_v35 = vand.u32 65535, %v791_v33 }
 0x56f   : > { %v795_v37 = vcvt.s32.f32 %v793_v34  ;;  %v794_v38 = vcvt.s32.f32 %v792_v35 }
 0x571   : > { %798 = vadd.xlane.f32.xlu1 %v795_v37  ;;  %796 = vadd.xlane.f32.xlu0 %v794_v38 }
 0x5fa   : > { %v799_v39 = vpop.xlane.xlu1 %798  ;;  %v797_v41 = vpop.xlane.xlu0 %796 }
 0x5fb   : > { %v801_v43 = vcvt.f32.s32 %v799_v39  ;;  %v800_v46 = vcvt.f32.s32 %v797_v41 }
 0x5fd   : > { %v802_v44 = vshll.u32 %v801_v43, 16 }
 0x5ff   : > { %v803_v47 = vadd.s32 %v802_v44, %v800_v46 }
 0x601   : > { %vm804_vm2 = vcmp.ge.s32.totalorder %v803_v47, %v2205_v62 }
 0x602   : > { %v805_v50 = vsel %vm804_vm2, %v788_v30, %v784_v26  ;;  %v806_v51 = vsel %vm804_vm2, %v785_v27, %v788_v30 }
 0x603   : > { %v807_v25 = vsub.s32 %v806_v51, %v805_v50 }
 0x605   : > { %v808_v53 = vshra.s32 %v807_v25, 1 }
 0x607   : > { %v809_v54 = vadd.s32 %v808_v53, %v805_v50 }
 0x609   : > { %vm810_vm3 = vcmp.gt.s32.totalorder %v2164_v36, %v809_v54 }
 0x60a   : > { %v811_v55 = vsel %vm810_vm3, 1, %v1971_v3 }
 0x60b   : > { %v812_v56 = vsel %vm500_vm11, %v811_v55, 0 }
 0x60c   : > { %v814_v57 = vshrl.u32 %v812_v56, 16  ;;  %v813_v58 = vand.u32 65535, %v812_v56 }
 0x60e   : > { %v816_v59 = vcvt.s32.f32 %v814_v57  ;;  %v815_v60 = vcvt.s32.f32 %v813_v58 }
 0x610   : > { %819 = vadd.xlane.f32.xlu1 %v816_v59  ;;  %817 = vadd.xlane.f32.xlu0 %v815_v60 }
 0x699   : > { %v820_v61 = vpop.xlane.xlu1 %819  ;;  %v818_v0 = vpop.xlane.xlu0 %817 }
 0x69a   : > { %v822_v1 = vcvt.f32.s32 %v820_v61  ;;  %v821_v4 = vcvt.f32.s32 %v818_v0 }
 0x69c   : > { %v823_v2 = vshll.u32 %v822_v1, 16 }
 0x69e   : > { %v824_v5 = vadd.s32 %v823_v2, %v821_v4 }
 0x6a0   : > { %vm825_vm4 = vcmp.ge.s32.totalorder %v824_v5, %v2205_v62 }
 0x6a1   : > { %v826_v6 = vsel %vm825_vm4, %v809_v54, %v805_v50  ;;  %v827_v7 = vsel %vm825_vm4, %v806_v51, %v809_v54 }
 0x6a2   : > { %v828_v9 = vsub.s32 %v827_v7, %v826_v6 }
 0x6a4   : > { %v829_v10 = vshra.s32 %v828_v9, 1 }
 0x6a6   : > { %v830_v11 = vadd.s32 %v829_v10, %v826_v6 }
 0x6a8   : > { %vm831_vm6 = vcmp.gt.s32.totalorder %v2164_v36, %v830_v11 }
 0x6a9   : > { %v832_v14 = vsel %vm831_vm6, 1, %v1971_v3 }
 0x6aa   : > { %v833_v15 = vsel %vm500_vm11, %v832_v14, 0 }
 0x6ab   : > { %v835_v16 = vshrl.u32 %v833_v15, 16  ;;  %v834_v17 = vand.u32 65535, %v833_v15 }
 0x6ad   : > { %v837_v18 = vcvt.s32.f32 %v835_v16  ;;  %v836_v19 = vcvt.s32.f32 %v834_v17 }
 0x6af   : > { %840 = vadd.xlane.f32.xlu1 %v837_v18  ;;  %838 = vadd.xlane.f32.xlu0 %v836_v19 }
 0x738   : > { %v841_v20 = vpop.xlane.xlu1 %840  ;;  %v839_v21 = vpop.xlane.xlu0 %838 }
 0x739   : > { %v843_v22 = vcvt.f32.s32 %v841_v20  ;;  %v842_v26 = vcvt.f32.s32 %v839_v21 }
 0x73b   : > { %v844_v23 = vshll.u32 %v843_v22, 16 }
 0x73d   : > { %v845_v27 = vadd.s32 %v844_v23, %v842_v26 }
 0x73f   : > { %vm846_vm7 = vcmp.ge.s32.totalorder %v845_v27, %v2205_v62 }
 0x740   : > { %v847_v28 = vsel %vm846_vm7, %v830_v11, %v826_v6  ;;  %v848_v29 = vsel %vm846_vm7, %v827_v7, %v830_v11 }
 0x741   : > { %v849_v30 = vsub.s32 %v848_v29, %v847_v28 }
 0x743   : > { %v850_v31 = vshra.s32 %v849_v30, 1 }
 0x745   : > { %v851_v33 = vadd.s32 %v850_v31, %v847_v28 }
 0x747   : > { %vm852_vm8 = vcmp.gt.s32.totalorder %v2164_v36, %v851_v33 }
 0x748   : > { %v853_v34 = vsel %vm852_vm8, 1, %v1971_v3 }
 0x749   : > { %v854_v35 = vsel %vm500_vm11, %v853_v34, 0 }
 0x74a   : > { %v856_v37 = vshrl.u32 %v854_v35, 16  ;;  %v855_v38 = vand.u32 65535, %v854_v35 }
 0x74c   : > { %v858_v39 = vcvt.s32.f32 %v856_v37  ;;  %v857_v41 = vcvt.s32.f32 %v855_v38 }
 0x74e   : > { %861 = vadd.xlane.f32.xlu1 %v858_v39  ;;  %859 = vadd.xlane.f32.xlu0 %v857_v41 }
 0x7d7   : > { %v862_v43 = vpop.xlane.xlu1 %861  ;;  %v860_v44 = vpop.xlane.xlu0 %859 }
 0x7d8   : > { %v864_v46 = vcvt.f32.s32 %v862_v43  ;;  %v863_v50 = vcvt.f32.s32 %v860_v44 }
 0x7da   : > { %v865_v47 = vshll.u32 %v864_v46, 16 }
 0x7dc   : > { %v866_v51 = vadd.s32 %v865_v47, %v863_v50 }
 0x7de   : > { %vm867_vm9 = vcmp.ge.s32.totalorder %v866_v51, %v2205_v62 }
 0x7df   : > { %v868_v25 = vsel %vm867_vm9, %v851_v33, %v847_v28  ;;  %v869_v53 = vsel %vm867_vm9, %v848_v29, %v851_v33 }
 0x7e0   : > { %v870_v54 = vsub.s32 %v869_v53, %v868_v25 }
 0x7e2   : > { %v871_v55 = vshra.s32 %v870_v54, 1 }
 0x7e4   : > { %v872_v56 = vadd.s32 %v871_v55, %v868_v25 }
 0x7e6   : > { %vm873_vm10 = vcmp.gt.s32.totalorder %v2164_v36, %v872_v56 }
 0x7e7   : > { %v874_v57 = vsel %vm873_vm10, 1, %v1971_v3 }
 0x7e8   : > { %v875_v58 = vsel %vm500_vm11, %v874_v57, 0 }
 0x7e9   : > { %v877_v59 = vshrl.u32 %v875_v58, 16  ;;  %v876_v60 = vand.u32 65535, %v875_v58 }
 0x7eb   : > { %v879_v61 = vcvt.s32.f32 %v877_v59  ;;  %v878_v0 = vcvt.s32.f32 %v876_v60 }
 0x7ed   : > { %882 = vadd.xlane.f32.xlu1 %v879_v61  ;;  %880 = vadd.xlane.f32.xlu0 %v878_v0 }
 0x876   : > { %v883_v1 = vpop.xlane.xlu1 %882  ;;  %v881_v2 = vpop.xlane.xlu0 %880 }
 0x877   : > { %v885_v4 = vcvt.f32.s32 %v883_v1  ;;  %v884_v6 = vcvt.f32.s32 %v881_v2 }
 0x879   : > { %v886_v5 = vshll.u32 %v885_v4, 16 }
 0x87b   : > { %v887_v7 = vadd.s32 %v886_v5, %v884_v6 }
 0x87d   : > { %vm888_vm13 = vcmp.ge.s32.totalorder %v887_v7, %v2205_v62 }
 0x87e   : > { %v889_v9 = vsel %vm888_vm13, %v872_v56, %v868_v25  ;;  %v890_v10 = vsel %vm888_vm13, %v869_v53, %v872_v56 }
 0x87f   : > { %v891_v11 = vsub.s32 %v890_v10, %v889_v9 }
 0x881   : > { %v892_v14 = vshra.s32 %v891_v11, 1 }
 0x883   : > { %v893_v15 = vadd.s32 %v892_v14, %v889_v9 }
 0x885   : > { %vm894_vm14 = vcmp.gt.s32.totalorder %v2164_v36, %v893_v15 }
 0x886   : > { %v895_v16 = vsel %vm894_vm14, 1, %v1971_v3 }
 0x887   : > { %v896_v17 = vsel %vm500_vm11, %v895_v16, 0 }
 0x888   : > { %v898_v18 = vshrl.u32 %v896_v17, 16  ;;  %v897_v19 = vand.u32 65535, %v896_v17 }
 0x88a   : > { %v900_v20 = vcvt.s32.f32 %v898_v18  ;;  %v899_v21 = vcvt.s32.f32 %v897_v19 }
 0x88c   : > { %903 = vadd.xlane.f32.xlu1 %v900_v20  ;;  %901 = vadd.xlane.f32.xlu0 %v899_v21 }
 0x915   : > { %v904_v22 = vpop.xlane.xlu1 %903  ;;  %v902_v23 = vpop.xlane.xlu0 %901 }
 0x916   : > { %v906_v26 = vcvt.f32.s32 %v904_v22  ;;  %v905_v28 = vcvt.f32.s32 %v902_v23 }
 0x918   : > { %v907_v27 = vshll.u32 %v906_v26, 16 }
 0x91a   : > { %v908_v29 = vadd.s32 %v907_v27, %v905_v28 }
 0x91c   : > { %vm909_vm15 = vcmp.ge.s32.totalorder %v908_v29, %v2205_v62 }
 0x91d   : > { %v910_v30 = vsel %vm909_vm15, %v893_v15, %v889_v9  ;;  %v911_v31 = vsel %vm909_vm15, %v890_v10, %v893_v15 }
 0x91e   : > { %v912_v33 = vsub.s32 %v911_v31, %v910_v30 }
 0x920   : > { %v913_v34 = vshra.s32 %v912_v33, 1 }
 0x922   : > { %v914_v35 = vadd.s32 %v913_v34, %v910_v30 }
 0x924   : > { %vm915_vm2 = vcmp.gt.s32.totalorder %v2164_v36, %v914_v35 }
 0x925   : > { %v916_v37 = vsel %vm915_vm2, 1, %v1971_v3 }
 0x926   : > { %v917_v38 = vsel %vm500_vm11, %v916_v37, 0 }
 0x927   : > { %v919_v39 = vshrl.u32 %v917_v38, 16  ;;  %v918_v41 = vand.u32 65535, %v917_v38 }
 0x929   : > { %v921_v43 = vcvt.s32.f32 %v919_v39  ;;  %v920_v44 = vcvt.s32.f32 %v918_v41 }
 0x92b   : > { %924 = vadd.xlane.f32.xlu1 %v921_v43  ;;  %922 = vadd.xlane.f32.xlu0 %v920_v44 }
 0x9b4   : > { %v925_v46 = vpop.xlane.xlu1 %924  ;;  %v923_v47 = vpop.xlane.xlu0 %922 }
 0x9b5   : > { %v927_v50 = vcvt.f32.s32 %v925_v46  ;;  %v926_v25 = vcvt.f32.s32 %v923_v47 }
 0x9b7   : > { %v928_v51 = vshll.u32 %v927_v50, 16 }
 0x9b9   : > { %v929_v53 = vadd.s32 %v928_v51, %v926_v25 }
 0x9bb   : > { %vm930_vm3 = vcmp.ge.s32.totalorder %v929_v53, %v2205_v62 }
 0x9bc   : > { %v931_v54 = vsel %vm930_vm3, %v914_v35, %v910_v30  ;;  %v932_v55 = vsel %vm930_vm3, %v911_v31, %v914_v35 }
 0x9bd   : > { %v933_v56 = vsub.s32 %v932_v55, %v931_v54 }
 0x9bf   : > { %v934_v57 = vshra.s32 %v933_v56, 1 }
 0x9c1   : > { %v935_v58 = vadd.s32 %v934_v57, %v931_v54 }
 0x9c3   : > { %vm936_vm4 = vcmp.gt.s32.totalorder %v2164_v36, %v935_v58 }
 0x9c4   : > { %v937_v59 = vsel %vm936_vm4, 1, %v1971_v3 }
 0x9c5   : > { %v938_v60 = vsel %vm500_vm11, %v937_v59, 0 }
 0x9c6   : > { %v940_v61 = vshrl.u32 %v938_v60, 16  ;;  %v939_v0 = vand.u32 65535, %v938_v60 }
 0x9c8   : > { %v942_v1 = vcvt.s32.f32 %v940_v61  ;;  %v941_v2 = vcvt.s32.f32 %v939_v0 }
 0x9ca   : > { %945 = vadd.xlane.f32.xlu1 %v942_v1  ;;  %943 = vadd.xlane.f32.xlu0 %v941_v2 }
 0xa53   : > { %v946_v4 = vpop.xlane.xlu1 %945  ;;  %v944_v5 = vpop.xlane.xlu0 %943 }
 0xa54   : > { %v948_v6 = vcvt.f32.s32 %v946_v4  ;;  %v947_v9 = vcvt.f32.s32 %v944_v5 }
 0xa56   : > { %v949_v7 = vshll.u32 %v948_v6, 16 }
 0xa58   : > { %v950_v10 = vadd.s32 %v949_v7, %v947_v9 }
 0xa5a   : > { %vm951_vm6 = vcmp.ge.s32.totalorder %v950_v10, %v2205_v62 }
 0xa5b   : > { %v952_v11 = vsel %vm951_vm6, %v935_v58, %v931_v54  ;;  %v953_v14 = vsel %vm951_vm6, %v932_v55, %v935_v58 }
 0xa5c   : > { %v954_v15 = vsub.s32 %v953_v14, %v952_v11 }
 0xa5e   : > { %v955_v16 = vshra.s32 %v954_v15, 1 }
 0xa60   : > { %v956_v17 = vadd.s32 %v955_v16, %v952_v11 }
 0xa62   : > { %vm957_vm7 = vcmp.gt.s32.totalorder %v2164_v36, %v956_v17 }
 0xa63   : > { %v958_v18 = vsel %vm957_vm7, 1, %v1971_v3 }
 0xa64   : > { %v959_v19 = vsel %vm500_vm11, %v958_v18, 0 }
 0xa65   : > { %v961_v20 = vshrl.u32 %v959_v19, 16  ;;  %v960_v21 = vand.u32 65535, %v959_v19 }
 0xa67   : > { %v963_v22 = vcvt.s32.f32 %v961_v20  ;;  %v962_v23 = vcvt.s32.f32 %v960_v21 }
 0xa69   : > { %966 = vadd.xlane.f32.xlu1 %v963_v22  ;;  %964 = vadd.xlane.f32.xlu0 %v962_v23 }
 0xaf2   : > { %v967_v26 = vpop.xlane.xlu1 %966  ;;  %v965_v27 = vpop.xlane.xlu0 %964 }
 0xaf3   : > { %v969_v28 = vcvt.f32.s32 %v967_v26  ;;  %v968_v30 = vcvt.f32.s32 %v965_v27 }
 0xaf5   : > { %v970_v29 = vshll.u32 %v969_v28, 16 }
 0xaf7   : > { %v971_v31 = vadd.s32 %v970_v29, %v968_v30 }
 0xaf9   : > { %vm972_vm8 = vcmp.ge.s32.totalorder %v971_v31, %v2205_v62 }
 0xafa   : > { %v973_v33 = vsel %vm972_vm8, %v956_v17, %v952_v11  ;;  %v974_v34 = vsel %vm972_vm8, %v953_v14, %v956_v17 }
 0xafb   : > { %v975_v35 = vsub.s32 %v974_v34, %v973_v33 }
 0xafd   : > { %v976_v37 = vshra.s32 %v975_v35, 1 }
 0xaff   : > { %v977_v38 = vadd.s32 %v976_v37, %v973_v33 }
 0xb01   : > { %vm978_vm9 = vcmp.gt.s32.totalorder %v2164_v36, %v977_v38 }
 0xb02   : > { %v979_v39 = vsel %vm978_vm9, 1, %v1971_v3 }
 0xb03   : > { %v980_v41 = vsel %vm500_vm11, %v979_v39, 0 }
 0xb04   : > { %v982_v43 = vshrl.u32 %v980_v41, 16  ;;  %v981_v44 = vand.u32 65535, %v980_v41 }
 0xb06   : > { %v984_v46 = vcvt.s32.f32 %v982_v43  ;;  %v983_v47 = vcvt.s32.f32 %v981_v44 }
 0xb08   : > { %987 = vadd.xlane.f32.xlu1 %v984_v46  ;;  %985 = vadd.xlane.f32.xlu0 %v983_v47 }
 0xb91   : > { %v988_v50 = vpop.xlane.xlu1 %987  ;;  %v986_v51 = vpop.xlane.xlu0 %985 }
 0xb92   : > { %v990_v25 = vcvt.f32.s32 %v988_v50  ;;  %v989_v54 = vcvt.f32.s32 %v986_v51 }
 0xb94   : > { %v991_v53 = vshll.u32 %v990_v25, 16 }
 0xb96   : > { %v992_v55 = vadd.s32 %v991_v53, %v989_v54 }
 0xb98   : > { %vm993_vm10 = vcmp.ge.s32.totalorder %v992_v55, %v2205_v62 }
 0xb99   : > { %v994_v56 = vsel %vm993_vm10, %v977_v38, %v973_v33  ;;  %v995_v57 = vsel %vm993_vm10, %v974_v34, %v977_v38 }
 0xb9a   : > { %v996_v58 = vsub.s32 %v995_v57, %v994_v56 }
 0xb9c   : > { %v997_v59 = vshra.s32 %v996_v58, 1 }
 0xb9e   : > { %v998_v60 = vadd.s32 %v997_v59, %v994_v56 }
 0xba0   : > { %vm999_vm13 = vcmp.gt.s32.totalorder %v2164_v36, %v998_v60 }
 0xba1   : > { %v1000_v61 = vsel %vm999_vm13, 1, %v1971_v3 }
 0xba2   : > { %v1001_v0 = vsel %vm500_vm11, %v1000_v61, 0 }
 0xba3   : > { %v1003_v1 = vshrl.u32 %v1001_v0, 16  ;;  %v1002_v2 = vand.u32 65535, %v1001_v0 }
 0xba5   : > { %v1005_v4 = vcvt.s32.f32 %v1003_v1  ;;  %v1004_v5 = vcvt.s32.f32 %v1002_v2 }
 0xba7   : > { %1008 = vadd.xlane.f32.xlu1 %v1005_v4  ;;  %1006 = vadd.xlane.f32.xlu0 %v1004_v5 }
 0xc30   : > { %v1009_v6 = vpop.xlane.xlu1 %1008  ;;  %v1007_v7 = vpop.xlane.xlu0 %1006 }
 0xc31   : > { %v1011_v9 = vcvt.f32.s32 %v1009_v6  ;;  %v1010_v11 = vcvt.f32.s32 %v1007_v7 }
 0xc33   : > { %v1012_v10 = vshll.u32 %v1011_v9, 16 }
 0xc35   : > { %v1013_v14 = vadd.s32 %v1012_v10, %v1010_v11 }
 0xc37   : > { %vm1014_vm14 = vcmp.ge.s32.totalorder %v1013_v14, %v2205_v62 }
 0xc38   : > { %v1015_v15 = vsel %vm1014_vm14, %v998_v60, %v994_v56  ;;  %v1016_v16 = vsel %vm1014_vm14, %v995_v57, %v998_v60 }
 0xc39   : > { %v1017_v17 = vsub.s32 %v1016_v16, %v1015_v15 }
 0xc3b   : > { %v1018_v18 = vshra.s32 %v1017_v17, 1 }
 0xc3d   : > { %v1019_v19 = vadd.s32 %v1018_v18, %v1015_v15 }
 0xc3f   : > { %vm1020_vm15 = vcmp.gt.s32.totalorder %v2164_v36, %v1019_v19 }
 0xc40   : > { %v1021_v20 = vsel %vm1020_vm15, 1, %v1971_v3 }
 0xc41   : > { %v1022_v21 = vsel %vm500_vm11, %v1021_v20, 0 }
 0xc42   : > { %v1024_v22 = vshrl.u32 %v1022_v21, 16  ;;  %v1023_v23 = vand.u32 65535, %v1022_v21 }
 0xc44   : > { %v1026_v26 = vcvt.s32.f32 %v1024_v22  ;;  %v1025_v27 = vcvt.s32.f32 %v1023_v23 }
 0xc46   : > { %1029 = vadd.xlane.f32.xlu1 %v1026_v26  ;;  %1027 = vadd.xlane.f32.xlu0 %v1025_v27 }
 0xccf   : > { %v1030_v28 = vpop.xlane.xlu1 %1029  ;;  %v1028_v29 = vpop.xlane.xlu0 %1027 }
 0xcd0   : > { %v1032_v30 = vcvt.f32.s32 %v1030_v28  ;;  %v1031_v33 = vcvt.f32.s32 %v1028_v29 }
 0xcd2   : > { %v1033_v31 = vshll.u32 %v1032_v30, 16 }
 0xcd4   : > { %v1034_v34 = vadd.s32 %v1033_v31, %v1031_v33 }
 0xcd6   : > { %vm1035_vm2 = vcmp.ge.s32.totalorder %v1034_v34, %v2205_v62 }
 0xcd7   : > { %v1036_v35 = vsel %vm1035_vm2, %v1019_v19, %v1015_v15  ;;  %v1037_v37 = vsel %vm1035_vm2, %v1016_v16, %v1019_v19 }
 0xcd8   : > { %v1038_v38 = vsub.s32 %v1037_v37, %v1036_v35 }
 0xcda   : > { %v1039_v39 = vshra.s32 %v1038_v38, 1 }
 0xcdc   : > { %v1040_v41 = vadd.s32 %v1039_v39, %v1036_v35 }
 0xcde   : > { %vm1041_vm3 = vcmp.gt.s32.totalorder %v2164_v36, %v1040_v41 }
 0xcdf   : > { %v1042_v43 = vsel %vm1041_vm3, 1, %v1971_v3 }
 0xce0   : > { %v1043_v44 = vsel %vm500_vm11, %v1042_v43, 0 }
 0xce1   : > { %v1045_v46 = vshrl.u32 %v1043_v44, 16  ;;  %v1044_v47 = vand.u32 65535, %v1043_v44 }
 0xce3   : > { %v1047_v50 = vcvt.s32.f32 %v1045_v46  ;;  %v1046_v51 = vcvt.s32.f32 %v1044_v47 }
 0xce5   : > { %1050 = vadd.xlane.f32.xlu1 %v1047_v50  ;;  %1048 = vadd.xlane.f32.xlu0 %v1046_v51 }
 0xd6e   : > { %v1051_v25 = vpop.xlane.xlu1 %1050  ;;  %v1049_v53 = vpop.xlane.xlu0 %1048 }
 0xd6f   : > { %v1053_v54 = vcvt.f32.s32 %v1051_v25  ;;  %v1052_v56 = vcvt.f32.s32 %v1049_v53 }
 0xd71   : > { %v1054_v55 = vshll.u32 %v1053_v54, 16 }
 0xd73   : > { %v1055_v57 = vadd.s32 %v1054_v55, %v1052_v56 }
 0xd75   : > { %vm1056_vm4 = vcmp.ge.s32.totalorder %v1055_v57, %v2205_v62 }
 0xd76   : > { %v1057_v58 = vsel %vm1056_vm4, %v1040_v41, %v1036_v35  ;;  %v1058_v59 = vsel %vm1056_vm4, %v1037_v37, %v1040_v41 }
 0xd77   : > { %v1059_v60 = vsub.s32 %v1058_v59, %v1057_v58 }
 0xd79   : > { %v1060_v61 = vshra.s32 %v1059_v60, 1 }
 0xd7b   : > { %v1061_v0 = vadd.s32 %v1060_v61, %v1057_v58 }
 0xd7d   : > { %vm1062_vm6 = vcmp.gt.s32.totalorder %v2164_v36, %v1061_v0 }
 0xd7e   : > { %v1063_v1 = vsel %vm1062_vm6, 1, %v1971_v3 }
 0xd7f   : > { %v1064_v2 = vsel %vm500_vm11, %v1063_v1, 0 }
 0xd80   : > { %v1066_v4 = vshrl.u32 %v1064_v2, 16  ;;  %v1065_v5 = vand.u32 65535, %v1064_v2 }
 0xd82   : > { %v1068_v6 = vcvt.s32.f32 %v1066_v4  ;;  %v1067_v7 = vcvt.s32.f32 %v1065_v5 }
 0xd84   : > { %1071 = vadd.xlane.f32.xlu1 %v1068_v6  ;;  %1069 = vadd.xlane.f32.xlu0 %v1067_v7 }
 0xe0d   : > { %v1072_v9 = vpop.xlane.xlu1 %1071  ;;  %v1070_v10 = vpop.xlane.xlu0 %1069 }
 0xe0e   : > { %v1074_v11 = vcvt.f32.s32 %v1072_v9  ;;  %v1073_v15 = vcvt.f32.s32 %v1070_v10 }
 0xe10   : > { %v1075_v14 = vshll.u32 %v1074_v11, 16 }
 0xe12   : > { %v1076_v16 = vadd.s32 %v1075_v14, %v1073_v15 }
 0xe14   : > { %vm1077_vm7 = vcmp.ge.s32.totalorder %v1076_v16, %v2205_v62 }
 0xe15   : > { %v1078_v17 = vsel %vm1077_vm7, %v1061_v0, %v1057_v58  ;;  %v1079_v18 = vsel %vm1077_vm7, %v1058_v59, %v1061_v0 }
 0xe16   : > { %v1080_v19 = vsub.s32 %v1079_v18, %v1078_v17 }
 0xe18   : > { %v1081_v20 = vshra.s32 %v1080_v19, 1 }
 0xe1a   : > { %v1082_v21 = vadd.s32 %v1081_v20, %v1078_v17 }
 0xe1c   : > { %vm1083_vm8 = vcmp.gt.s32.totalorder %v2164_v36, %v1082_v21 }
 0xe1d   : > { %v1084_v22 = vsel %vm1083_vm8, 1, %v1971_v3 }
 0xe1e   : > { %v1085_v23 = vsel %vm500_vm11, %v1084_v22, 0 }
 0xe1f   : > { %v1087_v26 = vshrl.u32 %v1085_v23, 16  ;;  %v1086_v27 = vand.u32 65535, %v1085_v23 }
 0xe21   : > { %v1089_v28 = vcvt.s32.f32 %v1087_v26  ;;  %v1088_v29 = vcvt.s32.f32 %v1086_v27 }
 0xe23   : > { %1092 = vadd.xlane.f32.xlu1 %v1089_v28  ;;  %1090 = vadd.xlane.f32.xlu0 %v1088_v29 }
 0xeac   : > { %v1093_v30 = vpop.xlane.xlu1 %1092  ;;  %v1091_v31 = vpop.xlane.xlu0 %1090 }
 0xead   : > { %v1095_v33 = vcvt.f32.s32 %v1093_v30  ;;  %v1094_v35 = vcvt.f32.s32 %v1091_v31 }
 0xeaf   : > { %v1096_v34 = vshll.u32 %v1095_v33, 16 }
 0xeb1   : > { %v1097_v37 = vadd.s32 %v1096_v34, %v1094_v35 }
 0xeb3   : > { %vm1098_vm9 = vcmp.ge.s32.totalorder %v1097_v37, %v2205_v62 }
 0xeb4   : > { %v1099_v38 = vsel %vm1098_vm9, %v1082_v21, %v1078_v17  ;;  %v1100_v39 = vsel %vm1098_vm9, %v1079_v18, %v1082_v21 }
 0xeb5   : > { %v1101_v41 = vsub.s32 %v1100_v39, %v1099_v38 }
 0xeb7   : > { %v1102_v43 = vshra.s32 %v1101_v41, 1 }
 0xeb9   : > { %v1103_v44 = vadd.s32 %v1102_v43, %v1099_v38 }
 0xebb   : > { %vm1104_vm10 = vcmp.gt.s32.totalorder %v2164_v36, %v1103_v44 }
 0xebc   : > { %v1105_v46 = vsel %vm1104_vm10, 1, %v1971_v3 }
 0xebd   : > { %v1106_v47 = vsel %vm500_vm11, %v1105_v46, 0 }
 0xebe   : > { %v1108_v50 = vshrl.u32 %v1106_v47, 16  ;;  %v1107_v51 = vand.u32 65535, %v1106_v47 }
 0xec0   : > { %v1110_v25 = vcvt.s32.f32 %v1108_v50  ;;  %v1109_v53 = vcvt.s32.f32 %v1107_v51 }
 0xec2   : > { %1113 = vadd.xlane.f32.xlu1 %v1110_v25  ;;  %1111 = vadd.xlane.f32.xlu0 %v1109_v53 }
 0xf4b   : > { %v1114_v54 = vpop.xlane.xlu1 %1113  ;;  %v1112_v55 = vpop.xlane.xlu0 %1111 }
 0xf4c   : > { %v1116_v56 = vcvt.f32.s32 %v1114_v54  ;;  %v1115_v58 = vcvt.f32.s32 %v1112_v55 }
 0xf4e   : > { %v1117_v57 = vshll.u32 %v1116_v56, 16 }
 0xf50   : > { %v1118_v59 = vadd.s32 %v1117_v57, %v1115_v58 }
 0xf52   : > { %vm1119_vm13 = vcmp.ge.s32.totalorder %v1118_v59, %v2205_v62 }
 0xf53   : > { %v1120_v60 = vsel %vm1119_vm13, %v1103_v44, %v1099_v38  ;;  %v1121_v61 = vsel %vm1119_vm13, %v1100_v39, %v1103_v44 }
 0xf54   : > { %v1122_v0 = vsub.s32 %v1121_v61, %v1120_v60 }
 0xf56   : > { %v1123_v1 = vshra.s32 %v1122_v0, 1 }
 0xf58   : > { %v1124_v2 = vadd.s32 %v1123_v1, %v1120_v60 }
 0xf5a   : > { %vm1125_vm14 = vcmp.gt.s32.totalorder %v2164_v36, %v1124_v2 }
 0xf5b   : > { %v1126_v4 = vsel %vm1125_vm14, 1, %v1971_v3 }
 0xf5c   : > { %v1127_v5 = vsel %vm500_vm11, %v1126_v4, 0 }
 0xf5d   : > { %v1129_v6 = vshrl.u32 %v1127_v5, 16  ;;  %v1128_v7 = vand.u32 65535, %v1127_v5 }
 0xf5f   : > { %v1131_v9 = vcvt.s32.f32 %v1129_v6  ;;  %v1130_v10 = vcvt.s32.f32 %v1128_v7 }
 0xf61   : > { %1134 = vadd.xlane.f32.xlu1 %v1131_v9  ;;  %1132 = vadd.xlane.f32.xlu0 %v1130_v10 }
 0xfea   : > { %v1135_v11 = vpop.xlane.xlu1 %1134  ;;  %v1133_v14 = vpop.xlane.xlu0 %1132 }
 0xfeb   : > { %v1137_v15 = vcvt.f32.s32 %v1135_v11  ;;  %v1136_v17 = vcvt.f32.s32 %v1133_v14 }
 0xfed   : > { %v1138_v16 = vshll.u32 %v1137_v15, 16 }
 0xfef   : > { %v1139_v18 = vadd.s32 %v1138_v16, %v1136_v17 }
 0xff1   : > { %vm1140_vm15 = vcmp.ge.s32.totalorder %v1139_v18, %v2205_v62 }
 0xff2   : > { %v1141_v19 = vsel %vm1140_vm15, %v1124_v2, %v1120_v60  ;;  %v1142_v20 = vsel %vm1140_vm15, %v1121_v61, %v1124_v2 }
 0xff3   : > { %v1143_v21 = vsub.s32 %v1142_v20, %v1141_v19 }
 0xff5   : > { %v1144_v22 = vshra.s32 %v1143_v21, 1 }
 0xff7   : > { %v1145_v23 = vadd.s32 %v1144_v22, %v1141_v19 }
 0xff9   : > { %vm1146_vm2 = vcmp.gt.s32.totalorder %v2164_v36, %v1145_v23 }
 0xffa   : > { %v1147_v26 = vsel %vm1146_vm2, 1, %v1971_v3 }
 0xffb   : > { %v1148_v27 = vsel %vm500_vm11, %v1147_v26, 0 }
 0xffc   : > { %v1150_v28 = vshrl.u32 %v1148_v27, 16  ;;  %v1149_v29 = vand.u32 65535, %v1148_v27 }
 0xffe   : > { %v1152_v30 = vcvt.s32.f32 %v1150_v28  ;;  %v1151_v31 = vcvt.s32.f32 %v1149_v29 }
0x1000   : > { %1155 = vadd.xlane.f32.xlu1 %v1152_v30  ;;  %1153 = vadd.xlane.f32.xlu0 %v1151_v31 }
0x1089   : > { %v1156_v33 = vpop.xlane.xlu1 %1155  ;;  %v1154_v34 = vpop.xlane.xlu0 %1153 }
0x108a   : > { %v1158_v35 = vcvt.f32.s32 %v1156_v33  ;;  %v1157_v38 = vcvt.f32.s32 %v1154_v34 }
0x108c   : > { %v1159_v37 = vshll.u32 %v1158_v35, 16 }
0x108e   : > { %v1160_v39 = vadd.s32 %v1159_v37, %v1157_v38 }
0x1090   : > { %vm1161_vm3 = vcmp.ge.s32.totalorder %v1160_v39, %v2205_v62 }
0x1091   : > { %v1162_v41 = vsel %vm1161_vm3, %v1145_v23, %v1141_v19  ;;  %v1163_v43 = vsel %vm1161_vm3, %v1142_v20, %v1145_v23 }
0x1092   : > { %v1164_v44 = vsub.s32 %v1163_v43, %v1162_v41 }
0x1094   : > { %v1165_v46 = vshra.s32 %v1164_v44, 1 }
0x1096   : > { %v1166_v47 = vadd.s32 %v1165_v46, %v1162_v41 }
0x1098   : > { %vm1167_vm4 = vcmp.gt.s32.totalorder %v2164_v36, %v1166_v47 }
0x1099   : > { %v1168_v50 = vsel %vm1167_vm4, 1, %v1971_v3 }
0x109a   : > { %v1169_v51 = vsel %vm500_vm11, %v1168_v50, 0 }
0x109b   : > { %v1171_v25 = vshrl.u32 %v1169_v51, 16  ;;  %v1170_v53 = vand.u32 65535, %v1169_v51 }
0x109d   : > { %v1173_v54 = vcvt.s32.f32 %v1171_v25  ;;  %v1172_v55 = vcvt.s32.f32 %v1170_v53 }
0x109f   : > { %1176 = vadd.xlane.f32.xlu1 %v1173_v54  ;;  %1174 = vadd.xlane.f32.xlu0 %v1172_v55 }
0x1128   : > { %v1177_v56 = vpop.xlane.xlu1 %1176  ;;  %v1175_v57 = vpop.xlane.xlu0 %1174 }
0x1129   : > { %v1179_v58 = vcvt.f32.s32 %v1177_v56  ;;  %v1178_v60 = vcvt.f32.s32 %v1175_v57 }
0x112b   : > { %v1180_v59 = vshll.u32 %v1179_v58, 16 }
0x112d   : > { %v1181_v61 = vadd.s32 %v1180_v59, %v1178_v60 }
0x112f   : > { %vm1182_vm6 = vcmp.ge.s32.totalorder %v1181_v61, %v2205_v62 }
0x1130   : > { %v1183_v0 = vsel %vm1182_vm6, %v1166_v47, %v1162_v41  ;;  %v1184_v1 = vsel %vm1182_vm6, %v1163_v43, %v1166_v47 }
0x1131   : > { %v1185_v2 = vsub.s32 %v1184_v1, %v1183_v0 }
0x1133   : > { %v1186_v4 = vshra.s32 %v1185_v2, 1 }
0x1135   : > { %v1187_v5 = vadd.s32 %v1186_v4, %v1183_v0 }
0x1137   : > { %vm1188_vm7 = vcmp.gt.s32.totalorder %v2164_v36, %v1187_v5 }
0x1138   : > { %v1189_v6 = vsel %vm1188_vm7, 1, %v1971_v3 }
0x1139   : > { %v1190_v7 = vsel %vm500_vm11, %v1189_v6, 0 }
0x113a   : > { %v1192_v9 = vshrl.u32 %v1190_v7, 16  ;;  %v1191_v10 = vand.u32 65535, %v1190_v7 }
0x113c   : > { %v1194_v11 = vcvt.s32.f32 %v1192_v9  ;;  %v1193_v14 = vcvt.s32.f32 %v1191_v10 }
0x113e   : > { %1197 = vadd.xlane.f32.xlu1 %v1194_v11  ;;  %1195 = vadd.xlane.f32.xlu0 %v1193_v14 }
0x11c7   : > { %v1198_v15 = vpop.xlane.xlu1 %1197  ;;  %v1196_v16 = vpop.xlane.xlu0 %1195 }
0x11c8   : > { %v1200_v17 = vcvt.f32.s32 %v1198_v15  ;;  %v1199_v19 = vcvt.f32.s32 %v1196_v16 }
0x11ca   : > { %v1201_v18 = vshll.u32 %v1200_v17, 16 }
0x11cc   : > { %v1202_v20 = vadd.s32 %v1201_v18, %v1199_v19 }
0x11ce   : > { %vm1203_vm8 = vcmp.ge.s32.totalorder %v1202_v20, %v2205_v62 }
0x11cf   : > { %v1204_v21 = vsel %vm1203_vm8, %v1187_v5, %v1183_v0  ;;  %v1205_v22 = vsel %vm1203_vm8, %v1184_v1, %v1187_v5 }
0x11d0   : > { %v1206_v23 = vsub.s32 %v1205_v22, %v1204_v21 }
0x11d2   : > { %v1207_v26 = vshra.s32 %v1206_v23, 1 }
0x11d4   : > { %v1208_v27 = vadd.s32 %v1207_v26, %v1204_v21 }
0x11d6   : > { %vm1209_vm9 = vcmp.gt.s32.totalorder %v2164_v36, %v1208_v27 }
0x11d7   : > { %v1210_v28 = vsel %vm1209_vm9, 1, %v1971_v3 }
0x11d8   : > { %v1211_v29 = vsel %vm500_vm11, %v1210_v28, 0 }
0x11d9   : > { %v1213_v30 = vshrl.u32 %v1211_v29, 16  ;;  %v1212_v31 = vand.u32 65535, %v1211_v29 }
0x11db   : > { %v1215_v33 = vcvt.s32.f32 %v1213_v30  ;;  %v1214_v34 = vcvt.s32.f32 %v1212_v31 }
0x11dd   : > { %1218 = vadd.xlane.f32.xlu1 %v1215_v33  ;;  %1216 = vadd.xlane.f32.xlu0 %v1214_v34 }
0x1266   : > { %v1219_v35 = vpop.xlane.xlu1 %1218  ;;  %v1217_v37 = vpop.xlane.xlu0 %1216 }
0x1267   : > { %v1221_v38 = vcvt.f32.s32 %v1219_v35  ;;  %v1220_v41 = vcvt.f32.s32 %v1217_v37 }
0x1269   : > { %v1222_v39 = vshll.u32 %v1221_v38, 16 }
0x126b   : > { %v1223_v43 = vadd.s32 %v1222_v39, %v1220_v41 }
0x126d   : > { %vm1224_vm10 = vcmp.ge.s32.totalorder %v1223_v43, %v2205_v62 }
0x126e   : > { %v1225_v44 = vsel %vm1224_vm10, %v1208_v27, %v1204_v21  ;;  %v1226_v46 = vsel %vm1224_vm10, %v1205_v22, %v1208_v27 }
0x126f   : > { %v1227_v47 = vsub.s32 %v1226_v46, %v1225_v44 }
0x1271   : > { %v1228_v50 = vshra.s32 %v1227_v47, 1 }
0x1273   : > { %v1229_v51 = vadd.s32 %v1228_v50, %v1225_v44 }
0x1275   : > { %vm1230_vm13 = vcmp.gt.s32.totalorder %v2164_v36, %v1229_v51 }
0x1276   : > { %v1231_v25 = vsel %vm1230_vm13, 1, %v1971_v3 }
0x1277   : > { %v1232_v53 = vsel %vm500_vm11, %v1231_v25, 0 }
0x1278   : > { %v1234_v54 = vshrl.u32 %v1232_v53, 16  ;;  %v1233_v55 = vand.u32 65535, %v1232_v53 }
0x127a   : > { %v1236_v56 = vcvt.s32.f32 %v1234_v54  ;;  %v1235_v57 = vcvt.s32.f32 %v1233_v55 }
0x127c   : > { %1239 = vadd.xlane.f32.xlu1 %v1236_v56  ;;  %1237 = vadd.xlane.f32.xlu0 %v1235_v57 }
0x1305   : > { %v1240_v58 = vpop.xlane.xlu1 %1239  ;;  %v1238_v59 = vpop.xlane.xlu0 %1237 }
0x1306   : > { %v1242_v60 = vcvt.f32.s32 %v1240_v58  ;;  %v1241_v0 = vcvt.f32.s32 %v1238_v59 }
0x1308   : > { %v1243_v61 = vshll.u32 %v1242_v60, 16 }
0x130a   : > { %v1244_v1 = vadd.s32 %v1243_v61, %v1241_v0 }
0x130c   : > { %vm1245_vm14 = vcmp.ge.s32.totalorder %v1244_v1, %v2205_v62 }
0x130d   : > { %v1246_v2 = vsel %vm1245_vm14, %v1229_v51, %v1225_v44  ;;  %v1247_v4 = vsel %vm1245_vm14, %v1226_v46, %v1229_v51 }
0x130e   : > { %v1248_v5 = vsub.s32 %v1247_v4, %v1246_v2 }
0x1310   : > { %v1249_v6 = vshra.s32 %v1248_v5, 1 }
0x1312   : > { %v1250_v7 = vadd.s32 %v1249_v6, %v1246_v2 }
0x1314   : > { %vm1251_vm15 = vcmp.gt.s32.totalorder %v2164_v36, %v1250_v7 }
0x1315   : > { %v1252_v9 = vsel %vm1251_vm15, 1, %v1971_v3 }
0x1316   : > { %v1253_v10 = vsel %vm500_vm11, %v1252_v9, 0 }
0x1317   : > { %v1255_v11 = vshrl.u32 %v1253_v10, 16  ;;  %v1254_v14 = vand.u32 65535, %v1253_v10 }
0x1319   : > { %v1257_v15 = vcvt.s32.f32 %v1255_v11  ;;  %v1256_v16 = vcvt.s32.f32 %v1254_v14 }
0x131b   : > { %1260 = vadd.xlane.f32.xlu1 %v1257_v15  ;;  %1258 = vadd.xlane.f32.xlu0 %v1256_v16 }
0x13a4   : > { %v1261_v17 = vpop.xlane.xlu1 %1260  ;;  %v1259_v18 = vpop.xlane.xlu0 %1258 }
0x13a5   : > { %v1263_v19 = vcvt.f32.s32 %v1261_v17  ;;  %v1262_v21 = vcvt.f32.s32 %v1259_v18 }
0x13a7   : > { %v1264_v20 = vshll.u32 %v1263_v19, 16 }
0x13a9   : > { %v1265_v22 = vadd.s32 %v1264_v20, %v1262_v21 }
0x13ab   : > { %vm1266_vm2 = vcmp.ge.s32.totalorder %v1265_v22, %v2205_v62 }
0x13ac   : > { %v1267_v23 = vsel %vm1266_vm2, %v1250_v7, %v1246_v2  ;;  %v1268_v26 = vsel %vm1266_vm2, %v1247_v4, %v1250_v7 }
0x13ad   : > { %v1269_v27 = vsub.s32 %v1268_v26, %v1267_v23 }
0x13af   : > { %v1270_v28 = vshra.s32 %v1269_v27, 1 }
0x13b1   : > { %v1271_v29 = vadd.s32 %v1270_v28, %v1267_v23 }
0x13b3   : > { %vm1272_vm3 = vcmp.gt.s32.totalorder %v2164_v36, %v1271_v29 }
0x13b4   : > { %v1273_v30 = vsel %vm1272_vm3, 1, %v1971_v3 }
0x13b5   : > { %v1274_v31 = vsel %vm500_vm11, %v1273_v30, 0 }
0x13b6   : > { %v1276_v33 = vshrl.u32 %v1274_v31, 16  ;;  %v1275_v34 = vand.u32 65535, %v1274_v31 }
0x13b8   : > { %v1278_v35 = vcvt.s32.f32 %v1276_v33  ;;  %v1277_v37 = vcvt.s32.f32 %v1275_v34 }
0x13ba   : > { %1281 = vadd.xlane.f32.xlu1 %v1278_v35  ;;  %1279 = vadd.xlane.f32.xlu0 %v1277_v37 }
0x1443   : > { %v1282_v38 = vpop.xlane.xlu1 %1281  ;;  %v1280_v39 = vpop.xlane.xlu0 %1279 }
0x1444   : > { %v1284_v41 = vcvt.f32.s32 %v1282_v38  ;;  %v1283_v44 = vcvt.f32.s32 %v1280_v39 }
0x1446   : > { %v1285_v43 = vshll.u32 %v1284_v41, 16 }
0x1448   : > { %v1286_v46 = vadd.s32 %v1285_v43, %v1283_v44 }
0x144a   : > { %vm1287_vm4 = vcmp.ge.s32.totalorder %v1286_v46, %v2205_v62 }
0x144b   : > { %v1288_v47 = vsel %vm1287_vm4, %v1271_v29, %v1267_v23  ;;  %v1289_v50 = vsel %vm1287_vm4, %v1268_v26, %v1271_v29 }
0x144c   : > { %v1290_v51 = vsub.s32 %v1289_v50, %v1288_v47 }
0x144e   : > { %v1291_v25 = vshra.s32 %v1290_v51, 1 }
0x1450   : > { %v1292_v53 = vadd.s32 %v1291_v25, %v1288_v47 }
0x1452   : > { %vm1293_vm6 = vcmp.gt.s32.totalorder %v2164_v36, %v1292_v53 }
0x1453   : > { %v1294_v54 = vsel %vm1293_vm6, 1, %v1971_v3 }
0x1454   : > { %v1295_v55 = vsel %vm500_vm11, %v1294_v54, 0 }
0x1455   : > { %v1297_v56 = vshrl.u32 %v1295_v55, 16  ;;  %v1296_v57 = vand.u32 65535, %v1295_v55 }
0x1457   : > { %v1299_v58 = vcvt.s32.f32 %v1297_v56  ;;  %v1298_v59 = vcvt.s32.f32 %v1296_v57 }
0x1459   : > { %1302 = vadd.xlane.f32.xlu1 %v1299_v58  ;;  %1300 = vadd.xlane.f32.xlu0 %v1298_v59 }
0x14e2   : > { %v1303_v60 = vpop.xlane.xlu1 %1302  ;;  %v1301_v61 = vpop.xlane.xlu0 %1300 }
0x14e3   : > { %v1305_v0 = vcvt.f32.s32 %v1303_v60  ;;  %v1304_v2 = vcvt.f32.s32 %v1301_v61 }
0x14e5   : > { %v1306_v1 = vshll.u32 %v1305_v0, 16 }
0x14e7   : > { %v1307_v4 = vadd.s32 %v1306_v1, %v1304_v2 }
0x14e9   : > { %vm1308_vm7 = vcmp.ge.s32.totalorder %v1307_v4, %v2205_v62 }
0x14ea   : > { %v1309_v5 = vsel %vm1308_vm7, %v1292_v53, %v1288_v47  ;;  %v1310_v6 = vsel %vm1308_vm7, %v1289_v50, %v1292_v53  ;;  %vm1432_vm7 = vcmp.le.s32.totalorder %v2084_v48, 63 }
0x14eb   : > { %v1311_v7 = vsub.s32 %v1310_v6, %v1309_v5 }
0x14ed   : > { %v1312_v9 = vshra.s32 %v1311_v7, 1 }
0x14ef   : > { %v1313_v10 = vadd.s32 %v1312_v9, %v1309_v5 }
0x14f1   : > { %vm1314_vm8 = vcmp.gt.s32.totalorder %v2164_v36, %v1313_v10 }
0x14f2   : > { %v1315_v11 = vsel %vm1314_vm8, 1, %v1971_v3 }
0x14f3   : > { %v1316_v14 = vsel %vm500_vm11, %v1315_v11, 0 }
0x14f4   : > { %v1318_v15 = vshrl.u32 %v1316_v14, 16  ;;  %v1317_v16 = vand.u32 65535, %v1316_v14 }
0x14f6   : > { %v1320_v17 = vcvt.s32.f32 %v1318_v15  ;;  %v1319_v18 = vcvt.s32.f32 %v1317_v16 }
0x14f8   : > { %1323 = vadd.xlane.f32.xlu1 %v1320_v17  ;;  %1321 = vadd.xlane.f32.xlu0 %v1319_v18 }
0x1581   : > { %v1324_v19 = vpop.xlane.xlu1 %1323  ;;  %v1322_v20 = vpop.xlane.xlu0 %1321 }
0x1582   : > { %v1326_v21 = vcvt.f32.s32 %v1324_v19  ;;  %v1325_v23 = vcvt.f32.s32 %v1322_v20 }
0x1584   : > { %v1327_v22 = vshll.u32 %v1326_v21, 16 }
0x1586   : > { %v1328_v26 = vadd.s32 %v1327_v22, %v1325_v23 }
0x1588   : > { %vm1329_vm9 = vcmp.ge.s32.totalorder %v1328_v26, %v2205_v62 }
0x1589   : > { %v1330_v27 = vsel %vm1329_vm9, %v1313_v10, %v1309_v5  ;;  %v1331_v28 = vsel %vm1329_vm9, %v1310_v6, %v1313_v10 }
0x158a   : > { %v1332_v29 = vsub.s32 %v1331_v28, %v1330_v27 }
0x158c   : > { %v1333_v30 = vshra.s32 %v1332_v29, 1 }
0x158e   : > { %v1334_v31 = vadd.s32 %v1333_v30, %v1330_v27 }
0x1590   : > { %vm1335_vm10 = vcmp.gt.s32.totalorder %v2164_v36, %v1334_v31 }
0x1591   : > { %v1336_v33 = vsel %vm1335_vm10, 1, %v1971_v3 }
0x1592   : > { %v1337_v34 = vsel %vm500_vm11, %v1336_v33, 0 }
0x1593   : > { %v1339_v35 = vshrl.u32 %v1337_v34, 16  ;;  %v1338_v37 = vand.u32 65535, %v1337_v34 }
0x1595   : > { %v1341_v38 = vcvt.s32.f32 %v1339_v35  ;;  %v1340_v39 = vcvt.s32.f32 %v1338_v37 }
0x1597   : > { %1344 = vadd.xlane.f32.xlu1 %v1341_v38  ;;  %1342 = vadd.xlane.f32.xlu0 %v1340_v39 }
0x1620   : > { %v1345_v41 = vpop.xlane.xlu1 %1344  ;;  %v1343_v43 = vpop.xlane.xlu0 %1342 }
0x1621   : > { %v1347_v44 = vcvt.f32.s32 %v1345_v41  ;;  %v1346_v47 = vcvt.f32.s32 %v1343_v43 }
0x1623   : > { %v1348_v46 = vshll.u32 %v1347_v44, 16 }
0x1625   : > { %v1349_v50 = vadd.s32 %v1348_v46, %v1346_v47 }
0x1627   : > { %vm1350_vm13 = vcmp.ge.s32.totalorder %v1349_v50, %v2205_v62 }
0x1628   : > { %v1351_v51 = vsel %vm1350_vm13, %v1334_v31, %v1330_v27  ;;  %v1352_v25 = vsel %vm1350_vm13, %v1331_v28, %v1334_v31 }
0x1629   : > { %v1353_v53 = vsub.s32 %v1352_v25, %v1351_v51 }
0x162b   : > { %v1354_v54 = vshra.s32 %v1353_v53, 1 }
0x162d   : > { %v1355_v55 = vadd.s32 %v1354_v54, %v1351_v51 }
0x162f   : > { %vm1356_vm14 = vcmp.gt.s32.totalorder %v2164_v36, %v1355_v55 }
0x1630   : > { %v1357_v56 = vsel %vm1356_vm14, 1, %v1971_v3 }
0x1631   : > { %v1358_v57 = vsel %vm500_vm11, %v1357_v56, 0 }
0x1632   : > { %v1360_v58 = vshrl.u32 %v1358_v57, 16  ;;  %v1359_v59 = vand.u32 65535, %v1358_v57 }
0x1634   : > { %v1362_v60 = vcvt.s32.f32 %v1360_v58  ;;  %v1361_v61 = vcvt.s32.f32 %v1359_v59 }
0x1636   : > { %1365 = vadd.xlane.f32.xlu1 %v1362_v60  ;;  %1363 = vadd.xlane.f32.xlu0 %v1361_v61 }
0x16bf   : > { %v1366_v0 = vpop.xlane.xlu1 %1365  ;;  %v1364_v1 = vpop.xlane.xlu0 %1363 }
0x16c0   : > { %v1368_v2 = vcvt.f32.s32 %v1366_v0  ;;  %v1367_v5 = vcvt.f32.s32 %v1364_v1 }
0x16c2   : > { %v1369_v4 = vshll.u32 %v1368_v2, 16 }
0x16c4   : > { %v1370_v6 = vadd.s32 %v1369_v4, %v1367_v5 }
0x16c6   : > { %vm1371_vm15 = vcmp.ge.s32.totalorder %v1370_v6, %v2205_v62 }
0x16c7   : > { %v1372_v7 = vsel %vm1371_vm15, %v1355_v55, %v1351_v51  ;;  %v1373_v9 = vsel %vm1371_vm15, %v1352_v25, %v1355_v55 }
0x16c8   : > { %v1374_v10 = vsub.s32 %v1373_v9, %v1372_v7 }
0x16ca   : > { %v1375_v11 = vshra.s32 %v1374_v10, 1 }
0x16cc   : > { %v1376_v14 = vadd.s32 %v1375_v11, %v1372_v7 }
0x16ce   : > { %vm1377_vm2 = vcmp.gt.s32.totalorder %v2164_v36, %v1376_v14 }
0x16cf   : > { %v1378_v15 = vsel %vm1377_vm2, 1, %v1971_v3 }
0x16d0   : > { %v1379_v16 = vsel %vm500_vm11, %v1378_v15, 0 }
0x16d1   : > { %v1381_v17 = vshrl.u32 %v1379_v16, 16  ;;  %v1380_v18 = vand.u32 65535, %v1379_v16 }
0x16d3   : > { %v1383_v19 = vcvt.s32.f32 %v1381_v17  ;;  %v1382_v20 = vcvt.s32.f32 %v1380_v18 }
0x16d5   : > { %1386 = vadd.xlane.f32.xlu1 %v1383_v19  ;;  %1384 = vadd.xlane.f32.xlu0 %v1382_v20 }
0x175e   : > { %v1387_v21 = vpop.xlane.xlu1 %1386  ;;  %v1385_v22 = vpop.xlane.xlu0 %1384 }
0x175f   : > { %v1389_v23 = vcvt.f32.s32 %v1387_v21  ;;  %v1388_v27 = vcvt.f32.s32 %v1385_v22  ;;  %v1978_v22 = vmov 63  }
0x1761   : > { %v1390_v26 = vshll.u32 %v1389_v23, 16 }
0x1763   : > { %v1391_v28 = vadd.s32 %v1390_v26, %v1388_v27  ;;  %v1979_v26 = vmov 127  }
0x1765   : > { %vm1392_vm3 = vcmp.ge.s32.totalorder %v1391_v28, %v2205_v62 }
0x1766   : > { %v1393_v29 = vsel %vm1392_vm3, %v1376_v14, %v1372_v7  ;;  %v1394_v30 = vsel %vm1392_vm3, %v1373_v9, %v1376_v14 }
0x1767   : > { %v1395_v31 = vsub.s32 %v1394_v30, %v1393_v29 }
0x1769   : > { %v1396_v33 = vshra.s32 %v1395_v31, 1 }
0x176b   : > { %v1397_v34 = vadd.s32 %v1396_v33, %v1393_v29 }
0x176d   : > { %vm1398_vm4 = vcmp.gt.s32.totalorder %v2164_v36, %v1397_v34 }
0x176e   : > { %v1399_v35 = vsel %vm1398_vm4, 1, %v1971_v3 }
0x176f   : > { %v1400_v37 = vsel %vm500_vm11, %v1399_v35, 0 }
0x1770   : > { %v1402_v38 = vshrl.u32 %v1400_v37, 16  ;;  %v1401_v39 = vand.u32 65535, %v1400_v37 }
0x1772   : > { %v1404_v41 = vcvt.s32.f32 %v1402_v38  ;;  %v1403_v43 = vcvt.s32.f32 %v1401_v39 }
0x1774   : > { %1407 = vadd.xlane.f32.xlu1 %v1404_v41  ;;  %1405 = vadd.xlane.f32.xlu0 %v1403_v43 }
0x17fd   : > { %v1408_v44 = vpop.xlane.xlu1 %1407  ;;  %v1406_v46 = vpop.xlane.xlu0 %1405 }
0x17fe   : > { %v1410_v47 = vcvt.f32.s32 %v1408_v44  ;;  %v1409_v51 = vcvt.f32.s32 %v1406_v46 }
0x1800   : > { %v1411_v50 = vshll.u32 %v1410_v47, 16 }
0x1802   : > { %v1412_v25 = vadd.s32 %v1411_v50, %v1409_v51 }
0x1804   : > { %vm1413_vm6 = vcmp.ge.s32.totalorder %v1412_v25, %v2205_v62 }
0x1805   : > { %v2333_v53 = vsel %vm1413_vm6, %v1394_v30, %v1397_v34 }
0x1806   : > { %vm1415_vm8 = vcmp.gt.s32.totalorder %v2164_v36, %v2333_v53  ;;  %vm2339_vm9 = vcmp.eq.s32.totalorder %v2164_v36, %v2333_v53 }
0x1807   : > { %v1417_v55 = vsel %vm1415_vm8, 1, %v1971_v3  ;;  %vm1433_vm10 = vmand %vm2339_vm9, %vm1432_vm7 }
0x1808   : > { %v1418_v56 = vsel %vm500_vm11, %v1417_v55, 0  ;;  %v1434_v57 = vsel %vm1433_vm10, 1, %v1971_v3 }
0x1809   : > { %v1420_v58 = vshrl.u32 %v1418_v56, 16  ;;  %v1419_v59 = vand.u32 65535, %v1418_v56  ;;  %v1435_v60 = vsel %vm500_vm11, %v1434_v57, 0 }
0x180a   : > { %v1437_v1 = vshrl.u32 %v1435_v60, 16  ;;  %v1436_v2 = vand.u32 65535, %v1435_v60 }
0x180b   : > { %v1422_v61 = vcvt.s32.f32 %v1420_v58  ;;  %v1421_v0 = vcvt.s32.f32 %v1419_v59 }
0x180c   : > { %v1439_v4 = vcvt.s32.f32 %v1437_v1  ;;  %v1438_v5 = vcvt.s32.f32 %v1436_v2 }
0x180d   : > { %1425 = vadd.xlane.f32.xlu1 %v1422_v61  ;;  %1423 = vadd.xlane.f32.xlu0 %v1421_v0 }
0x1811   : > { %1442 = vadd.xlane.f32.xlu1 %v1439_v4  ;;  %1440 = vadd.xlane.f32.xlu0 %v1438_v5 }
0x1896   : > { %v1426_v6 = vpop.xlane.xlu1 %1425  ;;  %v1424_v7 = vpop.xlane.xlu0 %1423 }
0x1897   : > { %v1428_v9 = vcvt.f32.s32 %v1426_v6  ;;  %v1427_v11 = vcvt.f32.s32 %v1424_v7 }
0x1899   : > { %v1429_v10 = vshll.u32 %v1428_v9, 16 }
0x189a   : > { %v1443_v14 = vpop.xlane.xlu1 %1442  ;;  %v1441_v15 = vpop.xlane.xlu0 %1440 }
0x189b   : > { %v1430_v16 = vadd.s32 %v1429_v10, %v1427_v11  ;;  %v1445_v17 = vcvt.f32.s32 %v1443_v14  ;;  %v1444_v19 = vcvt.f32.s32 %v1441_v15 }
0x189d   : > { %v1446_v18 = vshll.u32 %v1445_v17, 16  ;;  %v2353_v20 = vsub.s32 %v2205_v62, %v1430_v16 }
0x189f   : > { %v1447_v21 = vadd.s32 %v1446_v18, %v1444_v19 }
0x18a1   : > { %vm1448_vm13 = vcmp.ge.s32.totalorder %v1447_v21, %v2353_v20 }
0x18a2   : > { %v1449_v23 = vsel %vm1448_vm13, 4294967295, %v1978_v22  ;;  %v1450_v27 = vsel %vm1448_vm13, 63, %v1979_v26 }
0x18a3   : > { %v1451_v28 = vsub.s32 %v1450_v27, %v1449_v23 }
0x18a5   : > { %v1452_v29 = vshra.s32 %v1451_v28, 1 }
0x18a7   : > { %v1453_v30 = vadd.s32 %v1452_v29, %v1449_v23 }
0x18a9   : > { %vm1454_vm14 = vcmp.le.s32.totalorder %v2084_v48, %v1453_v30 }
0x18aa   : > { %vm1455_vm15 = vmand %vm2339_vm9, %vm1454_vm14 }
0x18ab   : > { %v1456_v31 = vsel %vm1455_vm15, 1, %v1971_v3 }
0x18ac   : > { %v1457_v62 = vsel %vm500_vm11, %v1456_v31, 0 }
0x18ad   : > { %v1459_v33 = vshrl.u32 %v1457_v62, 16  ;;  %v1458_v34 = vand.u32 65535, %v1457_v62 }
0x18af   : > { %v1461_v35 = vcvt.s32.f32 %v1459_v33  ;;  %v1460_v37 = vcvt.s32.f32 %v1458_v34 }
0x18b1   : > { %1464 = vadd.xlane.f32.xlu1 %v1461_v35  ;;  %1462 = vadd.xlane.f32.xlu0 %v1460_v37 }
0x193a   : > { %v1465_v38 = vpop.xlane.xlu1 %1464  ;;  %v1463_v39 = vpop.xlane.xlu0 %1462 }
0x193b   : > { %v1467_v41 = vcvt.f32.s32 %v1465_v38  ;;  %v1466_v44 = vcvt.f32.s32 %v1463_v39 }
0x193d   : > { %v1468_v43 = vshll.u32 %v1467_v41, 16 }
0x193f   : > { %v1469_v46 = vadd.s32 %v1468_v43, %v1466_v44 }
0x1941   : > { %vm1470_vm2 = vcmp.ge.s32.totalorder %v1469_v46, %v2353_v20 }
0x1942   : > { %v1471_v47 = vsel %vm1470_vm2, %v1449_v23, %v1453_v30  ;;  %v1472_v50 = vsel %vm1470_vm2, %v1453_v30, %v1450_v27 }
0x1943   : > { %v1473_v51 = vsub.s32 %v1472_v50, %v1471_v47 }
0x1945   : > { %v1474_v25 = vshra.s32 %v1473_v51, 1 }
0x1947   : > { %v1475_v55 = vadd.s32 %v1474_v25, %v1471_v47 }
0x1949   : > { %vm1476_vm3 = vcmp.le.s32.totalorder %v2084_v48, %v1475_v55 }
0x194a   : > { %vm1477_vm4 = vmand %vm2339_vm9, %vm1476_vm3 }
0x194b   : > { %v1478_v56 = vsel %vm1477_vm4, 1, %v1971_v3 }
0x194c   : > { %v1479_v57 = vsel %vm500_vm11, %v1478_v56, 0 }
0x194d   : > { %v1481_v58 = vshrl.u32 %v1479_v57, 16  ;;  %v1480_v59 = vand.u32 65535, %v1479_v57 }
0x194f   : > { %v1483_v60 = vcvt.s32.f32 %v1481_v58  ;;  %v1482_v61 = vcvt.s32.f32 %v1480_v59 }
0x1951   : > { %1486 = vadd.xlane.f32.xlu1 %v1483_v60  ;;  %1484 = vadd.xlane.f32.xlu0 %v1482_v61 }
0x19da   : > { %v1487_v0 = vpop.xlane.xlu1 %1486  ;;  %v1485_v1 = vpop.xlane.xlu0 %1484 }
0x19db   : > { %v1489_v2 = vcvt.f32.s32 %v1487_v0  ;;  %v1488_v5 = vcvt.f32.s32 %v1485_v1 }
0x19dd   : > { %v1490_v4 = vshll.u32 %v1489_v2, 16 }
0x19df   : > { %v1491_v6 = vadd.s32 %v1490_v4, %v1488_v5 }
0x19e1   : > { %vm1492_vm6 = vcmp.ge.s32.totalorder %v1491_v6, %v2353_v20 }
0x19e2   : > { %v1493_v7 = vsel %vm1492_vm6, %v1471_v47, %v1475_v55  ;;  %v1494_v9 = vsel %vm1492_vm6, %v1475_v55, %v1472_v50 }
0x19e3   : > { %v1495_v10 = vsub.s32 %v1494_v9, %v1493_v7 }
0x19e5   : > { %v1496_v11 = vshra.s32 %v1495_v10, 1 }
0x19e7   : > { %v1497_v14 = vadd.s32 %v1496_v11, %v1493_v7 }
0x19e9   : > { %vm1498_vm7 = vcmp.le.s32.totalorder %v2084_v48, %v1497_v14 }
0x19ea   : > { %vm1499_vm10 = vmand %vm2339_vm9, %vm1498_vm7 }
0x19eb   : > { %v1500_v15 = vsel %vm1499_vm10, 1, %v1971_v3 }
0x19ec   : > { %v1501_v16 = vsel %vm500_vm11, %v1500_v15, 0 }
0x19ed   : > { %v1503_v17 = vshrl.u32 %v1501_v16, 16  ;;  %v1502_v18 = vand.u32 65535, %v1501_v16 }
0x19ef   : > { %v1505_v19 = vcvt.s32.f32 %v1503_v17  ;;  %v1504_v21 = vcvt.s32.f32 %v1502_v18 }
0x19f1   : > { %1508 = vadd.xlane.f32.xlu1 %v1505_v19  ;;  %1506 = vadd.xlane.f32.xlu0 %v1504_v21 }
0x1a7a   : > { %v1509_v22 = vpop.xlane.xlu1 %1508  ;;  %v1507_v23 = vpop.xlane.xlu0 %1506 }
0x1a7b   : > { %v1511_v26 = vcvt.f32.s32 %v1509_v22  ;;  %v1510_v28 = vcvt.f32.s32 %v1507_v23 }
0x1a7d   : > { %v1512_v27 = vshll.u32 %v1511_v26, 16 }
0x1a7f   : > { %v1513_v29 = vadd.s32 %v1512_v27, %v1510_v28  ;;  %v518_v28 = vrot.slane %v2149_v63, 6 }
0x1a81   : > { %vm1514_vm13 = vcmp.ge.s32.totalorder %v1513_v29, %v2353_v20  ;;  %v520_v29 = vsub.f32 %v2149_v63, %v518_v28 }
0x1a82   : > { %v1515_v30 = vsel %vm1514_vm13, %v1493_v7, %v1497_v14  ;;  %v1516_v31 = vsel %vm1514_vm13, %v1497_v14, %v1494_v9 }
0x1a83   : > { %v1517_v62 = vsub.s32 %v1516_v31, %v1515_v30 }
0x1a85   : > { %v1518_v33 = vshra.s32 %v1517_v62, 1 }
0x1a87   : > { %v1519_v34 = vadd.s32 %v1518_v33, %v1515_v30  ;;  %v248_v33 = vld [vmem:[#allocation2 + $0x6] sm:$0x3] }
0x1a89   : > { %vm1520_vm14 = vcmp.le.s32.totalorder %v2084_v48, %v1519_v34 }
0x1a8a   : > { %vm1521_vm15 = vmand %vm2339_vm9, %vm1520_vm14 }
0x1a8b   : > { %v1522_v35 = vsel %vm1521_vm15, 1, %v1971_v3 }
0x1a8c   : > { %v1523_v37 = vsel %vm500_vm11, %v1522_v35, 0 }
0x1a8d   : > { %v1525_v38 = vshrl.u32 %v1523_v37, 16  ;;  %v1524_v39 = vand.u32 65535, %v1523_v37  ;;  %v525_v37 = vrot.slane %v248_v33, 6 }
0x1a8f   : > { %v1527_v41 = vcvt.s32.f32 %v1525_v38  ;;  %v1526_v43 = vcvt.s32.f32 %v1524_v39 }
0x1a91   : > { %1530 = vadd.xlane.f32.xlu1 %v1527_v41  ;;  %1528 = vadd.xlane.f32.xlu0 %v1526_v43 }
0x1b1a   : > { %v1531_v44 = vpop.xlane.xlu1 %1530  ;;  %v1529_v46 = vpop.xlane.xlu0 %1528 }
0x1b1b   : > { %v1533_v47 = vcvt.f32.s32 %v1531_v44  ;;  %v1532_v51 = vcvt.f32.s32 %v1529_v46  ;;  %v1872_v46 = vld [vmem:[#allocation2] sm:$0x3] }
0x1b1d   : > { %v1534_v50 = vshll.u32 %v1533_v47, 16 }
0x1b1f   : > { %v1535_v25 = vadd.s32 %v1534_v50, %v1532_v51 }
0x1b21   : > { %vm1536_vm2 = vcmp.ge.s32.totalorder %v1535_v25, %v2353_v20 }
0x1b22   : > { %v1537_v55 = vsel %vm1536_vm2, %v1515_v30, %v1519_v34  ;;  %v1538_v56 = vsel %vm1536_vm2, %v1519_v34, %v1516_v31  ;;  %v521_v30 = vmax.f32 %v520_v29, 1e-20  ;;  %v512_v31 = vrot.slane %v2149_v63, 2 }
0x1b23   : > { %v1539_v57 = vsub.s32 %v1538_v56, %v1537_v55  ;;  %v705_v29 = vsel %vm500_vm11, %v2200_v52, 0.0 }
0x1b24   : > { %1870 = vlog2.f32 %v521_v30  ;;  %v514_v34 = vadd.f32 %v512_v31, %v2149_v63  ;;  %v506_v31 = vsel %vm500_vm11, %v2168_v40, 0.0 }
0x1b25   : > { %v1540_v58 = vshra.s32 %v1539_v57, 1 }
0x1b26   : > { %v515_v38 = vmul.f32 0.5, %v514_v34 }
0x1b27   : > { %v1541_v59 = vadd.s32 %v1540_v58, %v1537_v55 }
0x1b28   : > { %v516_v47 = vsub.f32 %v515_v38, %v1872_v46 }
0x1b29   : > { %vm1542_vm3 = vcmp.le.s32.totalorder %v2084_v48, %v1541_v59 }
0x1b2a   : > { %vm1543_vm4 = vmand %vm2339_vm9, %vm1542_vm3 }
0x1b2b   : > { %v1544_v60 = vsel %vm1543_vm4, 1, %v1971_v3  ;;  %vm618_vm4 = vcmask 1047558  }
0x1b2c   : > { %v1545_v61 = vsel %vm500_vm11, %v1544_v60, 0 }
0x1b2d   : > { %v1547_v0 = vshrl.u32 %v1545_v61, 16  ;;  %v1546_v1 = vand.u32 65535, %v1545_v61 }
0x1b2f   : > { %v1549_v2 = vcvt.s32.f32 %v1547_v0  ;;  %v1548_v4 = vcvt.s32.f32 %v1546_v1  ;;  %v599_v0 = vand.u32 2147483647, %v2172_v42  ;;  %v603_v1 = vmul.f32 0.5, %v2172_v42 }
0x1b31   : > { %1552 = vadd.xlane.f32.xlu1 %v1549_v2  ;;  %1550 = vadd.xlane.f32.xlu0 %v1548_v4  ;;  %v1871_v62 = vpop.eup %1870  ;;  %v1874_v2 = vld [vmem:[%s2121_s29] sm:$0xff]  ;;  %vm601_vm2 = vcmp.lt.f32.partialorder %v599_v0, 1.0 }
0x1b32   : > { %v523_v35 = vmul.f32 0.6931472, %v1871_v62 }
0x1b34   : > { %v527_v43 = vsub.f32 %v523_v35, %v525_v37 }
0x1b36   : > { %v528_v25 = vmul.f32 5.0, %v527_v43 }
0x1bba   : > { %v1553_v5 = vpop.xlane.xlu1 %1552  ;;  %v1551_v6 = vpop.xlane.xlu0 %1550 }
0x1bbb   : > { %v1555_v7 = vcvt.f32.s32 %v1553_v5  ;;  %v1554_v10 = vcvt.f32.s32 %v1551_v6  ;;  %v605_v6 = vmul.f32 %v603_v1, %v2172_v42  ;;  %v1634_v1 = vrot.slane %v2202_v49, %v2177_v45 }
0x1bbd   : > { %v1556_v9 = vshll.u32 %v1555_v7, 16  ;;  %v1772_v7 = vadd.f32 -0.5, %v599_v0 }
0x1bbf   : > { %v1557_v11 = vadd.s32 %v1556_v9, %v1554_v10 }
0x1bc1   : > { %vm1558_vm6 = vcmp.ge.s32.totalorder %v1557_v11, %v2353_v20 }
0x1bc2   : > { %v1559_v14 = vsel %vm1558_vm6, %v1537_v55, %v1541_v59  ;;  %v1560_v15 = vsel %vm1558_vm6, %v1541_v59, %v1538_v56  ;;  %v1873_v56 = vld [vmem:[#allocation2 + $0x4] sm:$0x3] }
0x1bc3   : > { %v1561_v16 = vsub.s32 %v1560_v15, %v1559_v14  ;;  %v517_v57 = vmul.f32 %v1873_v56, %v516_v47 }
0x1bc5   : > { %v1562_v17 = vshra.s32 %v1561_v16, 1  ;;  %v530_v60 = vsel %vm529_vm0, %v517_v57, %v528_v25 }
0x1bc6   : > { %v531_v4 = vsub.f32 %v1874_v2, %v530_v60 }
0x1bc7   : > { %v1563_v18 = vadd.s32 %v1562_v17, %v1559_v14  ;;  %v498_v17 = vsel %vm496_vm12, 1, %v1971_v3 }
0x1bc8   : > { %v532_v9 = vand.u32 2147483647, %v531_v4  ;;  %v534_v10 = vmul.f32 0.5, %v531_v4  ;;  %v541_v42 = vrot.slane %v498_v17, %v2177_v45 }
0x1bc9   : > { %vm1564_vm7 = vcmp.le.s32.totalorder %v2084_v48, %v1563_v18 }
0x1bca   : > { %vm1565_vm10 = vmand %vm2339_vm9, %vm1564_vm7  ;;  %vm533_vm3 = vcmp.lt.f32.partialorder %v532_v9, 1.0  ;;  %vm542_vm6 = vcmp.eq.s32.totalorder %v541_v42, 1  ;;  %vm1604_vm7 = vcmp.gt.s32.totalorder %v2353_v20, 0 }
0x1bcb   : > { %v1566_v19 = vsel %vm1565_vm10, 1, %v1971_v3 }
0x1bcc   : > { %v1567_v21 = vsel %vm500_vm11, %v1566_v19, 0  ;;  %v535_v19 = vmul.f32 %v534_v10, %v531_v4 }
0x1bcd   : > { %v1569_v22 = vshrl.u32 %v1567_v21, 16  ;;  %v1568_v23 = vand.u32 65535, %v1567_v21  ;;  %v1771_v21 = vadd.f32 -0.5, %v532_v9 }
0x1bcf   : > { %v1571_v26 = vcvt.s32.f32 %v1569_v22  ;;  %v1570_v27 = vcvt.s32.f32 %v1568_v23 }
0x1bd1   : > { %1574 = vadd.xlane.f32.xlu1 %v1571_v26  ;;  %1572 = vadd.xlane.f32.xlu0 %v1570_v27  ;;  %v537_v27 = vsel %vm533_vm3, %v535_v19, %v1771_v21 }
0x1c5a   : > { %v1575_v39 = vpop.xlane.xlu1 %1574  ;;  %v1573_v41 = vpop.xlane.xlu0 %1572 }
0x1c5b   : > { %v1577_v44 = vcvt.f32.s32 %v1575_v39  ;;  %v1576_v51 = vcvt.f32.s32 %v1573_v41 }
0x1c5d   : > { %v1578_v50 = vshll.u32 %v1577_v44, 16 }
0x1c5f   : > { %v1579_v55 = vadd.s32 %v1578_v50, %v1576_v51 }
0x1c61   : > { %vm1580_vm13 = vcmp.ge.s32.totalorder %v1579_v55, %v2353_v20 }
0x1c62   : > { %v1581_v58 = vsel %vm1580_vm13, %v1559_v14, %v1563_v18  ;;  %v1582_v63 = vsel %vm1580_vm13, %v1563_v18, %v1560_v15  ;;  %v609_v18 = vsel %vm601_vm2, %v605_v6, %v1772_v7 }
0x1c63   : > { %v1583_v59 = vsub.s32 %v1582_v63, %v1581_v58  ;;  %v616_v26 = vsel %vm2188_vm1, %v609_v18, 0.0 }
0x1c64   : > { %v619_v28 = vsel %vm618_vm4, %v616_v26, 0.0 }
0x1c65   : > { %v1584_v61 = vshra.s32 %v1583_v59, 1 }
0x1c67   : > { %v1585_v5 = vadd.s32 %v1584_v61, %v1581_v58 }
0x1c69   : > { %vm1586_vm14 = vcmp.le.s32.totalorder %v2084_v48, %v1585_v5 }
0x1c6a   : > { %vm1587_vm15 = vmand %vm2339_vm9, %vm1586_vm14 }
0x1c6b   : > { %v1588_v11 = vsel %vm1587_vm15, 1, %v1971_v3  ;;  %v543_v3 = vsel %vm542_vm6, %v537_v27, 0.0 }
0x1c6c   : > { %v1589_v14 = vsel %vm500_vm11, %v1588_v11, 0  ;;  %v545_v30 = vsel %vm544_vm5, %v543_v3, 0.0 }
0x1c6d   : > { %v1591_v15 = vshrl.u32 %v1589_v14, 16  ;;  %v1590_v16 = vand.u32 65535, %v1589_v14 }
0x1c6f   : > { %v1593_v22 = vcvt.s32.f32 %v1591_v15  ;;  %v1592_v23 = vcvt.s32.f32 %v1590_v16 }
0x1c71   : > { %1596 = vadd.xlane.f32.xlu1 %v1593_v22  ;;  %1594 = vadd.xlane.f32.xlu0 %v1592_v23 }
0x1c75   : > { %620 = vadd.xlane.f32.xlu1 %v619_v28  ;;  %622 = vadd.xlane.f32.xlu0 %v2194_v12 }
0x1c79   : > { %706 = vadd.xlane.f32.xlu0 %v705_v29  ;;  %546 = vadd.xlane.f32.xlu1 %v545_v30 }
0x1c7d   : > { %507 = vadd.xlane.f32.xlu1 %v506_v31 }
0x1cfa   : > { %v1597_v8 = vpop.xlane.xlu1 %1596  ;;  %v1595_v62 = vpop.xlane.xlu0 %1594 }
0x1cfb   : > { %v1599_v33 = vcvt.f32.s32 %v1597_v8  ;;  %v1598_v35 = vcvt.f32.s32 %v1595_v62 }
0x1cfd   : > { %v1600_v34 = vshll.u32 %v1599_v33, 16 }
0x1cfe   : > { %v621_v39 = vpop.xlane.xlu1 %620 }
0x1cff   : > { %v1601_v37 = vadd.s32 %v1600_v34, %v1598_v35  ;;  %v626_v41 = vrot.slane %v621_v39, 6 }
0x1d01   : > { %vm1602_vm1 = vcmp.ge.s32.totalorder %v1601_v37, %v2353_v20  ;;  %v623_v20 = vpop.xlane.xlu0 %622 }
0x1d02   : > { %v1603_v12 = vsel %vm1602_vm1, %v1585_v5, %v1582_v63  ;;  %v547_v44 = vpop.xlane.xlu1 %546 }
0x1d03   : > { %v1605_v52 = vsel %vm1604_vm7, %v1603_v12, 4294967295  ;;  %v548_v24 = vsel %vm544_vm5, %v547_v44, 0.0  ;;  %vm1619_vm5 = vcmp.eq.s32.totalorder %v2081_v13, 4 }
0x1d04   : > { %vm1606_vm10 = vcmp.le.s32.totalorder %v2084_v48, %v1605_v52  ;;  %v627_v48 = vrot.slane %v623_v20, 6  ;;  %v549_v46 = vrot.slane %v548_v24, 4 }
0x1d05   : > { %vm1607_vm13 = vmand %vm2339_vm9, %vm1606_vm10  ;;  %v707_v51 = vpop.xlane.xlu0 %706  ;;  %vm1615_vm9 = vcmp.eq.s32.totalorder %v2081_v13, 0 }
0x1d06   : > { %vm1608_vm14 = vmor %vm1415_vm8, %vm1607_vm13  ;;  %v628_v54 = vsel %vm529_vm0, %v626_v41, %v627_v48  ;;  %v631_v43 = vsel %vm529_vm0, %v627_v48, 0.0  ;;  %v550_v47 = vadd.f32 %v549_v46, %v548_v24  ;;  %v508_v55 = vpop.xlane.xlu1 %507  ;;  %v1624_v57 = vrot.slane %v707_v51, %v2177_v45 }
0x1d07   : > { %vm1609_vm15 = vmor %vm496_vm12, %vm1608_vm14  ;;  %v632_v36 = vadd.f32 %v631_v43, %v628_v54  ;;  %vm1620_vm0 = vcmp.eq.s32.totalorder %v2081_v13, 5  ;;  %v1629_v63 = vrot.slane %v508_v55, %v2177_v45  ;;  %vm1617_vm12 = vcmp.eq.s32.totalorder %v2081_v13, 2 }
0x1d08   : > { %v1610_v40 = vsel %vm1609_vm15, %v2157_v32, 0.0  ;;  %v551_v25 = vrot.slane %v550_v47, 2  ;;  %v1625_v60 = vsel %vm1620_vm0, %v1624_v57, 0.0  ;;  %vm1616_vm8 = vcmp.eq.s32.totalorder %v2081_v13, 1 }
0x1d09   : > { %v1611_v38 = vsel %vm500_vm11, %v1610_v40, 0.0  ;;  %v633_v53 = vrot.slane %v632_v36, 4  ;;  %v1630_v0 = vsel %vm1619_vm5, %v1629_v63, %v1625_v60  ;;  %vm1618_vm11 = vcmp.eq.s32.totalorder %v2081_v13, 3 }
0x1d0a   : > { %1612 = vadd.xlane.f32.xlu0 %v1611_v38  ;;  %v552_v58 = vadd.f32 %v551_v25, %v550_v47  ;;  %v1635_v6 = vsel %vm1618_vm11, %v1634_v1, %v1630_v0 }
0x1d0b   : > { %v634_v32 = vadd.f32 %v633_v53, %v632_v36 }
0x1d0c   : > { %v553_v61 = vrot.slane %v552_v58, 1 }
0x1d0d   : > { %v635_v50 = vrot.slane %v634_v32, 2 }
0x1d0e   : > { %v554_v7 = vadd.f32 %v553_v61, %v552_v58 }
0x1d0f   : > { %v636_v56 = vadd.f32 %v635_v50, %v634_v32 }
0x1d11   : > { %v637_v59 = vrot.slane %v636_v56, 1 }
0x1d13   : > { %v638_v5 = vadd.f32 %v637_v59, %v636_v56 }
0x1d93   : > { %v1613_v2 = vpop.xlane.xlu0 %1612 }
0x1d94   : > { %v1639_v4 = vrot.slane %v1613_v2, %v2177_v45 }
0x1d96   : > { %v1640_v9 = vsel %vm1617_vm12, %v1639_v4, %v1635_v6 }
0x1d97   : > { %v1641_v10 = vsel %vm1616_vm8, %v638_v5, %v1640_v9 }
0x1d98   : > { %v1642_v49 = vsel %vm1615_vm9, %v554_v7, %v1641_v10 }
0x1d99   : > { %1643 = vst [vmem:[%s231_s7] sm:$0xff] %v1642_v49 }
0x1d9a   : > { %1914 = shalt.err (!%p1911_p0)
}
0x1d9b   : > { %s1915_s22 = scalar_lea.hbm %s2451_s11, 128  ;;  %s1919_s28 = scalar_lea.hbm %s2492_s4, 256 }
0x1d9c   : > { %p1916_p1 = scmp.ne.s32.totalorder %s2451_s11, %s1915_s22  ;;  %p1920_p4 = scmp.lt.s32.totalorder %s2451_s11, %s2492_s4 }
0x1d9d   : > { %p1921_p7 = scmp.lt.s32.totalorder %s1919_s28, %s1915_s22 }
0x1d9e   : > { %p1917_p2 = pnand %p1916_p1, %p2044_p5 }
0x1d9f   : > { %p1922_p8 = por %p1921_p7, %p1920_p4 }
0x1da0   : > { %p1918_p3 = pneg %p1917_p2 }
0x1da2   : > { %p1923_p6 = pnand %p1922_p8, %p1918_p3 }
0x1da4   : > { %1926 = shalt.err (!%p1923_p6)
}
0x1da5   : > { %1794 = dma.vmem_to_hbm [thread:$0]  (%p2044_p5), %s1659_s8, 128, %s2451_s11, %s1645_s19  }
0x1da6 PF: > { %p1806_p9 = scmp.ge.s32.totalorder %s1965_s18, 2  ;;  %s1670_s5 = sand.u32 1, %s1953_s15  }
0x1da7   : > { %p2502_p10 = scmp.ne.s32.totalorder %s2494_s26, 0  ;;  %s1671_s6 = scalar_lea.sflag [#allocation4], %s1670_s5 }
0x1da9   : > { %p1801_p11 = pnand %p1806_p9, %p2502_p10 }
0x1dab   : > { %p1802_p12 = pneg %p1801_p11 }
0x1dad   : > { %1948 = dma.done.wait (%p1802_p12), %s1671_s6, 128  }
0x1dae   : > { %1950 = vsyncadd (%p1802_p12), %s1671_s6, 4294967168  ;;  %p15_p13 = scmp.ge.s32.totalorder %s2031_s21, 4   ;;  %s2503_s15 = smov %s1957_s16 }
0x1daf   : > { %s2504_s16 = smov %s1961_s17  ;;  %s2505_s17 = smov %s2042_s24 }
0x1db0   : > { %s2506_s18 = smov %s2031_s21  ;;  %17 = sbr.rel (!%p15_p13) target bundleno = 4 (0x4), region = 82 }
0x1db5   :  { %1676 = vsyncpa [#allocation3], 1 }
0x1db6   :  { %1678 = vsyncpa [#allocation3 + $0x1], 1 }
0x1db7   :  { %1679 = vsyncpa [#allocation4], 1 }
0x1db8   :  { %1681 = vsyncpa [#allocation4 + $0x1], 1 }

</bundles_post_ra>
